<compile_context>
chip_gen: v7x
topology: tpu7x:2x2x1
jax: 0.10.0
libtpu: 0.0.40
codegen_flags: <defaults>
</compile_context>

<pallas_src>
import functools

import jax
import jax.numpy as jnp
from jax import lax
from jax.experimental import pallas as pl
from jax.experimental.pallas import tpu as pltpu


# ----------------------------------------------------------------------------
# Pallas kernel (conv1 / conv2): out = relu?(x @ w + b), row-tiled.
# x, w are bf16; accumulate + bias + ReLU in f32; output dtype selectable.
# ----------------------------------------------------------------------------
def _mm_bias_act_kernel(x_ref, w_ref, b_ref, o_ref, *, relu):
    acc = jnp.dot(x_ref[...], w_ref[...], preferred_element_type=jnp.float32)
    acc = acc + b_ref[...]
    if relu:
        acc = jnp.maximum(acc, 0.0)
    o_ref[...] = acc.astype(o_ref.dtype)


def _pick_tm(m, max_tm=1024):
    """Largest row tile (multiple of 16, <= max_tm) that divides m exactly and
    leaves a grid of >= 2 steps (keeps both v7x TensorCores busy).  Falls back
    to a single full-M block (always legal) — no padding anywhere."""
    best = None
    for t in range(16, min(m, max_tm) + 1, 16):
        if m % t == 0 and m // t >= 2:
            best = t
    return best if best is not None else m


def matmul_bias_act(x, w, b, *, relu, out_dtype=jnp.float32):
    """x: (M, K) bf16, w: (K, N) bf16, b: (1, N) f32 -> (M, N) out_dtype."""
    m, k = x.shape
    k2, n = w.shape
    assert k == k2, (k, k2)
    tm = _pick_tm(m)
    return pl.pallas_call(
        functools.partial(_mm_bias_act_kernel, relu=relu),
        out_shape=jax.ShapeDtypeStruct((m, n), out_dtype),
        grid=(m // tm,),
        in_specs=[
            pl.BlockSpec((tm, k), lambda i: (i, 0)),   # activation row tile
            pl.BlockSpec((k, n), lambda i: (0, 0)),    # weight stays resident
            pl.BlockSpec((1, n), lambda i: (0, 0)),    # bias
        ],
        out_specs=pl.BlockSpec((tm, n), lambda i: (i, 0)),
        compiler_params=pltpu.CompilerParams(
            dimension_semantics=("parallel",)),
    )(x, w, b)


# ----------------------------------------------------------------------------
# Fused tail kernel: conv3 + conv4 + fc1 + fc2 for one image per grid step.
# Input is conv3's im2col patches (9, 512); everything downstream lives in
# registers/VMEM, only the (1, num_actions) result is written back.
# ----------------------------------------------------------------------------
def _tail_kernel(p3_ref, w3_ref, b3_ref, w4_ref, b4_ref,
                 wf1_ref, bf1_ref, wf2_ref, bf2_ref, o_ref):
    # conv3: (9, 512) @ (512, 64) + b, ReLU   (9 = 3x3 output positions)
    p3 = p3_ref[0]
    a3 = jnp.dot(p3, w3_ref[...], preferred_element_type=jnp.float32)
    a3 = jnp.maximum(a3 + b3_ref[...], 0.0)                      # (9, 64) f32

    # conv4 (3x3 kernel over the 3x3 map -> 1x1 output): sum of 9 per-tap
    # matmuls keeps everything as plain 2-D dots (no in-kernel flatten).
    taps = w4_ref.shape[0]
    acc = jnp.zeros((1, w4_ref.shape[2]), jnp.float32)
    for p in range(taps):
        acc = acc + jnp.dot(a3[p:p + 1, :].astype(jnp.bfloat16), w4_ref[p],
                            preferred_element_type=jnp.float32)
    a4 = jnp.maximum(acc + b4_ref[...], 0.0).astype(jnp.bfloat16)  # (1, 64)

    # fc1 + ReLU, fc2
    a5 = jnp.dot(a4, wf1_ref[...], preferred_element_type=jnp.float32)
    a5 = jnp.maximum(a5 + bf1_ref[...], 0.0).astype(jnp.bfloat16)  # (1, 512)
    q = jnp.dot(a5, wf2_ref[...], preferred_element_type=jnp.float32)
    q = q + bf2_ref[...]                                           # (1, A)
    o_ref[0] = q.astype(o_ref.dtype)


def fused_tail(p3, prep):
    """p3: (N, 9, 512) bf16 conv3 patches -> (N, num_actions) f32."""
    n, pp, f3 = p3.shape
    num_actions = prep["fc2_w"].shape[1]

    def full(arr):
        nd = arr.ndim
        return pl.BlockSpec(arr.shape, lambda b: (0,) * nd)

    out = pl.pallas_call(
        _tail_kernel,
        out_shape=jax.ShapeDtypeStruct((n, 1, num_actions), jnp.float32),
        grid=(n,),
        in_specs=[
            pl.BlockSpec((1, pp, f3), lambda b: (b, 0, 0)),
            full(prep["conv3_w"]), full(prep["conv3_b"]),
            full(prep["conv4_w"]), full(prep["conv4_b"]),
            full(prep["fc1_w"]), full(prep["fc1_b"]),
            full(prep["fc2_w"]), full(prep["fc2_b"]),
        ],
        out_specs=pl.BlockSpec((1, 1, num_actions), lambda b: (b, 0, 0)),
        compiler_params=pltpu.CompilerParams(
            dimension_semantics=("parallel",)),
    )(p3, prep["conv3_w"], prep["conv3_b"], prep["conv4_w"], prep["conv4_b"],
      prep["fc1_w"], prep["fc1_b"], prep["fc2_w"], prep["fc2_b"])
    return out.reshape(n, num_actions)


# ----------------------------------------------------------------------------
# Parameters (PyTorch layouts) + one-time conversion to kernel layouts.
# ----------------------------------------------------------------------------
def init_qnetwork_params(key, num_channels, num_actions, feat_dim):
    """Conv layers: kaiming_uniform (a=0) weights, zero bias (as in
    initialize_weights_he).  Head Linears: PyTorch nn.Linear default init."""
    ks = jax.random.split(key, 8)

    def he_conv(k, cout, cin, kh, kw):
        fan_in = cin * kh * kw
        bound = float(jnp.sqrt(6.0 / fan_in))
        return jax.random.uniform(k, (cout, cin, kh, kw), jnp.float32,
                                  -bound, bound)

    def torch_linear(kw_, kb_, fan_out, fan_in):
        bound = 1.0 / float(jnp.sqrt(fan_in))
        w = jax.random.uniform(kw_, (fan_out, fan_in), jnp.float32, -bound, bound)
        b = jax.random.uniform(kb_, (fan_out,), jnp.float32, -bound, bound)
        return w, b

    fc1_w, fc1_b = torch_linear(ks[4], ks[5], 512, feat_dim)
    fc2_w, fc2_b = torch_linear(ks[6], ks[7], num_actions, 512)
    return {
        "conv1_w": he_conv(ks[0], 32, num_channels, 8, 8),
        "conv1_b": jnp.zeros((32,), jnp.float32),
        "conv2_w": he_conv(ks[1], 32, 32, 8, 8),
        "conv2_b": jnp.zeros((32,), jnp.float32),
        "conv3_w": he_conv(ks[2], 64, 32, 4, 4),
        "conv3_b": jnp.zeros((64,), jnp.float32),
        "conv4_w": he_conv(ks[3], 64, 64, 3, 3),
        "conv4_b": jnp.zeros((64,), jnp.float32),
        "fc1_w": fc1_w, "fc1_b": fc1_b,
        "fc2_w": fc2_w, "fc2_b": fc2_b,
    }


def _conv_w_to_mat(w):
    # (Cout, Cin, kh, kw) -> (Cin*kh*kw, Cout); row order (c, i, j) matches the
    # channel-major / spatial-minor feature order that
    # lax.conv_general_dilated_patches produces.
    cout, cin, kh, kw = w.shape
    return jnp.transpose(w, (1, 2, 3, 0)).reshape(cin * kh * kw, cout)


def prepare_params(params):
    """One-time conversion: matmul weights -> bf16 matrices, biases -> (1, N) f32."""
    bf16 = jnp.bfloat16
    cout4, cin4, kh4, kw4 = params["conv4_w"].shape
    return {
        "conv1_w": _conv_w_to_mat(params["conv1_w"]).astype(bf16),
        "conv1_b": params["conv1_b"].reshape(1, -1),
        "conv2_w": _conv_w_to_mat(params["conv2_w"]).astype(bf16),
        "conv2_b": params["conv2_b"].reshape(1, -1),
        "conv3_w": _conv_w_to_mat(params["conv3_w"]).astype(bf16),
        "conv3_b": params["conv3_b"].reshape(1, -1),
        # conv4 runs in the fused tail as 9 per-tap matmuls: tap p = i*kw + j
        # acts on conv3 output position p = ho*3 + wo.
        "conv4_w": jnp.transpose(params["conv4_w"], (2, 3, 1, 0))
                      .reshape(kh4 * kw4, cin4, cout4).astype(bf16),
        "conv4_b": params["conv4_b"].reshape(1, -1),
        # conv4's spatial output is 1x1 for the supported input size, so the
        # NCHW flatten the PyTorch head consumes equals the channel vector and
        # only a transpose of the Linear weights is needed (no runtime permute).
        # TODO(synk): for inputs whose conv stack keeps >1x1 spatial extent,
        # also permute fc1_w rows from (C,H,W) to (H,W,C) order.
        "fc1_w": params["fc1_w"].T.astype(bf16),
        "fc1_b": params["fc1_b"].reshape(1, -1),
        "fc2_w": params["fc2_w"].T.astype(bf16),
        "fc2_b": params["fc2_b"].reshape(1, -1),
    }


# ----------------------------------------------------------------------------
# Forward
# ----------------------------------------------------------------------------
def _patches(x, ksize, stride):
    # One fused XLA op: (N, H, W, C) -> (N, Ho, Wo, C*kh*kw), feature order
    # (c, i, j) == channel-major, filter-spatial-minor.
    return lax.conv_general_dilated_patches(
        x, (ksize, ksize), (stride, stride), "VALID",
        dimension_numbers=("NHWC", "HWIO", "NHWC"))


@jax.jit
def qnetwork_forward(prep, states):
    """states: (N, H, W, C) float32 NHWC — the same input the PyTorch module
    takes (its internal NHWC->NCHW permute is folded into the weights)."""
    n = states.shape[0]
    x = states.astype(jnp.bfloat16)

    # conv1 (8x8 / s4) + ReLU  — Pallas matmul, row-tiled.
    p1 = _patches(x, 8, 4)
    _, h1, w1, f1 = p1.shape
    a1 = matmul_bias_act(p1.reshape(n * h1 * w1, f1),
                         prep["conv1_w"], prep["conv1_b"],
                         relu=True, out_dtype=jnp.bfloat16)
    a1 = a1.reshape(n, h1, w1, 32)

    # conv2 (8x8 / s4) + ReLU  — Pallas matmul, grid over batch.
    p2 = _patches(a1, 8, 4)
    _, h2, w2, f2 = p2.shape
    a2 = matmul_bias_act(p2.reshape(n * h2 * w2, f2),
                         prep["conv2_w"], prep["conv2_b"],
                         relu=True, out_dtype=jnp.bfloat16)
    a2 = a2.reshape(n, h2, w2, 32)

    # conv3 + conv4 + fc1 + fc2 fused into one Pallas kernel; only conv3's
    # im2col patches are materialized.
    p3 = _patches(a2, 4, 2)
    _, h3, w3, f3 = p3.shape
    if (h3, w3) != (3, 3):
        raise ValueError("fused tail kernel expects a 3x3 conv3 output "
                         f"(got {h3}x{w3}); use 148x148 inputs")
    return fused_tail(p3.reshape(n, h3 * w3, f3), prep)


if __name__ == "__main__":
    key = jax.random.PRNGKey(0)
    k_x, k_p = jax.random.split(key)

    # Smallest spatial size that survives the conv stack: 148 -> 36 -> 8 -> 3 -> 1.
    batch, H, W, C = 2, 148, 148, 4
    num_actions = 6

    states = jax.random.uniform(k_x, (batch, H, W, C), dtype=jnp.float32)

    def _o(s, k, st):
        return (s - k) // st + 1

    h_out = _o(_o(_o(_o(H, 8, 4), 8, 4), 4, 2), 3, 1)
    feat_dim = 64 * h_out * h_out   # = 64 for 148x148 inputs

    # TODO(synk): the PyTorch module hard-codes nn.Linear(4096 + 6, 512), which
    # is inconsistent with its own conv flatten; the head input here is sized
    # to the actual flattened feature dim.
    params = init_qnetwork_params(k_p, C, num_actions, feat_dim)
    prep = prepare_params(params)

    q = qnetwork_forward(prep, states)
    q = jax.block_until_ready(q)
    assert q.shape == (batch, num_actions) and q.dtype == jnp.float32
    print("KERNEL_OK")
</pallas_src>

<mosaic_0001>
module attributes {stable_mosaic.version = 11 : i64} {
  func.func @_mm_bias_act_kernel(%arg0: i32, %arg1: memref<864x256xbf16, #tpu.memory_space<vmem>>, %arg2: memref<256x32xbf16, #tpu.memory_space<vmem>>, %arg3: memref<1x32xf32, #tpu.memory_space<vmem>>, %arg4: memref<864x32xbf16, #tpu.memory_space<vmem>>) attributes {dimension_semantics = [#tpu.dimension_semantics<parallel>], iteration_bounds = array<i64: 3>, scalar_prefetch = 0 : i64, scratch_operands = 0 : i64, tpu.core_type = #tpu.core_type<tc>, window_params = [{transform_indices = @transform_0, window_bounds = array<i64: 864, 256>}, {pipeline_mode = #tpu.pipeline_mode<synchronous>, transform_indices = @transform_1, window_bounds = array<i64: 256, 32>}, {pipeline_mode = #tpu.pipeline_mode<synchronous>, transform_indices = @transform_2, window_bounds = array<i64: 1, 32>}, {transform_indices = @transform_3, window_bounds = array<i64: 864, 32>}]} {
    %c0 = arith.constant 0 : index
    %c0_0 = arith.constant 0 : index
    %0 = vector.load %arg1[%c0, %c0_0] : memref<864x256xbf16, #tpu.memory_space<vmem>>, vector<864x256xbf16>
    %c0_1 = arith.constant 0 : index
    %c0_2 = arith.constant 0 : index
    %1 = vector.load %arg2[%c0_1, %c0_2] : memref<256x32xbf16, #tpu.memory_space<vmem>>, vector<256x32xbf16>
    %cst = arith.constant dense<0.000000e+00> : vector<864x32xf32>
    %2 = tpu.matmul %0, %1, %cst {dimension_numbers = #tpu.dot_dimension_numbers<[1], [0], [0], [1], [0, 0, 1, 1], [], []>} : vector<864x256xbf16>, vector<256x32xbf16>, vector<864x32xf32> -> vector<864x32xf32>
    %c0_3 = arith.constant 0 : index
    %c0_4 = arith.constant 0 : index
    %3 = vector.load %arg3[%c0_3, %c0_4] : memref<1x32xf32, #tpu.memory_space<vmem>>, vector<1x32xf32>
    %4 = vector.broadcast %3 : vector<1x32xf32> to vector<864x32xf32>
    %5 = arith.addf %2, %4 : vector<864x32xf32>
    %cst_5 = arith.constant 0.000000e+00 : f32
    %6 = vector.broadcast %cst_5 : f32 to vector<864x32xf32>
    %7 = arith.maximumf %5, %6 : vector<864x32xf32>
    %8 = arith.truncf %7 : vector<864x32xf32> to vector<864x32xbf16>
    %c0_6 = arith.constant 0 : index
    %c0_7 = arith.constant 0 : index
    %9 = vector.load %arg4[%c0_6, %c0_7] : memref<864x32xbf16, #tpu.memory_space<vmem>>, vector<864x32xbf16>
    tpu.vector_store %arg4[%c0_6, %c0_7], %8 {strides = array<i32>} : memref<864x32xbf16, #tpu.memory_space<vmem>>, vector<864x32xbf16>,
    return
  }
  func.func @transform_0(%arg0: i32) -> (i32, i32) {
    %c0_i32 = arith.constant 0 : i32
    %c0_i32_0 = arith.constant 0 : i32
    return %arg0, %c0_i32 : i32, i32
  }
  func.func @transform_1(%arg0: i32) -> (i32, i32) {
    %c0_i32 = arith.constant 0 : i32
    %c0_i32_0 = arith.constant 0 : i32
    %c0_i32_1 = arith.constant 0 : i32
    return %c0_i32, %c0_i32_0 : i32, i32
  }
  func.func @transform_2(%arg0: i32) -> (i32, i32) {
    %c0_i32 = arith.constant 0 : i32
    %c0_i32_0 = arith.constant 0 : i32
    %c0_i32_1 = arith.constant 0 : i32
    return %c0_i32, %c0_i32_0 : i32, i32
  }
  func.func @transform_3(%arg0: i32) -> (i32, i32) {
    %c0_i32 = arith.constant 0 : i32
    %c0_i32_0 = arith.constant 0 : i32
    return %arg0, %c0_i32 : i32, i32
  }
}

module attributes {stable_mosaic.version = 11 : i64} {
  func.func @_mm_bias_act_kernel(%arg0: i32, %arg1: memref<64x2048xbf16, #tpu.memory_space<vmem>>, %arg2: memref<2048x32xbf16, #tpu.memory_space<vmem>>, %arg3: memref<1x32xf32, #tpu.memory_space<vmem>>, %arg4: memref<64x32xbf16, #tpu.memory_space<vmem>>) attributes {dimension_semantics = [#tpu.dimension_semantics<parallel>], iteration_bounds = array<i64: 2>, scalar_prefetch = 0 : i64, scratch_operands = 0 : i64, tpu.core_type = #tpu.core_type<tc>, window_params = [{transform_indices = @transform_0, window_bounds = array<i64: 64, 2048>}, {pipeline_mode = #tpu.pipeline_mode<synchronous>, transform_indices = @transform_1, window_bounds = array<i64: 2048, 32>}, {pipeline_mode = #tpu.pipeline_mode<synchronous>, transform_indices = @transform_2, window_bounds = array<i64: 1, 32>}, {transform_indices = @transform_3, window_bounds = array<i64: 64, 32>}]} {
    %c0 = arith.constant 0 : index
    %c0_0 = arith.constant 0 : index
    %0 = vector.load %arg1[%c0, %c0_0] : memref<64x2048xbf16, #tpu.memory_space<vmem>>, vector<64x2048xbf16>
    %c0_1 = arith.constant 0 : index
    %c0_2 = arith.constant 0 : index
    %1 = vector.load %arg2[%c0_1, %c0_2] : memref<2048x32xbf16, #tpu.memory_space<vmem>>, vector<2048x32xbf16>
    %cst = arith.constant dense<0.000000e+00> : vector<64x32xf32>
    %2 = tpu.matmul %0, %1, %cst {dimension_numbers = #tpu.dot_dimension_numbers<[1], [0], [0], [1], [0, 0, 1, 1], [], []>} : vector<64x2048xbf16>, vector<2048x32xbf16>, vector<64x32xf32> -> vector<64x32xf32>
    %c0_3 = arith.constant 0 : index
    %c0_4 = arith.constant 0 : index
    %3 = vector.load %arg3[%c0_3, %c0_4] : memref<1x32xf32, #tpu.memory_space<vmem>>, vector<1x32xf32>
    %4 = vector.broadcast %3 : vector<1x32xf32> to vector<64x32xf32>
    %5 = arith.addf %2, %4 : vector<64x32xf32>
    %cst_5 = arith.constant 0.000000e+00 : f32
    %6 = vector.broadcast %cst_5 : f32 to vector<64x32xf32>
    %7 = arith.maximumf %5, %6 : vector<64x32xf32>
    %8 = arith.truncf %7 : vector<64x32xf32> to vector<64x32xbf16>
    %c0_6 = arith.constant 0 : index
    %c0_7 = arith.constant 0 : index
    %9 = vector.load %arg4[%c0_6, %c0_7] : memref<64x32xbf16, #tpu.memory_space<vmem>>, vector<64x32xbf16>
    tpu.vector_store %arg4[%c0_6, %c0_7], %8 {strides = array<i32>} : memref<64x32xbf16, #tpu.memory_space<vmem>>, vector<64x32xbf16>,
    return
  }
  func.func @transform_0(%arg0: i32) -> (i32, i32) {
    %c0_i32 = arith.constant 0 : i32
    %c0_i32_0 = arith.constant 0 : i32
    return %arg0, %c0_i32 : i32, i32
  }
  func.func @transform_1(%arg0: i32) -> (i32, i32) {
    %c0_i32 = arith.constant 0 : i32
    %c0_i32_0 = arith.constant 0 : i32
    %c0_i32_1 = arith.constant 0 : i32
    return %c0_i32, %c0_i32_0 : i32, i32
  }
  func.func @transform_2(%arg0: i32) -> (i32, i32) {
    %c0_i32 = arith.constant 0 : i32
    %c0_i32_0 = arith.constant 0 : i32
    %c0_i32_1 = arith.constant 0 : i32
    return %c0_i32, %c0_i32_0 : i32, i32
  }
  func.func @transform_3(%arg0: i32) -> (i32, i32) {
    %c0_i32 = arith.constant 0 : i32
    %c0_i32_0 = arith.constant 0 : i32
    return %arg0, %c0_i32 : i32, i32
  }
}

module attributes {stable_mosaic.version = 11 : i64} {
  func.func @_tail_kernel(%arg0: i32, %arg1: memref<1x9x512xbf16, #tpu.memory_space<vmem>>, %arg2: memref<512x64xbf16, #tpu.memory_space<vmem>>, %arg3: memref<1x64xf32, #tpu.memory_space<vmem>>, %arg4: memref<9x64x64xbf16, #tpu.memory_space<vmem>>, %arg5: memref<1x64xf32, #tpu.memory_space<vmem>>, %arg6: memref<64x512xbf16, #tpu.memory_space<vmem>>, %arg7: memref<1x512xf32, #tpu.memory_space<vmem>>, %arg8: memref<512x6xbf16, #tpu.memory_space<vmem>>, %arg9: memref<1x6xf32, #tpu.memory_space<vmem>>, %arg10: memref<1x1x6xf32, #tpu.memory_space<vmem>>) attributes {dimension_semantics = [#tpu.dimension_semantics<parallel>], iteration_bounds = array<i64: 2>, scalar_prefetch = 0 : i64, scratch_operands = 0 : i64, tpu.core_type = #tpu.core_type<tc>, window_params = [{transform_indices = @transform_0, window_bounds = array<i64: 1, 9, 512>}, {pipeline_mode = #tpu.pipeline_mode<synchronous>, transform_indices = @transform_1, window_bounds = array<i64: 512, 64>}, {pipeline_mode = #tpu.pipeline_mode<synchronous>, transform_indices = @transform_2, window_bounds = array<i64: 1, 64>}, {pipeline_mode = #tpu.pipeline_mode<synchronous>, transform_indices = @transform_3, window_bounds = array<i64: 9, 64, 64>}, {pipeline_mode = #tpu.pipeline_mode<synchronous>, transform_indices = @transform_4, window_bounds = array<i64: 1, 64>}, {pipeline_mode = #tpu.pipeline_mode<synchronous>, transform_indices = @transform_5, window_bounds = array<i64: 64, 512>}, {pipeline_mode = #tpu.pipeline_mode<synchronous>, transform_indices = @transform_6, window_bounds = array<i64: 1, 512>}, {pipeline_mode = #tpu.pipeline_mode<synchronous>, transform_indices = @transform_7, window_bounds = array<i64: 512, 6>}, {pipeline_mode = #tpu.pipeline_mode<synchronous>, transform_indices = @transform_8, window_bounds = array<i64: 1, 6>}, {transform_indices = @transform_9, window_bounds = array<i64: 1, 1, 6>}]} {
    %c0 = arith.constant 0 : index
    %c0_0 = arith.constant 0 : index
    %c0_1 = arith.constant 0 : index
    %0 = vector.load %arg1[%c0, %c0_0, %c0_1] : memref<1x9x512xbf16, #tpu.memory_space<vmem>>, vector<1x9x512xbf16>
    %1 = vector.shape_cast %0 : vector<1x9x512xbf16> to vector<9x512xbf16>
    %c0_2 = arith.constant 0 : index
    %c0_3 = arith.constant 0 : index
    %2 = vector.load %arg2[%c0_2, %c0_3] : memref<512x64xbf16, #tpu.memory_space<vmem>>, vector<512x64xbf16>
    %cst = arith.constant dense<0.000000e+00> : vector<9x64xf32>
    %3 = tpu.matmul %1, %2, %cst {dimension_numbers = #tpu.dot_dimension_numbers<[1], [0], [0], [1], [0, 0, 1, 1], [], []>} : vector<9x512xbf16>, vector<512x64xbf16>, vector<9x64xf32> -> vector<9x64xf32>
    %c0_4 = arith.constant 0 : index
    %c0_5 = arith.constant 0 : index
    %4 = vector.load %arg3[%c0_4, %c0_5] : memref<1x64xf32, #tpu.memory_space<vmem>>, vector<1x64xf32>
    %5 = vector.broadcast %4 : vector<1x64xf32> to vector<9x64xf32>
    %6 = arith.addf %3, %5 : vector<9x64xf32>
    %cst_6 = arith.constant 0.000000e+00 : f32
    %7 = vector.broadcast %cst_6 : f32 to vector<9x64xf32>
    %8 = arith.maximumf %6, %7 : vector<9x64xf32>
    %cst_7 = arith.constant 0.000000e+00 : f32
    %9 = vector.broadcast %cst_7 : f32 to vector<1x64xf32>
    %10 = vector.extract_strided_slice %8 {offsets = [0, 0], sizes = [1, 64], strides = [1, 1]} : vector<9x64xf32> to vector<1x64xf32>
    %11 = arith.truncf %10 : vector<1x64xf32> to vector<1x64xbf16>
    %c0_8 = arith.constant 0 : index
    %c0_9 = arith.constant 0 : index
    %c0_10 = arith.constant 0 : index
    %12 = vector.load %arg4[%c0_8, %c0_9, %c0_10] : memref<9x64x64xbf16, #tpu.memory_space<vmem>>, vector<1x64x64xbf16>
    %13 = vector.shape_cast %12 : vector<1x64x64xbf16> to vector<64x64xbf16>
    %cst_11 = arith.constant dense<0.000000e+00> : vector<1x64xf32>
    %14 = tpu.matmul %11, %13, %cst_11 {dimension_numbers = #tpu.dot_dimension_numbers<[1], [0], [0], [1], [0, 0, 1, 1], [], []>} : vector<1x64xbf16>, vector<64x64xbf16>, vector<1x64xf32> -> vector<1x64xf32>
    %15 = arith.addf %9, %14 : vector<1x64xf32>
    %16 = vector.extract_strided_slice %8 {offsets = [1, 0], sizes = [1, 64], strides = [1, 1]} : vector<9x64xf32> to vector<1x64xf32>
    %17 = arith.truncf %16 : vector<1x64xf32> to vector<1x64xbf16>
    %c1 = arith.constant 1 : index
    %c0_12 = arith.constant 0 : index
    %c0_13 = arith.constant 0 : index
    %18 = vector.load %arg4[%c1, %c0_12, %c0_13] : memref<9x64x64xbf16, #tpu.memory_space<vmem>>, vector<1x64x64xbf16>
    %19 = vector.shape_cast %18 : vector<1x64x64xbf16> to vector<64x64xbf16>
    %cst_14 = arith.constant dense<0.000000e+00> : vector<1x64xf32>
    %20 = tpu.matmul %17, %19, %cst_14 {dimension_numbers = #tpu.dot_dimension_numbers<[1], [0], [0], [1], [0, 0, 1, 1], [], []>} : vector<1x64xbf16>, vector<64x64xbf16>, vector<1x64xf32> -> vector<1x64xf32>
    %21 = arith.addf %15, %20 : vector<1x64xf32>
    %22 = vector.extract_strided_slice %8 {offsets = [2, 0], sizes = [1, 64], strides = [1, 1]} : vector<9x64xf32> to vector<1x64xf32>
    %23 = arith.truncf %22 : vector<1x64xf32> to vector<1x64xbf16>
    %c2 = arith.constant 2 : index
    %c0_15 = arith.constant 0 : index
    %c0_16 = arith.constant 0 : index
    %24 = vector.load %arg4[%c2, %c0_15, %c0_16] : memref<9x64x64xbf16, #tpu.memory_space<vmem>>, vector<1x64x64xbf16>
    %25 = vector.shape_cast %24 : vector<1x64x64xbf16> to vector<64x64xbf16>
    %cst_17 = arith.constant dense<0.000000e+00> : vector<1x64xf32>
    %26 = tpu.matmul %23, %25, %cst_17 {dimension_numbers = #tpu.dot_dimension_numbers<[1], [0], [0], [1], [0, 0, 1, 1], [], []>} : vector<1x64xbf16>, vector<64x64xbf16>, vector<1x64xf32> -> vector<1x64xf32>
    %27 = arith.addf %21, %26 : vector<1x64xf32>
    %28 = vector.extract_strided_slice %8 {offsets = [3, 0], sizes = [1, 64], strides = [1, 1]} : vector<9x64xf32> to vector<1x64xf32>
    %29 = arith.truncf %28 : vector<1x64xf32> to vector<1x64xbf16>
    %c3 = arith.constant 3 : index
    %c0_18 = arith.constant 0 : index
    %c0_19 = arith.constant 0 : index
    %30 = vector.load %arg4[%c3, %c0_18, %c0_19] : memref<9x64x64xbf16, #tpu.memory_space<vmem>>, vector<1x64x64xbf16>
    %31 = vector.shape_cast %30 : vector<1x64x64xbf16> to vector<64x64xbf16>
    %cst_20 = arith.constant dense<0.000000e+00> : vector<1x64xf32>
    %32 = tpu.matmul %29, %31, %cst_20 {dimension_numbers = #tpu.dot_dimension_numbers<[1], [0], [0], [1], [0, 0, 1, 1], [], []>} : vector<1x64xbf16>, vector<64x64xbf16>, vector<1x64xf32> -> vector<1x64xf32>
    %33 = arith.addf %27, %32 : vector<1x64xf32>
    %34 = vector.extract_strided_slice %8 {offsets = [4, 0], sizes = [1, 64], strides = [1, 1]} : vector<9x64xf32> to vector<1x64xf32>
    %35 = arith.truncf %34 : vector<1x64xf32> to vector<1x64xbf16>
    %c4 = arith.constant 4 : index
    %c0_21 = arith.constant 0 : index
    %c0_22 = arith.constant 0 : index
    %36 = vector.load %arg4[%c4, %c0_21, %c0_22] : memref<9x64x64xbf16, #tpu.memory_space<vmem>>, vector<1x64x64xbf16>
    %37 = vector.shape_cast %36 : vector<1x64x64xbf16> to vector<64x64xbf16>
    %cst_23 = arith.constant dense<0.000000e+00> : vector<1x64xf32>
    %38 = tpu.matmul %35, %37, %cst_23 {dimension_numbers = #tpu.dot_dimension_numbers<[1], [0], [0], [1], [0, 0, 1, 1], [], []>} : vector<1x64xbf16>, vector<64x64xbf16>, vector<1x64xf32> -> vector<1x64xf32>
    %39 = arith.addf %33, %38 : vector<1x64xf32>
    %40 = vector.extract_strided_slice %8 {offsets = [5, 0], sizes = [1, 64], strides = [1, 1]} : vector<9x64xf32> to vector<1x64xf32>
    %41 = arith.truncf %40 : vector<1x64xf32> to vector<1x64xbf16>
    %c5 = arith.constant 5 : index
    %c0_24 = arith.constant 0 : index
    %c0_25 = arith.constant 0 : index
    %42 = vector.load %arg4[%c5, %c0_24, %c0_25] : memref<9x64x64xbf16, #tpu.memory_space<vmem>>, vector<1x64x64xbf16>
    %43 = vector.shape_cast %42 : vector<1x64x64xbf16> to vector<64x64xbf16>
    %cst_26 = arith.constant dense<0.000000e+00> : vector<1x64xf32>
    %44 = tpu.matmul %41, %43, %cst_26 {dimension_numbers = #tpu.dot_dimension_numbers<[1], [0], [0], [1], [0, 0, 1, 1], [], []>} : vector<1x64xbf16>, vector<64x64xbf16>, vector<1x64xf32> -> vector<1x64xf32>
    %45 = arith.addf %39, %44 : vector<1x64xf32>
    %46 = vector.extract_strided_slice %8 {offsets = [6, 0], sizes = [1, 64], strides = [1, 1]} : vector<9x64xf32> to vector<1x64xf32>
    %47 = arith.truncf %46 : vector<1x64xf32> to vector<1x64xbf16>
    %c6 = arith.constant 6 : index
    %c0_27 = arith.constant 0 : index
    %c0_28 = arith.constant 0 : index
    %48 = vector.load %arg4[%c6, %c0_27, %c0_28] : memref<9x64x64xbf16, #tpu.memory_space<vmem>>, vector<1x64x64xbf16>
    %49 = vector.shape_cast %48 : vector<1x64x64xbf16> to vector<64x64xbf16>
    %cst_29 = arith.constant dense<0.000000e+00> : vector<1x64xf32>
    %50 = tpu.matmul %47, %49, %cst_29 {dimension_numbers = #tpu.dot_dimension_numbers<[1], [0], [0], [1], [0, 0, 1, 1], [], []>} : vector<1x64xbf16>, vector<64x64xbf16>, vector<1x64xf32> -> vector<1x64xf32>
    %51 = arith.addf %45, %50 : vector<1x64xf32>
    %52 = vector.extract_strided_slice %8 {offsets = [7, 0], sizes = [1, 64], strides = [1, 1]} : vector<9x64xf32> to vector<1x64xf32>
    %53 = arith.truncf %52 : vector<1x64xf32> to vector<1x64xbf16>
    %c7 = arith.constant 7 : index
    %c0_30 = arith.constant 0 : index
    %c0_31 = arith.constant 0 : index
    %54 = vector.load %arg4[%c7, %c0_30, %c0_31] : memref<9x64x64xbf16, #tpu.memory_space<vmem>>, vector<1x64x64xbf16>
    %55 = vector.shape_cast %54 : vector<1x64x64xbf16> to vector<64x64xbf16>
    %cst_32 = arith.constant dense<0.000000e+00> : vector<1x64xf32>
    %56 = tpu.matmul %53, %55, %cst_32 {dimension_numbers = #tpu.dot_dimension_numbers<[1], [0], [0], [1], [0, 0, 1, 1], [], []>} : vector<1x64xbf16>, vector<64x64xbf16>, vector<1x64xf32> -> vector<1x64xf32>
    %57 = arith.addf %51, %56 : vector<1x64xf32>
    %58 = vector.extract_strided_slice %8 {offsets = [8, 0], sizes = [1, 64], strides = [1, 1]} : vector<9x64xf32> to vector<1x64xf32>
    %59 = arith.truncf %58 : vector<1x64xf32> to vector<1x64xbf16>
    %c8 = arith.constant 8 : index
    %c0_33 = arith.constant 0 : index
    %c0_34 = arith.constant 0 : index
    %60 = vector.load %arg4[%c8, %c0_33, %c0_34] : memref<9x64x64xbf16, #tpu.memory_space<vmem>>, vector<1x64x64xbf16>
    %61 = vector.shape_cast %60 : vector<1x64x64xbf16> to vector<64x64xbf16>
    %cst_35 = arith.constant dense<0.000000e+00> : vector<1x64xf32>
    %62 = tpu.matmul %59, %61, %cst_35 {dimension_numbers = #tpu.dot_dimension_numbers<[1], [0], [0], [1], [0, 0, 1, 1], [], []>} : vector<1x64xbf16>, vector<64x64xbf16>, vector<1x64xf32> -> vector<1x64xf32>
    %63 = arith.addf %57, %62 : vector<1x64xf32>
    %c0_36 = arith.constant 0 : index
    %c0_37 = arith.constant 0 : index
    %64 = vector.load %arg5[%c0_36, %c0_37] : memref<1x64xf32, #tpu.memory_space<vmem>>, vector<1x64xf32>
    %65 = arith.addf %63, %64 : vector<1x64xf32>
    %cst_38 = arith.constant 0.000000e+00 : f32
    %66 = vector.broadcast %cst_38 : f32 to vector<1x64xf32>
    %67 = arith.maximumf %65, %66 : vector<1x64xf32>
    %68 = arith.truncf %67 : vector<1x64xf32> to vector<1x64xbf16>
    %c0_39 = arith.constant 0 : index
    %c0_40 = arith.constant 0 : index
    %69 = vector.load %arg6[%c0_39, %c0_40] : memref<64x512xbf16, #tpu.memory_space<vmem>>, vector<64x512xbf16>
    %cst_41 = arith.constant dense<0.000000e+00> : vector<1x512xf32>
    %70 = tpu.matmul %68, %69, %cst_41 {dimension_numbers = #tpu.dot_dimension_numbers<[1], [0], [0], [1], [0, 0, 1, 1], [], []>} : vector<1x64xbf16>, vector<64x512xbf16>, vector<1x512xf32> -> vector<1x512xf32>
    %c0_42 = arith.constant 0 : index
    %c0_43 = arith.constant 0 : index
    %71 = vector.load %arg7[%c0_42, %c0_43] : memref<1x512xf32, #tpu.memory_space<vmem>>, vector<1x512xf32>
    %72 = arith.addf %70, %71 : vector<1x512xf32>
    %cst_44 = arith.constant 0.000000e+00 : f32
    %73 = vector.broadcast %cst_44 : f32 to vector<1x512xf32>
    %74 = arith.maximumf %72, %73 : vector<1x512xf32>
    %75 = arith.truncf %74 : vector<1x512xf32> to vector<1x512xbf16>
    %c0_45 = arith.constant 0 : index
    %c0_46 = arith.constant 0 : index
    %76 = vector.load %arg8[%c0_45, %c0_46] : memref<512x6xbf16, #tpu.memory_space<vmem>>, vector<512x6xbf16>
    %cst_47 = arith.constant dense<0.000000e+00> : vector<1x6xf32>
    %77 = tpu.matmul %75, %76, %cst_47 {dimension_numbers = #tpu.dot_dimension_numbers<[1], [0], [0], [1], [0, 0, 1, 1], [], []>} : vector<1x512xbf16>, vector<512x6xbf16>, vector<1x6xf32> -> vector<1x6xf32>
    %c0_48 = arith.constant 0 : index
    %c0_49 = arith.constant 0 : index
    %78 = vector.load %arg9[%c0_48, %c0_49] : memref<1x6xf32, #tpu.memory_space<vmem>>, vector<1x6xf32>
    %79 = arith.addf %77, %78 : vector<1x6xf32>
    %c0_50 = arith.constant 0 : index
    %c0_51 = arith.constant 0 : index
    %c0_52 = arith.constant 0 : index
    %80 = vector.load %arg10[%c0_50, %c0_51, %c0_52] : memref<1x1x6xf32, #tpu.memory_space<vmem>>, vector<1x1x6xf32>
    %81 = vector.shape_cast %80 : vector<1x1x6xf32> to vector<1x6xf32>
    %82 = vector.shape_cast %79 : vector<1x6xf32> to vector<1x1x6xf32>
    tpu.vector_store %arg10[%c0_50, %c0_51, %c0_52], %82 {strides = array<i32>} : memref<1x1x6xf32, #tpu.memory_space<vmem>>, vector<1x1x6xf32>,
    return
  }
  func.func @transform_0(%arg0: i32) -> (i32, i32, i32) {
    %c0_i32 = arith.constant 0 : i32
    %c0_i32_0 = arith.constant 0 : i32
    %c0_i32_1 = arith.constant 0 : i32
    return %arg0, %c0_i32, %c0_i32_0 : i32, i32, i32
  }
  func.func @transform_1(%arg0: i32) -> (i32, i32) {
    %c0_i32 = arith.constant 0 : i32
    %c0_i32_0 = arith.constant 0 : i32
    %c0_i32_1 = arith.constant 0 : i32
    return %c0_i32, %c0_i32_0 : i32, i32
  }
  func.func @transform_2(%arg0: i32) -> (i32, i32) {
    %c0_i32 = arith.constant 0 : i32
    %c0_i32_0 = arith.constant 0 : i32
    %c0_i32_1 = arith.constant 0 : i32
    return %c0_i32, %c0_i32_0 : i32, i32
  }
  func.func @transform_3(%arg0: i32) -> (i32, i32, i32) {
    %c0_i32 = arith.constant 0 : i32
    %c0_i32_0 = arith.constant 0 : i32
    %c0_i32_1 = arith.constant 0 : i32
    %c0_i32_2 = arith.constant 0 : i32
    return %c0_i32, %c0_i32_0, %c0_i32_1 : i32, i32, i32
  }
  func.func @transform_4(%arg0: i32) -> (i32, i32) {
    %c0_i32 = arith.constant 0 : i32
    %c0_i32_0 = arith.constant 0 : i32
    %c0_i32_1 = arith.constant 0 : i32
    return %c0_i32, %c0_i32_0 : i32, i32
  }
  func.func @transform_5(%arg0: i32) -> (i32, i32) {
    %c0_i32 = arith.constant 0 : i32
    %c0_i32_0 = arith.constant 0 : i32
    %c0_i32_1 = arith.constant 0 : i32
    return %c0_i32, %c0_i32_0 : i32, i32
  }
  func.func @transform_6(%arg0: i32) -> (i32, i32) {
    %c0_i32 = arith.constant 0 : i32
    %c0_i32_0 = arith.constant 0 : i32
    %c0_i32_1 = arith.constant 0 : i32
    return %c0_i32, %c0_i32_0 : i32, i32
  }
  func.func @transform_7(%arg0: i32) -> (i32, i32) {
    %c0_i32 = arith.constant 0 : i32
    %c0_i32_0 = arith.constant 0 : i32
    %c0_i32_1 = arith.constant 0 : i32
    return %c0_i32, %c0_i32_0 : i32, i32
  }
  func.func @transform_8(%arg0: i32) -> (i32, i32) {
    %c0_i32 = arith.constant 0 : i32
    %c0_i32_0 = arith.constant 0 : i32
    %c0_i32_1 = arith.constant 0 : i32
    return %c0_i32, %c0_i32_0 : i32, i32
  }
  func.func @transform_9(%arg0: i32) -> (i32, i32, i32) {
    %c0_i32 = arith.constant 0 : i32
    %c0_i32_0 = arith.constant 0 : i32
    %c0_i32_1 = arith.constant 0 : i32
    return %arg0, %c0_i32, %c0_i32_0 : i32, i32, i32
  }
}

</mosaic_0001>

<bundles_post_ra>
// kernel: qnetwork_forward.3
= control target key start
LH: loop header
LB: loop body
LE: loop exit
PB: predicated region body
PF: predicated region fallthrough
CT: control target
= control target key end

     0   :  { %s2732_s12 = smov 0   ;;  %s3279_s0 = inlined_call_operand.vmem [shape: bf16[2592,256], index: 0, kind: input, shape index: {}]   ;;  %s3280_s1 = inlined_call_operand.vmem [shape: bf16[256,32], index: 1, kind: input, shape index: {}]   ;;  %s3281_s2 = inlined_call_operand.vmem [shape: f32[1,32], index: 2, kind: input, shape index: {}]   ;;  %s3282_s3 = inlined_call_operand.vmem [shape: bf16[2592,32], index: 3, kind: output, shape index: {}]  }
   0x1 LB: > { %s2131_s13 = sadd.s32 4294967295, %s2709_s12   ;;  %p2135_p0 = scmp.ge.s32.totalorder %s2709_s12, 1  ;;  %s2709_s12 = sphi %s2732_s12, %s13_s12  }
   0x2   : > { %p139_p1 = scmp.lt.s32.totalorder %s2709_s12, 4 }
   0x4   : > { %p140_p2 = pnand %p2135_p0, %p139_p1 }
   0x5   : > { %v2524_v0 = vld [vmem:[%s3280_s1] sm:$0xff] (!%p140_p2)   ;;  %v2711_v1 = vmov (!%p140_p2), 0   ;;  %s164_s16 = smul.u32 (!%p140_p2), 108, %s2131_s13  ;;  %v2525_v2 = vld [vmem:[%s3280_s1 + $0x8] sm:$0xff] (!%p140_p2)   ;;  %v2526_v3 = vld [vmem:[%s3280_s1 + $0x10] sm:$0xff] (!%p140_p2)   ;;  %vm1966_vm0 = vcmask (!%p140_p2), 257024  }
   0x6   : > { %143 = sbr.rel (%p140_p2) target bundleno = 499 (0x1f3), region = 32  ;;  %961 = vmatprep.subr.bf16.mxu0 (!%p140_p2), %v2711_v1  ;;  %2483 = vmatprep.subr.bf16.mxu1 (!%p140_p2), %v2711_v1  ;;  %v2527_v4 = vld [vmem:[%s3280_s1 + $0x18] sm:$0xff] (!%p140_p2)   ;;  %v2528_v5 = vld [vmem:[%s3280_s1 + $0x20] sm:$0xff] (!%p140_p2)   ;;  %v2529_v7 = vld [vmem:[%s3280_s1 + $0x28] sm:$0xff] (!%p140_p2)  }
   0x7   : > { %962 = vmatpush1.bf16.msra.mxu0 (!%p140_p2), %v2524_v0  ;;  %2499 = vmatpush1.bf16.msra.mxu1 (!%p140_p2), %v2524_v0  ;;  %p165_p3 = scmp.lt.s32.totalorder (!%p140_p2), %s164_s16, 323  ;;  %v2530_v9 = vld [vmem:[%s3280_s1 + $0x30] sm:$0xff] (!%p140_p2)   ;;  %v2531_v10 = vld [vmem:[%s3280_s1 + $0x38] sm:$0xff] (!%p140_p2)   ;;  %v2532_v11 = vld [vmem:[%s3280_s1 + $0x40] sm:$0xff] (!%p140_p2)  }
   0x8   : > { %963 = vmatprep.subr.bf16.mxu0 (!%p140_p2), %v2711_v1  ;;  %2484 = vmatprep.subr.bf16.mxu1 (!%p140_p2), %v2711_v1  ;;  %v2533_v12 = vld [vmem:[%s3280_s1 + $0x48] sm:$0xff] (!%p140_p2)   ;;  %v2534_v13 = vld [vmem:[%s3280_s1 + $0x50] sm:$0xff] (!%p140_p2)   ;;  %v2535_v14 = vld [vmem:[%s3280_s1 + $0x58] sm:$0xff] (!%p140_p2)  }
   0x9   : > { %v2536_v15 = vld [vmem:[%s3280_s1 + $0x60] sm:$0xff] (!%p140_p2)   ;;  %v2537_v16 = vld [vmem:[%s3280_s1 + $0x68] sm:$0xff] (!%p140_p2)   ;;  %v2538_v17 = vld [vmem:[%s3280_s1 + $0x70] sm:$0xff] (!%p140_p2)  }
   0xa   : > { %v2539_v18 = vld [vmem:[%s3280_s1 + $0x78] sm:$0xff] (!%p140_p2)  }
   0xb   : > { %964 = vmatpush1.bf16.msra.mxu0 (!%p140_p2), %v2525_v2  ;;  %2500 = vmatpush1.bf16.msra.mxu1 (!%p140_p2), %v2525_v2 }
   0xc   : > { %965 = vmatprep.subr.bf16.mxu0 (!%p140_p2), %v2711_v1  ;;  %2485 = vmatprep.subr.bf16.mxu1 (!%p140_p2), %v2711_v1 }
   0xd   : > { %s3284_s16 = smov (!%p165_p3, %s164_s16), 323 }
   0xe   : > { %s2374_s23 = sshll.u32 %s3284_s16, 3  ;;  %s2138_s29 = sshll.u32 %s3284_s16, 2 }
   0xf   : > { %966 = vmatpush1.bf16.msra.mxu0 %v2526_v3  ;;  %2501 = vmatpush1.bf16.msra.mxu1 %v2526_v3  ;;  %s2769_s28 = scalar_lea.vmem %s3279_s0, %s2374_s23  ;;  %s2949_s16 = scalar_lea.vmem %s3282_s3, %s2138_s29 }
  0x10   : > { %967 = vmatprep.subr.bf16.mxu0 %v2711_v1  ;;  %2486 = vmatprep.subr.bf16.mxu1 %v2711_v1  ;;  %v2542_v6 = vld [vmem:[%s2769_s28 + $0x4] ss:$8 sps:$4 sm:$0xff]   ;;  %v2545_v8 = vld [vmem:[%s2769_s28 + $0x1b4] ss:$8 sps:$4 sm:$0xff]   ;;  %v2540_v19 = vld [vmem:[%s2769_s28] ss:$8 sps:$4 sm:$0xff]  }
  0x11   : > { %993 = vmatprep.mubr.bf16.mxu0 %v2542_v6  ;;  %1209 = vmatprep.mubr.bf16.mxu1 %v2545_v8  ;;  %v2543_v20 = vld [vmem:[%s2769_s28 + $0x1b0] ss:$8 sps:$4 sm:$0xff]   ;;  %v2546_v21 = vld [vmem:[%s2769_s28 + $0x14] ss:$8 sps:$4 sm:$0xff]   ;;  %v2548_v22 = vld [vmem:[%s2769_s28 + $0x1c4] ss:$8 sps:$4 sm:$0xff]  }
  0x12   : > { %v2550_v23 = vld [vmem:[%s2769_s28 + $0x10] ss:$8 sps:$4 sm:$0xff]   ;;  %v2551_v24 = vld [vmem:[%s2769_s28 + $0x1c0] ss:$8 sps:$4 sm:$0xff]   ;;  %v2552_v25 = vld [vmem:[%s2769_s28 + $0x24] ss:$8 sps:$4 sm:$0xff]  }
  0x13   : > { %968 = vmatpush1.bf16.msra.mxu0 %v2527_v4  ;;  %2502 = vmatpush1.bf16.msra.mxu1 %v2527_v4  ;;  %v2554_v26 = vld [vmem:[%s2769_s28 + $0x1d4] ss:$8 sps:$4 sm:$0xff]   ;;  %v2556_v27 = vld [vmem:[%s2769_s28 + $0x20] ss:$8 sps:$4 sm:$0xff]   ;;  %v2557_v28 = vld [vmem:[%s2769_s28 + $0x1d0] ss:$8 sps:$4 sm:$0xff]  }
  0x14   : > { %969 = vmatprep.subr.bf16.mxu0 %v2711_v1  ;;  %2487 = vmatprep.subr.bf16.mxu1 %v2711_v1  ;;  %v2558_v29 = vld [vmem:[%s2769_s28 + $0x34] ss:$8 sps:$4 sm:$0xff]   ;;  %v2560_v30 = vld [vmem:[%s2769_s28 + $0x1e4] ss:$8 sps:$4 sm:$0xff]   ;;  %v2562_v31 = vld [vmem:[%s2769_s28 + $0x30] ss:$8 sps:$4 sm:$0xff]  }
  0x15   : > { %v2563_v32 = vld [vmem:[%s2769_s28 + $0x1e0] ss:$8 sps:$4 sm:$0xff]   ;;  %v2564_v33 = vld [vmem:[%s2769_s28 + $0x44] ss:$8 sps:$4 sm:$0xff]   ;;  %v2566_v34 = vld [vmem:[%s2769_s28 + $0x1f4] ss:$8 sps:$4 sm:$0xff]  }
  0x16   : > { %v2568_v35 = vld [vmem:[%s2769_s28 + $0x40] ss:$8 sps:$4 sm:$0xff]   ;;  %v2569_v36 = vld [vmem:[%s2769_s28 + $0x1f0] ss:$8 sps:$4 sm:$0xff]   ;;  %v2570_v37 = vld [vmem:[%s2769_s28 + $0x54] ss:$8 sps:$4 sm:$0xff]  }
  0x17   : > { %970 = vmatpush1.bf16.msra.mxu0 %v2528_v5  ;;  %2503 = vmatpush1.bf16.msra.mxu1 %v2528_v5  ;;  %v2572_v38 = vld [vmem:[%s2769_s28 + $0x204] ss:$8 sps:$4 sm:$0xff]   ;;  %v2574_v39 = vld [vmem:[%s2769_s28 + $0x50] ss:$8 sps:$4 sm:$0xff]   ;;  %v2575_v40 = vld [vmem:[%s2769_s28 + $0x200] ss:$8 sps:$4 sm:$0xff]  }
  0x18   : > { %971 = vmatprep.subr.bf16.mxu0 %v2711_v1  ;;  %2488 = vmatprep.subr.bf16.mxu1 %v2711_v1  ;;  %v2576_v41 = vld [vmem:[%s2769_s28 + $0x64] ss:$8 sps:$4 sm:$0xff]   ;;  %v2578_v42 = vld [vmem:[%s2769_s28 + $0x214] ss:$8 sps:$4 sm:$0xff]   ;;  %v2580_v43 = vld [vmem:[%s2769_s28 + $0x60] ss:$8 sps:$4 sm:$0xff]  }
  0x19   : > { %v2581_v44 = vld [vmem:[%s2769_s28 + $0x210] ss:$8 sps:$4 sm:$0xff]   ;;  %v2582_v45 = vld [vmem:[%s2769_s28 + $0x74] ss:$8 sps:$4 sm:$0xff]   ;;  %v2584_v46 = vld [vmem:[%s2769_s28 + $0x224] ss:$8 sps:$4 sm:$0xff]  }
  0x1a   : > { %v2586_v47 = vld [vmem:[%s2769_s28 + $0x70] ss:$8 sps:$4 sm:$0xff]   ;;  %v2587_v48 = vld [vmem:[%s2769_s28 + $0x220] ss:$8 sps:$4 sm:$0xff]   ;;  %v2588_v49 = vld [vmem:[%s2769_s28 + $0x84] ss:$8 sps:$4 sm:$0xff]  }
  0x1b   : > { %972 = vmatpush1.bf16.msra.mxu0 %v2529_v7  ;;  %2504 = vmatpush1.bf16.msra.mxu1 %v2529_v7  ;;  %v2590_v50 = vld [vmem:[%s2769_s28 + $0x234] ss:$8 sps:$4 sm:$0xff]   ;;  %v2592_v51 = vld [vmem:[%s2769_s28 + $0x80] ss:$8 sps:$4 sm:$0xff]   ;;  %v2593_v52 = vld [vmem:[%s2769_s28 + $0x230] ss:$8 sps:$4 sm:$0xff]  }
  0x1c   : > { %973 = vmatprep.subr.bf16.mxu0 %v2711_v1  ;;  %2489 = vmatprep.subr.bf16.mxu1 %v2711_v1  ;;  %v2594_v53 = vld [vmem:[%s2769_s28 + $0x94] ss:$8 sps:$4 sm:$0xff]   ;;  %v2596_v54 = vld [vmem:[%s2769_s28 + $0x244] ss:$8 sps:$4 sm:$0xff]   ;;  %v2598_v55 = vld [vmem:[%s2769_s28 + $0x90] ss:$8 sps:$4 sm:$0xff]  }
  0x1d   : > { %v2599_v56 = vld [vmem:[%s2769_s28 + $0x240] ss:$8 sps:$4 sm:$0xff]   ;;  %v2600_v57 = vld [vmem:[%s2769_s28 + $0xa4] ss:$8 sps:$4 sm:$0xff]   ;;  %v2602_v58 = vld [vmem:[%s2769_s28 + $0x254] ss:$8 sps:$4 sm:$0xff]  }
  0x1e   : > { %v2604_v59 = vld [vmem:[%s2769_s28 + $0xa0] ss:$8 sps:$4 sm:$0xff]   ;;  %v2605_v60 = vld [vmem:[%s2769_s28 + $0x250] ss:$8 sps:$4 sm:$0xff]   ;;  %v2606_v61 = vld [vmem:[%s2769_s28 + $0xb4] ss:$8 sps:$4 sm:$0xff]  }
  0x1f   : > { %974 = vmatpush1.bf16.msra.mxu0 %v2530_v9  ;;  %2505 = vmatpush1.bf16.msra.mxu1 %v2530_v9  ;;  %v2608_v62 = vld [vmem:[%s2769_s28 + $0x264] ss:$8 sps:$4 sm:$0xff]   ;;  %v2610_v63 = vld [vmem:[%s2769_s28 + $0xb0] ss:$8 sps:$4 sm:$0xff]   ;;  %v2611_v0 = vld [vmem:[%s2769_s28 + $0x260] ss:$8 sps:$4 sm:$0xff]  }
  0x20   : > { %975 = vmatprep.subr.bf16.mxu0 %v2711_v1  ;;  %2490 = vmatprep.subr.bf16.mxu1 %v2711_v1  ;;  %v2614_v2 = vld [vmem:[%s2769_s28 + $0x274] ss:$8 sps:$4 sm:$0xff]   ;;  %v2616_v3 = vld [vmem:[%s2769_s28 + $0xc0] ss:$8 sps:$4 sm:$0xff]   ;;  %v2617_v4 = vld [vmem:[%s2769_s28 + $0x270] ss:$8 sps:$4 sm:$0xff]  }
  0x21   : > { %v2618_v5 = vld [vmem:[%s2769_s28 + $0xd4] ss:$8 sps:$4 sm:$0xff]   ;;  %v2620_v6 = vld [vmem:[%s2769_s28 + $0x284] ss:$8 sps:$4 sm:$0xff]   ;;  %v2622_v7 = vld [vmem:[%s2769_s28 + $0xd0] ss:$8 sps:$4 sm:$0xff]  }
  0x22   : > { %v2623_v8 = vld [vmem:[%s2769_s28 + $0x280] ss:$8 sps:$4 sm:$0xff]   ;;  %v2624_v9 = vld [vmem:[%s2769_s28 + $0xe4] ss:$8 sps:$4 sm:$0xff]  }
  0x23   : > { %976 = vmatpush1.bf16.msra.mxu0 %v2531_v10  ;;  %2506 = vmatpush1.bf16.msra.mxu1 %v2531_v10  ;;  %v2626_v10 = vld [vmem:[%s2769_s28 + $0x294] ss:$8 sps:$4 sm:$0xff]  }
  0x24   : > { %977 = vmatprep.subr.bf16.mxu0 %v2711_v1  ;;  %2491 = vmatprep.subr.bf16.mxu1 %v2711_v1 }
  0x27   : > { %978 = vmatpush1.bf16.msra.mxu0 %v2532_v11  ;;  %2507 = vmatpush1.bf16.msra.mxu1 %v2532_v11  ;;  %v2628_v11 = vld [vmem:[%s2769_s28 + $0xe0] ss:$8 sps:$4 sm:$0xff]  }
  0x28   : > { %979 = vmatprep.subr.bf16.mxu0 %v2711_v1  ;;  %2492 = vmatprep.subr.bf16.mxu1 %v2711_v1 }
  0x2b   : > { %980 = vmatpush1.bf16.msra.mxu0 %v2533_v12  ;;  %2508 = vmatpush1.bf16.msra.mxu1 %v2533_v12  ;;  %v2629_v12 = vld [vmem:[%s2769_s28 + $0x290] ss:$8 sps:$4 sm:$0xff]  }
  0x2c   : > { %981 = vmatprep.subr.bf16.mxu0 %v2711_v1  ;;  %2493 = vmatprep.subr.bf16.mxu1 %v2711_v1 }
  0x2f   : > { %982 = vmatpush1.bf16.msra.mxu0 %v2534_v13  ;;  %2509 = vmatpush1.bf16.msra.mxu1 %v2534_v13  ;;  %v2630_v13 = vld [vmem:[%s2769_s28 + $0xf4] ss:$8 sps:$4 sm:$0xff]  }
  0x30   : > { %983 = vmatprep.subr.bf16.mxu0 %v2711_v1  ;;  %2494 = vmatprep.subr.bf16.mxu1 %v2711_v1 }
  0x33   : > { %984 = vmatpush1.bf16.msra.mxu0 %v2535_v14  ;;  %2510 = vmatpush1.bf16.msra.mxu1 %v2535_v14  ;;  %v2632_v14 = vld [vmem:[%s2769_s28 + $0x2a4] ss:$8 sps:$4 sm:$0xff]  }
  0x34   : > { %985 = vmatprep.subr.bf16.mxu0 %v2711_v1  ;;  %2495 = vmatprep.subr.bf16.mxu1 %v2711_v1 }
  0x37   : > { %986 = vmatpush1.bf16.msra.mxu0 %v2536_v15  ;;  %2511 = vmatpush1.bf16.msra.mxu1 %v2536_v15  ;;  %v2634_v15 = vld [vmem:[%s2769_s28 + $0xf0] ss:$8 sps:$4 sm:$0xff]  }
  0x38   : > { %987 = vmatprep.subr.bf16.mxu0 %v2711_v1  ;;  %2496 = vmatprep.subr.bf16.mxu1 %v2711_v1 }
  0x3b   : > { %988 = vmatpush1.bf16.msra.mxu0 %v2537_v16  ;;  %2512 = vmatpush1.bf16.msra.mxu1 %v2537_v16  ;;  %v2635_v16 = vld [vmem:[%s2769_s28 + $0x2a0] ss:$8 sps:$4 sm:$0xff]  }
  0x3c   : > { %989 = vmatprep.subr.bf16.mxu0 %v2711_v1  ;;  %2497 = vmatprep.subr.bf16.mxu1 %v2711_v1 }
  0x3f   : > { %990 = vmatpush1.bf16.msra.mxu0 %v2538_v17  ;;  %2513 = vmatpush1.bf16.msra.mxu1 %v2538_v17  ;;  %v2636_v17 = vld [vmem:[%s2769_s28 + $0x104] ss:$8 sps:$4 sm:$0xff]  }
  0x40   : > { %991 = vmatprep.subr.bf16.mxu0 %v2711_v1  ;;  %2498 = vmatprep.subr.bf16.mxu1 %v2711_v1  ;;  %v2612_v1 = vld [vmem:[%s2769_s28 + $0xc4] ss:$8 sps:$4 sm:$0xff]  }
  0x43   : > { %992 = vmatpush1.bf16.msra.mxu0 %v2539_v18  ;;  %2514 = vmatpush1.bf16.msra.mxu1 %v2539_v18  ;;  %v2638_v18 = vld [vmem:[%s2769_s28 + $0x2b4] ss:$8 sps:$4 sm:$0xff]  }
  0x46   : > { %994 = vmatmul.mubr.bf16.vlgmr.msra.gmra.mrb[0].mxu0 %v2540_v19  ;;  %1210 = vmatmul.mubr.bf16.vlgmr.msra.gmra.mrb[0].mxu1 %v2543_v20  ;;  %v2640_v19 = vld [vmem:[%s2769_s28 + $0x100] ss:$8 sps:$4 sm:$0xff]   ;;  %v2641_v20 = vld [vmem:[%s2769_s28 + $0x2b0] ss:$8 sps:$4 sm:$0xff]  }
  0x47   : > { %1001 = vmatprep.mubr.bf16.mxu0 %v2546_v21  ;;  %1217 = vmatprep.mubr.bf16.mxu1 %v2548_v22  ;;  %v2642_v21 = vld [vmem:[%s2769_s28 + $0x114] ss:$8 sps:$4 sm:$0xff]   ;;  %v2644_v22 = vld [vmem:[%s2769_s28 + $0x2c4] ss:$8 sps:$4 sm:$0xff]  }
  0x4e   : > { %1002 = vmatmul.mubr.bf16.gmra.mrb[4].mxu0 %v2550_v23  ;;  %1218 = vmatmul.mubr.bf16.gmra.mrb[4].mxu1 %v2551_v24  ;;  %v2646_v23 = vld [vmem:[%s2769_s28 + $0x110] ss:$8 sps:$4 sm:$0xff]   ;;  %v2647_v24 = vld [vmem:[%s2769_s28 + $0x2c0] ss:$8 sps:$4 sm:$0xff]  }
  0x4f   : > { %1009 = vmatprep.mubr.bf16.mxu0 %v2552_v25  ;;  %1225 = vmatprep.mubr.bf16.mxu1 %v2554_v26  ;;  %v2648_v25 = vld [vmem:[%s2769_s28 + $0x124] ss:$8 sps:$4 sm:$0xff]   ;;  %v2650_v26 = vld [vmem:[%s2769_s28 + $0x2d4] ss:$8 sps:$4 sm:$0xff]  }
  0x56   : > { %1010 = vmatmul.mubr.bf16.gmra.mrb[8].mxu0 %v2556_v27  ;;  %1226 = vmatmul.mubr.bf16.gmra.mrb[8].mxu1 %v2557_v28  ;;  %v2652_v27 = vld [vmem:[%s2769_s28 + $0x120] ss:$8 sps:$4 sm:$0xff]   ;;  %v2653_v28 = vld [vmem:[%s2769_s28 + $0x2d0] ss:$8 sps:$4 sm:$0xff]  }
  0x57   : > { %1017 = vmatprep.mubr.bf16.mxu0 %v2558_v29  ;;  %1233 = vmatprep.mubr.bf16.mxu1 %v2560_v30  ;;  %v2654_v29 = vld [vmem:[%s2769_s28 + $0x134] ss:$8 sps:$4 sm:$0xff]   ;;  %v2656_v30 = vld [vmem:[%s2769_s28 + $0x2e4] ss:$8 sps:$4 sm:$0xff]  }
  0x5e   : > { %1018 = vmatmul.mubr.bf16.gmra.mrb[12].mxu0 %v2562_v31  ;;  %1234 = vmatmul.mubr.bf16.gmra.mrb[12].mxu1 %v2563_v32  ;;  %v2658_v31 = vld [vmem:[%s2769_s28 + $0x130] ss:$8 sps:$4 sm:$0xff]   ;;  %v2659_v32 = vld [vmem:[%s2769_s28 + $0x2e0] ss:$8 sps:$4 sm:$0xff]  }
  0x5f   : > { %1025 = vmatprep.mubr.bf16.mxu0 %v2564_v33  ;;  %1241 = vmatprep.mubr.bf16.mxu1 %v2566_v34  ;;  %v2660_v33 = vld [vmem:[%s2769_s28 + $0x144] ss:$8 sps:$4 sm:$0xff]   ;;  %v2662_v34 = vld [vmem:[%s2769_s28 + $0x2f4] ss:$8 sps:$4 sm:$0xff]  }
  0x66   : > { %1026 = vmatmul.mubr.bf16.gmra.mrb[16].mxu0 %v2568_v35  ;;  %1242 = vmatmul.mubr.bf16.gmra.mrb[16].mxu1 %v2569_v36  ;;  %v2664_v35 = vld [vmem:[%s2769_s28 + $0x140] ss:$8 sps:$4 sm:$0xff]   ;;  %v2665_v36 = vld [vmem:[%s2769_s28 + $0x2f0] ss:$8 sps:$4 sm:$0xff]  }
  0x67   : > { %1033 = vmatprep.mubr.bf16.mxu0 %v2570_v37  ;;  %1249 = vmatprep.mubr.bf16.mxu1 %v2572_v38  ;;  %v2666_v37 = vld [vmem:[%s2769_s28 + $0x154] ss:$8 sps:$4 sm:$0xff]   ;;  %v2668_v38 = vld [vmem:[%s2769_s28 + $0x304] ss:$8 sps:$4 sm:$0xff]  }
  0x6e   : > { %1034 = vmatmul.mubr.bf16.gmra.mrb[20].mxu0 %v2574_v39  ;;  %1250 = vmatmul.mubr.bf16.gmra.mrb[20].mxu1 %v2575_v40  ;;  %v2670_v39 = vld [vmem:[%s2769_s28 + $0x150] ss:$8 sps:$4 sm:$0xff]   ;;  %v2671_v40 = vld [vmem:[%s2769_s28 + $0x300] ss:$8 sps:$4 sm:$0xff]  }
  0x6f   : > { %1041 = vmatprep.mubr.bf16.mxu0 %v2576_v41  ;;  %1257 = vmatprep.mubr.bf16.mxu1 %v2578_v42  ;;  %v2672_v41 = vld [vmem:[%s2769_s28 + $0x164] ss:$8 sps:$4 sm:$0xff]   ;;  %v2674_v42 = vld [vmem:[%s2769_s28 + $0x314] ss:$8 sps:$4 sm:$0xff]  }
  0x76   : > { %1042 = vmatmul.mubr.bf16.gmra.mrb[24].mxu0 %v2580_v43  ;;  %1258 = vmatmul.mubr.bf16.gmra.mrb[24].mxu1 %v2581_v44  ;;  %v2676_v43 = vld [vmem:[%s2769_s28 + $0x160] ss:$8 sps:$4 sm:$0xff]   ;;  %v2677_v44 = vld [vmem:[%s2769_s28 + $0x310] ss:$8 sps:$4 sm:$0xff]  }
  0x77   : > { %1049 = vmatprep.mubr.bf16.mxu0 %v2582_v45  ;;  %1265 = vmatprep.mubr.bf16.mxu1 %v2584_v46  ;;  %v2678_v45 = vld [vmem:[%s2769_s28 + $0x174] ss:$8 sps:$4 sm:$0xff]   ;;  %v2680_v46 = vld [vmem:[%s2769_s28 + $0x324] ss:$8 sps:$4 sm:$0xff]  }
  0x7e   : > { %1050 = vmatmul.mubr.bf16.gmra.mrb[28].mxu0 %v2586_v47  ;;  %1266 = vmatmul.mubr.bf16.gmra.mrb[28].mxu1 %v2587_v48  ;;  %v2682_v47 = vld [vmem:[%s2769_s28 + $0x170] ss:$8 sps:$4 sm:$0xff]   ;;  %v2683_v48 = vld [vmem:[%s2769_s28 + $0x320] ss:$8 sps:$4 sm:$0xff]  }
  0x7f   : > { %1057 = vmatprep.mubr.bf16.mxu0 %v2588_v49  ;;  %1273 = vmatprep.mubr.bf16.mxu1 %v2590_v50  ;;  %v2684_v49 = vld [vmem:[%s2769_s28 + $0x184] ss:$8 sps:$4 sm:$0xff]   ;;  %v2686_v50 = vld [vmem:[%s2769_s28 + $0x334] ss:$8 sps:$4 sm:$0xff]  }
  0x86   : > { %1058 = vmatmul.mubr.bf16.gmra.mrb[32].mxu0 %v2592_v51  ;;  %1274 = vmatmul.mubr.bf16.gmra.mrb[32].mxu1 %v2593_v52  ;;  %v2688_v51 = vld [vmem:[%s2769_s28 + $0x180] ss:$8 sps:$4 sm:$0xff]   ;;  %v2689_v52 = vld [vmem:[%s2769_s28 + $0x330] ss:$8 sps:$4 sm:$0xff]  }
  0x87   : > { %1065 = vmatprep.mubr.bf16.mxu0 %v2594_v53  ;;  %1281 = vmatprep.mubr.bf16.mxu1 %v2596_v54  ;;  %v2690_v53 = vld [vmem:[%s2769_s28 + $0x194] ss:$8 sps:$4 sm:$0xff]   ;;  %v2692_v54 = vld [vmem:[%s2769_s28 + $0x344] ss:$8 sps:$4 sm:$0xff]  }
  0x8e   : > { %1066 = vmatmul.mubr.bf16.gmra.mrb[36].mxu0 %v2598_v55  ;;  %1282 = vmatmul.mubr.bf16.gmra.mrb[36].mxu1 %v2599_v56  ;;  %v2694_v55 = vld [vmem:[%s2769_s28 + $0x190] ss:$8 sps:$4 sm:$0xff]   ;;  %v2695_v56 = vld [vmem:[%s2769_s28 + $0x340] ss:$8 sps:$4 sm:$0xff]  }
  0x8f   : > { %1073 = vmatprep.mubr.bf16.mxu0 %v2600_v57  ;;  %1289 = vmatprep.mubr.bf16.mxu1 %v2602_v58  ;;  %v2696_v57 = vld [vmem:[%s2769_s28 + $0x1a4] ss:$8 sps:$4 sm:$0xff]   ;;  %v2698_v58 = vld [vmem:[%s2769_s28 + $0x354] ss:$8 sps:$4 sm:$0xff]  }
  0x96   : > { %1074 = vmatmul.mubr.bf16.gmra.mrb[40].mxu0 %v2604_v59  ;;  %1290 = vmatmul.mubr.bf16.gmra.mrb[40].mxu1 %v2605_v60  ;;  %v2700_v59 = vld [vmem:[%s2769_s28 + $0x1a0] ss:$8 sps:$4 sm:$0xff]   ;;  %v2701_v60 = vld [vmem:[%s2769_s28 + $0x350] ss:$8 sps:$4 sm:$0xff]  }
  0x97   : > { %1081 = vmatprep.mubr.bf16.mxu0 %v2606_v61  ;;  %1297 = vmatprep.mubr.bf16.mxu1 %v2608_v62  ;;  %v2939_v61 = vld [vmem:[%s3281_s2] ss:$0 sm:$0xff] }
  0x9e   : > { %1082 = vmatmul.mubr.bf16.gmra.mrb[44].mxu0 %v2610_v63  ;;  %1298 = vmatmul.mubr.bf16.gmra.mrb[44].mxu1 %v2611_v0 }
  0x9f   : > { %1089 = vmatprep.mubr.bf16.mxu0 %v2612_v1  ;;  %1305 = vmatprep.mubr.bf16.mxu1 %v2614_v2 }
  0xa6   : > { %1090 = vmatmul.mubr.bf16.gmra.mrb[48].mxu0 %v2616_v3  ;;  %1306 = vmatmul.mubr.bf16.gmra.mrb[48].mxu1 %v2617_v4 }
  0xa7   : > { %1097 = vmatprep.mubr.bf16.mxu0 %v2618_v5  ;;  %1313 = vmatprep.mubr.bf16.mxu1 %v2620_v6 }
  0xae   : > { %1098 = vmatmul.mubr.bf16.gmra.mrb[52].mxu0 %v2622_v7  ;;  %1314 = vmatmul.mubr.bf16.gmra.mrb[52].mxu1 %v2623_v8 }
  0xaf   : > { %1105 = vmatprep.mubr.bf16.mxu0 %v2624_v9  ;;  %1321 = vmatprep.mubr.bf16.mxu1 %v2626_v10 }
  0xb6   : > { %1106 = vmatmul.mubr.bf16.gmra.mrb[56].mxu0 %v2628_v11  ;;  %1322 = vmatmul.mubr.bf16.gmra.mrb[56].mxu1 %v2629_v12 }
  0xb7   : > { %1113 = vmatprep.mubr.bf16.mxu0 %v2630_v13  ;;  %1329 = vmatprep.mubr.bf16.mxu1 %v2632_v14 }
  0xbe   : > { %1114 = vmatmul.mubr.bf16.gmra.mrb[60].mxu0 %v2634_v15  ;;  %1330 = vmatmul.mubr.bf16.gmra.mrb[60].mxu1 %v2635_v16 }
  0xbf   : > { %1121 = vmatprep.mubr.bf16.mxu0 %v2636_v17  ;;  %1337 = vmatprep.mubr.bf16.mxu1 %v2638_v18 }
  0xc6   : > { %1122 = vmatmul.mubr.bf16.gmra.mrb[64].mxu0 %v2640_v19  ;;  %1338 = vmatmul.mubr.bf16.gmra.mrb[64].mxu1 %v2641_v20 }
  0xc7   : > { %1129 = vmatprep.mubr.bf16.mxu0 %v2642_v21  ;;  %1345 = vmatprep.mubr.bf16.mxu1 %v2644_v22 }
  0xce   : > { %1130 = vmatmul.mubr.bf16.gmra.mrb[68].mxu0 %v2646_v23  ;;  %1346 = vmatmul.mubr.bf16.gmra.mrb[68].mxu1 %v2647_v24 }
  0xcf   : > { %1137 = vmatprep.mubr.bf16.mxu0 %v2648_v25  ;;  %1353 = vmatprep.mubr.bf16.mxu1 %v2650_v26 }
  0xd6   : > { %1138 = vmatmul.mubr.bf16.gmra.mrb[72].mxu0 %v2652_v27  ;;  %1354 = vmatmul.mubr.bf16.gmra.mrb[72].mxu1 %v2653_v28 }
  0xd7   : > { %1145 = vmatprep.mubr.bf16.mxu0 %v2654_v29  ;;  %1361 = vmatprep.mubr.bf16.mxu1 %v2656_v30 }
  0xde   : > { %1146 = vmatmul.mubr.bf16.gmra.mrb[76].mxu0 %v2658_v31  ;;  %1362 = vmatmul.mubr.bf16.gmra.mrb[76].mxu1 %v2659_v32 }
  0xdf   : > { %1153 = vmatprep.mubr.bf16.mxu0 %v2660_v33  ;;  %1369 = vmatprep.mubr.bf16.mxu1 %v2662_v34 }
  0xe6   : > { %1154 = vmatmul.mubr.bf16.gmra.mrb[80].mxu0 %v2664_v35  ;;  %1370 = vmatmul.mubr.bf16.gmra.mrb[80].mxu1 %v2665_v36 }
  0xe7   : > { %1161 = vmatprep.mubr.bf16.mxu0 %v2666_v37  ;;  %1377 = vmatprep.mubr.bf16.mxu1 %v2668_v38 }
  0xee   : > { %1162 = vmatmul.mubr.bf16.gmra.mrb[84].mxu0 %v2670_v39  ;;  %1378 = vmatmul.mubr.bf16.gmra.mrb[84].mxu1 %v2671_v40 }
  0xef   : > { %1169 = vmatprep.mubr.bf16.mxu0 %v2672_v41  ;;  %1385 = vmatprep.mubr.bf16.mxu1 %v2674_v42 }
  0xf6   : > { %1170 = vmatmul.mubr.bf16.gmra.mrb[88].mxu0 %v2676_v43  ;;  %1386 = vmatmul.mubr.bf16.gmra.mrb[88].mxu1 %v2677_v44 }
  0xf7   : > { %1177 = vmatprep.mubr.bf16.mxu0 %v2678_v45  ;;  %1393 = vmatprep.mubr.bf16.mxu1 %v2680_v46 }
  0xfe   : > { %1178 = vmatmul.mubr.bf16.gmra.mrb[92].mxu0 %v2682_v47  ;;  %1394 = vmatmul.mubr.bf16.gmra.mrb[92].mxu1 %v2683_v48 }
  0xff   : > { %1185 = vmatprep.mubr.bf16.mxu0 %v2684_v49  ;;  %1401 = vmatprep.mubr.bf16.mxu1 %v2686_v50 }
 0x106   : > { %1186 = vmatmul.mubr.bf16.gmra.mrb[96].mxu0 %v2688_v51  ;;  %1402 = vmatmul.mubr.bf16.gmra.mrb[96].mxu1 %v2689_v52 }
 0x107   : > { %1193 = vmatprep.mubr.bf16.mxu0 %v2690_v53  ;;  %1409 = vmatprep.mubr.bf16.mxu1 %v2692_v54 }
 0x10e   : > { %1194 = vmatmul.mubr.bf16.gmra.mrb[100].mxu0 %v2694_v55  ;;  %1410 = vmatmul.mubr.bf16.gmra.mrb[100].mxu1 %v2695_v56 }
 0x10f   : > { %1201 = vmatprep.mubr.bf16.mxu0 %v2696_v57  ;;  %1417 = vmatprep.mubr.bf16.mxu1 %v2698_v58 }
 0x116   : > { %1202 = vmatmul.mubr.bf16.gmra.mrb[104].mxu0 %v2700_v59  ;;  %1418 = vmatmul.mubr.bf16.gmra.mrb[104].mxu1 %v2701_v60 }
 0x119   : > { %v995_v62 = vpop.f32.mrb[0].mxu0  ;;  %v1211_v63 = vpop.f32.mrb[0].mxu1 }
 0x11a   : > { %v996_v0 = vadd.f32 %v2939_v61, %v995_v62  ;;  %v1212_v1 = vadd.f32 %v2939_v61, %v1211_v63  ;;  %v997_v2 = vpop.f32.mrb[1].mxu0  ;;  %v1213_v3 = vpop.f32.mrb[1].mxu1 }
 0x11b   : > { %v998_v4 = vpop.f32.mrb[2].mxu0  ;;  %v1214_v5 = vpop.f32.mrb[2].mxu1 }
 0x11c   : > { %v1426_v6 = vmax.f32 %v996_v0, 0.0  ;;  %v1480_v7 = vmax.f32 %v1212_v1, 0.0  ;;  %v999_v8 = vadd.f32 %v2939_v61, %v998_v4  ;;  %v1215_v9 = vadd.f32 %v2939_v61, %v1214_v5  ;;  %v1000_v10 = vpop.f32.mrb[3].mxu0  ;;  %v1216_v11 = vpop.f32.mrb[3].mxu1 }
 0x11e   : > { %v2375_v12 = vpack.c.bf16 %v1426_v6, %v1426_v6  ;;  %v2429_v13 = vpack.c.bf16 %v1480_v7, %v1480_v7  ;;  %v1427_v14 = vmax.f32 %v999_v8, 0.0  ;;  %v1481_v15 = vmax.f32 %v1215_v9, 0.0 }
 0x120   : > { %1967 = vst.msk [vmem:[%s2949_s16] sm:$0xf] %vm1966_vm0, %v2375_v12  ;;  %2021 = vst.msk [vmem:[%s2949_s16 + $0xd8] sm:$0xf] %vm1966_vm0, %v2429_v13  ;;  %v2376_v16 = vpack.c.bf16 %v1427_v14, %v1427_v14  ;;  %v2430_v17 = vpack.c.bf16 %v1481_v15, %v1481_v15 }
 0x121   : > { %v1003_v18 = vpop.f32.mrb[4].mxu0  ;;  %v1219_v19 = vpop.f32.mrb[4].mxu1 }
 0x122   : > { %1968 = vst.msk [vmem:[%s2949_s16 + $0x4] sm:$0xf] %vm1966_vm0, %v2376_v16  ;;  %2022 = vst.msk [vmem:[%s2949_s16 + $0xdc] sm:$0xf] %vm1966_vm0, %v2430_v17  ;;  %v1004_v20 = vadd.f32 %v2939_v61, %v1003_v18  ;;  %v1220_v21 = vadd.f32 %v2939_v61, %v1219_v19  ;;  %v1005_v22 = vpop.f32.mrb[5].mxu0  ;;  %v1221_v23 = vpop.f32.mrb[5].mxu1 }
 0x123   : > { %v1006_v24 = vpop.f32.mrb[6].mxu0  ;;  %v1222_v25 = vpop.f32.mrb[6].mxu1 }
 0x124   : > { %v1428_v26 = vmax.f32 %v1004_v20, 0.0  ;;  %v1482_v27 = vmax.f32 %v1220_v21, 0.0  ;;  %v1007_v28 = vadd.f32 %v2939_v61, %v1006_v24  ;;  %v1223_v29 = vadd.f32 %v2939_v61, %v1222_v25  ;;  %v1008_v30 = vpop.f32.mrb[7].mxu0  ;;  %v1224_v31 = vpop.f32.mrb[7].mxu1 }
 0x126   : > { %v2377_v32 = vpack.c.bf16 %v1428_v26, %v1428_v26  ;;  %v2431_v33 = vpack.c.bf16 %v1482_v27, %v1482_v27  ;;  %v1429_v34 = vmax.f32 %v1007_v28, 0.0  ;;  %v1483_v35 = vmax.f32 %v1223_v29, 0.0 }
 0x128   : > { %1969 = vst.msk [vmem:[%s2949_s16 + $0x8] sm:$0xf] %vm1966_vm0, %v2377_v32  ;;  %2023 = vst.msk [vmem:[%s2949_s16 + $0xe0] sm:$0xf] %vm1966_vm0, %v2431_v33  ;;  %v2378_v36 = vpack.c.bf16 %v1429_v34, %v1429_v34  ;;  %v2432_v37 = vpack.c.bf16 %v1483_v35, %v1483_v35 }
 0x129   : > { %v1011_v38 = vpop.f32.mrb[8].mxu0  ;;  %v1227_v39 = vpop.f32.mrb[8].mxu1 }
 0x12a   : > { %1970 = vst.msk [vmem:[%s2949_s16 + $0xc] sm:$0xf] %vm1966_vm0, %v2378_v36  ;;  %2024 = vst.msk [vmem:[%s2949_s16 + $0xe4] sm:$0xf] %vm1966_vm0, %v2432_v37  ;;  %v1012_v40 = vadd.f32 %v2939_v61, %v1011_v38  ;;  %v1228_v41 = vadd.f32 %v2939_v61, %v1227_v39  ;;  %v1013_v42 = vpop.f32.mrb[9].mxu0  ;;  %v1229_v43 = vpop.f32.mrb[9].mxu1 }
 0x12b   : > { %v1014_v44 = vpop.f32.mrb[10].mxu0  ;;  %v1230_v45 = vpop.f32.mrb[10].mxu1 }
 0x12c   : > { %v1430_v46 = vmax.f32 %v1012_v40, 0.0  ;;  %v1484_v47 = vmax.f32 %v1228_v41, 0.0  ;;  %v1015_v48 = vadd.f32 %v2939_v61, %v1014_v44  ;;  %v1231_v49 = vadd.f32 %v2939_v61, %v1230_v45  ;;  %v1016_v50 = vpop.f32.mrb[11].mxu0  ;;  %v1232_v51 = vpop.f32.mrb[11].mxu1 }
 0x12e   : > { %v2379_v52 = vpack.c.bf16 %v1430_v46, %v1430_v46  ;;  %v2433_v53 = vpack.c.bf16 %v1484_v47, %v1484_v47  ;;  %v1431_v54 = vmax.f32 %v1015_v48, 0.0  ;;  %v1485_v55 = vmax.f32 %v1231_v49, 0.0 }
 0x130   : > { %1971 = vst.msk [vmem:[%s2949_s16 + $0x10] sm:$0xf] %vm1966_vm0, %v2379_v52  ;;  %2025 = vst.msk [vmem:[%s2949_s16 + $0xe8] sm:$0xf] %vm1966_vm0, %v2433_v53  ;;  %v2380_v56 = vpack.c.bf16 %v1431_v54, %v1431_v54  ;;  %v2434_v57 = vpack.c.bf16 %v1485_v55, %v1485_v55 }
 0x131   : > { %v1019_v58 = vpop.f32.mrb[12].mxu0  ;;  %v1235_v59 = vpop.f32.mrb[12].mxu1 }
 0x132   : > { %1972 = vst.msk [vmem:[%s2949_s16 + $0x14] sm:$0xf] %vm1966_vm0, %v2380_v56  ;;  %2026 = vst.msk [vmem:[%s2949_s16 + $0xec] sm:$0xf] %vm1966_vm0, %v2434_v57  ;;  %v1020_v60 = vadd.f32 %v2939_v61, %v1019_v58  ;;  %v1236_v62 = vadd.f32 %v2939_v61, %v1235_v59  ;;  %v1021_v63 = vpop.f32.mrb[13].mxu0  ;;  %v1237_v0 = vpop.f32.mrb[13].mxu1 }
 0x133   : > { %v1022_v1 = vpop.f32.mrb[14].mxu0  ;;  %v1238_v2 = vpop.f32.mrb[14].mxu1 }
 0x134   : > { %v1432_v3 = vmax.f32 %v1020_v60, 0.0  ;;  %v1486_v4 = vmax.f32 %v1236_v62, 0.0  ;;  %v1023_v5 = vadd.f32 %v2939_v61, %v1022_v1  ;;  %v1239_v6 = vadd.f32 %v2939_v61, %v1238_v2  ;;  %v1024_v7 = vpop.f32.mrb[15].mxu0  ;;  %v1240_v8 = vpop.f32.mrb[15].mxu1 }
 0x136   : > { %v2381_v9 = vpack.c.bf16 %v1432_v3, %v1432_v3  ;;  %v2435_v10 = vpack.c.bf16 %v1486_v4, %v1486_v4  ;;  %v1433_v11 = vmax.f32 %v1023_v5, 0.0  ;;  %v1487_v12 = vmax.f32 %v1239_v6, 0.0 }
 0x138   : > { %1973 = vst.msk [vmem:[%s2949_s16 + $0x18] sm:$0xf] %vm1966_vm0, %v2381_v9  ;;  %2027 = vst.msk [vmem:[%s2949_s16 + $0xf0] sm:$0xf] %vm1966_vm0, %v2435_v10  ;;  %v2382_v13 = vpack.c.bf16 %v1433_v11, %v1433_v11  ;;  %v2436_v14 = vpack.c.bf16 %v1487_v12, %v1487_v12 }
 0x139   : > { %v1027_v15 = vpop.f32.mrb[16].mxu0  ;;  %v1243_v16 = vpop.f32.mrb[16].mxu1 }
 0x13a   : > { %1974 = vst.msk [vmem:[%s2949_s16 + $0x1c] sm:$0xf] %vm1966_vm0, %v2382_v13  ;;  %2028 = vst.msk [vmem:[%s2949_s16 + $0xf4] sm:$0xf] %vm1966_vm0, %v2436_v14  ;;  %v1028_v17 = vadd.f32 %v2939_v61, %v1027_v15  ;;  %v1244_v18 = vadd.f32 %v2939_v61, %v1243_v16  ;;  %v1029_v19 = vpop.f32.mrb[17].mxu0  ;;  %v1245_v20 = vpop.f32.mrb[17].mxu1 }
 0x13b   : > { %v1030_v21 = vpop.f32.mrb[18].mxu0  ;;  %v1246_v22 = vpop.f32.mrb[18].mxu1 }
 0x13c   : > { %v1434_v23 = vmax.f32 %v1028_v17, 0.0  ;;  %v1488_v24 = vmax.f32 %v1244_v18, 0.0  ;;  %v1031_v25 = vadd.f32 %v2939_v61, %v1030_v21  ;;  %v1247_v26 = vadd.f32 %v2939_v61, %v1246_v22  ;;  %v1032_v27 = vpop.f32.mrb[19].mxu0  ;;  %v1248_v28 = vpop.f32.mrb[19].mxu1 }
 0x13e   : > { %v2383_v29 = vpack.c.bf16 %v1434_v23, %v1434_v23  ;;  %v2437_v30 = vpack.c.bf16 %v1488_v24, %v1488_v24  ;;  %v1435_v31 = vmax.f32 %v1031_v25, 0.0  ;;  %v1489_v32 = vmax.f32 %v1247_v26, 0.0 }
 0x140   : > { %1975 = vst.msk [vmem:[%s2949_s16 + $0x20] sm:$0xf] %vm1966_vm0, %v2383_v29  ;;  %2029 = vst.msk [vmem:[%s2949_s16 + $0xf8] sm:$0xf] %vm1966_vm0, %v2437_v30  ;;  %v2384_v33 = vpack.c.bf16 %v1435_v31, %v1435_v31  ;;  %v2438_v34 = vpack.c.bf16 %v1489_v32, %v1489_v32 }
 0x141   : > { %v1035_v35 = vpop.f32.mrb[20].mxu0  ;;  %v1251_v36 = vpop.f32.mrb[20].mxu1 }
 0x142   : > { %1976 = vst.msk [vmem:[%s2949_s16 + $0x24] sm:$0xf] %vm1966_vm0, %v2384_v33  ;;  %2030 = vst.msk [vmem:[%s2949_s16 + $0xfc] sm:$0xf] %vm1966_vm0, %v2438_v34  ;;  %v1036_v37 = vadd.f32 %v2939_v61, %v1035_v35  ;;  %v1252_v38 = vadd.f32 %v2939_v61, %v1251_v36  ;;  %v1037_v39 = vpop.f32.mrb[21].mxu0  ;;  %v1253_v40 = vpop.f32.mrb[21].mxu1 }
 0x143   : > { %v1038_v41 = vpop.f32.mrb[22].mxu0  ;;  %v1254_v42 = vpop.f32.mrb[22].mxu1 }
 0x144   : > { %v1436_v43 = vmax.f32 %v1036_v37, 0.0  ;;  %v1490_v44 = vmax.f32 %v1252_v38, 0.0  ;;  %v1039_v45 = vadd.f32 %v2939_v61, %v1038_v41  ;;  %v1255_v46 = vadd.f32 %v2939_v61, %v1254_v42  ;;  %v1040_v47 = vpop.f32.mrb[23].mxu0  ;;  %v1256_v48 = vpop.f32.mrb[23].mxu1 }
 0x146   : > { %v2385_v49 = vpack.c.bf16 %v1436_v43, %v1436_v43  ;;  %v2439_v50 = vpack.c.bf16 %v1490_v44, %v1490_v44  ;;  %v1437_v51 = vmax.f32 %v1039_v45, 0.0  ;;  %v1491_v52 = vmax.f32 %v1255_v46, 0.0 }
 0x148   : > { %1977 = vst.msk [vmem:[%s2949_s16 + $0x28] sm:$0xf] %vm1966_vm0, %v2385_v49  ;;  %2031 = vst.msk [vmem:[%s2949_s16 + $0x100] sm:$0xf] %vm1966_vm0, %v2439_v50  ;;  %v2386_v53 = vpack.c.bf16 %v1437_v51, %v1437_v51  ;;  %v2440_v54 = vpack.c.bf16 %v1491_v52, %v1491_v52 }
 0x149   : > { %v1043_v55 = vpop.f32.mrb[24].mxu0  ;;  %v1259_v56 = vpop.f32.mrb[24].mxu1 }
 0x14a   : > { %1978 = vst.msk [vmem:[%s2949_s16 + $0x2c] sm:$0xf] %vm1966_vm0, %v2386_v53  ;;  %2032 = vst.msk [vmem:[%s2949_s16 + $0x104] sm:$0xf] %vm1966_vm0, %v2440_v54  ;;  %v1044_v57 = vadd.f32 %v2939_v61, %v1043_v55  ;;  %v1260_v58 = vadd.f32 %v2939_v61, %v1259_v56  ;;  %v1045_v59 = vpop.f32.mrb[25].mxu0  ;;  %v1261_v60 = vpop.f32.mrb[25].mxu1 }
 0x14b   : > { %v1046_v62 = vpop.f32.mrb[26].mxu0  ;;  %v1262_v63 = vpop.f32.mrb[26].mxu1 }
 0x14c   : > { %v1438_v0 = vmax.f32 %v1044_v57, 0.0  ;;  %v1492_v1 = vmax.f32 %v1260_v58, 0.0  ;;  %v1047_v2 = vadd.f32 %v2939_v61, %v1046_v62  ;;  %v1263_v3 = vadd.f32 %v2939_v61, %v1262_v63  ;;  %v1048_v4 = vpop.f32.mrb[27].mxu0  ;;  %v1264_v5 = vpop.f32.mrb[27].mxu1 }
 0x14e   : > { %v2387_v6 = vpack.c.bf16 %v1438_v0, %v1438_v0  ;;  %v2441_v7 = vpack.c.bf16 %v1492_v1, %v1492_v1  ;;  %v1439_v8 = vmax.f32 %v1047_v2, 0.0  ;;  %v1493_v9 = vmax.f32 %v1263_v3, 0.0 }
 0x150   : > { %1979 = vst.msk [vmem:[%s2949_s16 + $0x30] sm:$0xf] %vm1966_vm0, %v2387_v6  ;;  %2033 = vst.msk [vmem:[%s2949_s16 + $0x108] sm:$0xf] %vm1966_vm0, %v2441_v7  ;;  %v2388_v10 = vpack.c.bf16 %v1439_v8, %v1439_v8  ;;  %v2442_v11 = vpack.c.bf16 %v1493_v9, %v1493_v9 }
 0x151   : > { %v1051_v12 = vpop.f32.mrb[28].mxu0  ;;  %v1267_v13 = vpop.f32.mrb[28].mxu1 }
 0x152   : > { %1980 = vst.msk [vmem:[%s2949_s16 + $0x34] sm:$0xf] %vm1966_vm0, %v2388_v10  ;;  %2034 = vst.msk [vmem:[%s2949_s16 + $0x10c] sm:$0xf] %vm1966_vm0, %v2442_v11  ;;  %v1052_v14 = vadd.f32 %v2939_v61, %v1051_v12  ;;  %v1268_v15 = vadd.f32 %v2939_v61, %v1267_v13  ;;  %v1053_v16 = vpop.f32.mrb[29].mxu0  ;;  %v1269_v17 = vpop.f32.mrb[29].mxu1 }
 0x153   : > { %v1054_v18 = vpop.f32.mrb[30].mxu0  ;;  %v1270_v19 = vpop.f32.mrb[30].mxu1 }
 0x154   : > { %v1440_v20 = vmax.f32 %v1052_v14, 0.0  ;;  %v1494_v21 = vmax.f32 %v1268_v15, 0.0  ;;  %v1055_v22 = vadd.f32 %v2939_v61, %v1054_v18  ;;  %v1271_v23 = vadd.f32 %v2939_v61, %v1270_v19  ;;  %v1056_v24 = vpop.f32.mrb[31].mxu0  ;;  %v1272_v25 = vpop.f32.mrb[31].mxu1 }
 0x156   : > { %v2389_v26 = vpack.c.bf16 %v1440_v20, %v1440_v20  ;;  %v2443_v27 = vpack.c.bf16 %v1494_v21, %v1494_v21  ;;  %v1441_v28 = vmax.f32 %v1055_v22, 0.0  ;;  %v1495_v29 = vmax.f32 %v1271_v23, 0.0 }
 0x158   : > { %1981 = vst.msk [vmem:[%s2949_s16 + $0x38] sm:$0xf] %vm1966_vm0, %v2389_v26  ;;  %2035 = vst.msk [vmem:[%s2949_s16 + $0x110] sm:$0xf] %vm1966_vm0, %v2443_v27  ;;  %v2390_v30 = vpack.c.bf16 %v1441_v28, %v1441_v28  ;;  %v2444_v31 = vpack.c.bf16 %v1495_v29, %v1495_v29 }
 0x159   : > { %v1059_v32 = vpop.f32.mrb[32].mxu0  ;;  %v1275_v33 = vpop.f32.mrb[32].mxu1 }
 0x15a   : > { %1982 = vst.msk [vmem:[%s2949_s16 + $0x3c] sm:$0xf] %vm1966_vm0, %v2390_v30  ;;  %2036 = vst.msk [vmem:[%s2949_s16 + $0x114] sm:$0xf] %vm1966_vm0, %v2444_v31  ;;  %v1060_v34 = vadd.f32 %v2939_v61, %v1059_v32  ;;  %v1276_v35 = vadd.f32 %v2939_v61, %v1275_v33  ;;  %v1061_v36 = vpop.f32.mrb[33].mxu0  ;;  %v1277_v37 = vpop.f32.mrb[33].mxu1 }
 0x15b   : > { %v1062_v38 = vpop.f32.mrb[34].mxu0  ;;  %v1278_v39 = vpop.f32.mrb[34].mxu1 }
 0x15c   : > { %v1442_v40 = vmax.f32 %v1060_v34, 0.0  ;;  %v1496_v41 = vmax.f32 %v1276_v35, 0.0  ;;  %v1063_v42 = vadd.f32 %v2939_v61, %v1062_v38  ;;  %v1279_v43 = vadd.f32 %v2939_v61, %v1278_v39  ;;  %v1064_v44 = vpop.f32.mrb[35].mxu0  ;;  %v1280_v45 = vpop.f32.mrb[35].mxu1 }
 0x15e   : > { %v2391_v46 = vpack.c.bf16 %v1442_v40, %v1442_v40  ;;  %v2445_v47 = vpack.c.bf16 %v1496_v41, %v1496_v41  ;;  %v1443_v48 = vmax.f32 %v1063_v42, 0.0  ;;  %v1497_v49 = vmax.f32 %v1279_v43, 0.0 }
 0x160   : > { %1983 = vst.msk [vmem:[%s2949_s16 + $0x40] sm:$0xf] %vm1966_vm0, %v2391_v46  ;;  %2037 = vst.msk [vmem:[%s2949_s16 + $0x118] sm:$0xf] %vm1966_vm0, %v2445_v47  ;;  %v2392_v50 = vpack.c.bf16 %v1443_v48, %v1443_v48  ;;  %v2446_v51 = vpack.c.bf16 %v1497_v49, %v1497_v49 }
 0x161   : > { %v1067_v52 = vpop.f32.mrb[36].mxu0  ;;  %v1283_v53 = vpop.f32.mrb[36].mxu1 }
 0x162   : > { %1984 = vst.msk [vmem:[%s2949_s16 + $0x44] sm:$0xf] %vm1966_vm0, %v2392_v50  ;;  %2038 = vst.msk [vmem:[%s2949_s16 + $0x11c] sm:$0xf] %vm1966_vm0, %v2446_v51  ;;  %v1068_v54 = vadd.f32 %v2939_v61, %v1067_v52  ;;  %v1284_v55 = vadd.f32 %v2939_v61, %v1283_v53  ;;  %v1069_v56 = vpop.f32.mrb[37].mxu0  ;;  %v1285_v57 = vpop.f32.mrb[37].mxu1 }
 0x163   : > { %v1070_v58 = vpop.f32.mrb[38].mxu0  ;;  %v1286_v59 = vpop.f32.mrb[38].mxu1 }
 0x164   : > { %v1444_v60 = vmax.f32 %v1068_v54, 0.0  ;;  %v1498_v62 = vmax.f32 %v1284_v55, 0.0  ;;  %v1071_v63 = vadd.f32 %v2939_v61, %v1070_v58  ;;  %v1287_v0 = vadd.f32 %v2939_v61, %v1286_v59  ;;  %v1072_v1 = vpop.f32.mrb[39].mxu0  ;;  %v1288_v2 = vpop.f32.mrb[39].mxu1 }
 0x166   : > { %v2393_v3 = vpack.c.bf16 %v1444_v60, %v1444_v60  ;;  %v2447_v4 = vpack.c.bf16 %v1498_v62, %v1498_v62  ;;  %v1445_v5 = vmax.f32 %v1071_v63, 0.0  ;;  %v1499_v6 = vmax.f32 %v1287_v0, 0.0 }
 0x168   : > { %1985 = vst.msk [vmem:[%s2949_s16 + $0x48] sm:$0xf] %vm1966_vm0, %v2393_v3  ;;  %2039 = vst.msk [vmem:[%s2949_s16 + $0x120] sm:$0xf] %vm1966_vm0, %v2447_v4  ;;  %v2394_v7 = vpack.c.bf16 %v1445_v5, %v1445_v5  ;;  %v2448_v8 = vpack.c.bf16 %v1499_v6, %v1499_v6 }
 0x169   : > { %v1075_v9 = vpop.f32.mrb[40].mxu0  ;;  %v1291_v10 = vpop.f32.mrb[40].mxu1 }
 0x16a   : > { %1986 = vst.msk [vmem:[%s2949_s16 + $0x4c] sm:$0xf] %vm1966_vm0, %v2394_v7  ;;  %2040 = vst.msk [vmem:[%s2949_s16 + $0x124] sm:$0xf] %vm1966_vm0, %v2448_v8  ;;  %v1076_v11 = vadd.f32 %v2939_v61, %v1075_v9  ;;  %v1292_v12 = vadd.f32 %v2939_v61, %v1291_v10  ;;  %v1077_v13 = vpop.f32.mrb[41].mxu0  ;;  %v1293_v14 = vpop.f32.mrb[41].mxu1 }
 0x16b   : > { %v1078_v15 = vpop.f32.mrb[42].mxu0  ;;  %v1294_v16 = vpop.f32.mrb[42].mxu1 }
 0x16c   : > { %v1446_v17 = vmax.f32 %v1076_v11, 0.0  ;;  %v1500_v18 = vmax.f32 %v1292_v12, 0.0  ;;  %v1079_v19 = vadd.f32 %v2939_v61, %v1078_v15  ;;  %v1295_v20 = vadd.f32 %v2939_v61, %v1294_v16  ;;  %v1080_v21 = vpop.f32.mrb[43].mxu0  ;;  %v1296_v22 = vpop.f32.mrb[43].mxu1 }
 0x16e   : > { %v2395_v23 = vpack.c.bf16 %v1446_v17, %v1446_v17  ;;  %v2449_v24 = vpack.c.bf16 %v1500_v18, %v1500_v18  ;;  %v1447_v25 = vmax.f32 %v1079_v19, 0.0  ;;  %v1501_v26 = vmax.f32 %v1295_v20, 0.0 }
 0x170   : > { %1987 = vst.msk [vmem:[%s2949_s16 + $0x50] sm:$0xf] %vm1966_vm0, %v2395_v23  ;;  %2041 = vst.msk [vmem:[%s2949_s16 + $0x128] sm:$0xf] %vm1966_vm0, %v2449_v24  ;;  %v2396_v27 = vpack.c.bf16 %v1447_v25, %v1447_v25  ;;  %v2450_v28 = vpack.c.bf16 %v1501_v26, %v1501_v26 }
 0x171   : > { %v1083_v29 = vpop.f32.mrb[44].mxu0  ;;  %v1299_v30 = vpop.f32.mrb[44].mxu1 }
 0x172   : > { %1988 = vst.msk [vmem:[%s2949_s16 + $0x54] sm:$0xf] %vm1966_vm0, %v2396_v27  ;;  %2042 = vst.msk [vmem:[%s2949_s16 + $0x12c] sm:$0xf] %vm1966_vm0, %v2450_v28  ;;  %v1084_v31 = vadd.f32 %v2939_v61, %v1083_v29  ;;  %v1300_v32 = vadd.f32 %v2939_v61, %v1299_v30  ;;  %v1085_v33 = vpop.f32.mrb[45].mxu0  ;;  %v1301_v34 = vpop.f32.mrb[45].mxu1 }
 0x173   : > { %v1086_v35 = vpop.f32.mrb[46].mxu0  ;;  %v1302_v36 = vpop.f32.mrb[46].mxu1 }
 0x174   : > { %v1448_v37 = vmax.f32 %v1084_v31, 0.0  ;;  %v1502_v38 = vmax.f32 %v1300_v32, 0.0  ;;  %v1087_v39 = vadd.f32 %v2939_v61, %v1086_v35  ;;  %v1303_v40 = vadd.f32 %v2939_v61, %v1302_v36  ;;  %v1088_v41 = vpop.f32.mrb[47].mxu0  ;;  %v1304_v42 = vpop.f32.mrb[47].mxu1 }
 0x176   : > { %v2397_v43 = vpack.c.bf16 %v1448_v37, %v1448_v37  ;;  %v2451_v44 = vpack.c.bf16 %v1502_v38, %v1502_v38  ;;  %v1449_v45 = vmax.f32 %v1087_v39, 0.0  ;;  %v1503_v46 = vmax.f32 %v1303_v40, 0.0 }
 0x178   : > { %1989 = vst.msk [vmem:[%s2949_s16 + $0x58] sm:$0xf] %vm1966_vm0, %v2397_v43  ;;  %2043 = vst.msk [vmem:[%s2949_s16 + $0x130] sm:$0xf] %vm1966_vm0, %v2451_v44  ;;  %v2398_v47 = vpack.c.bf16 %v1449_v45, %v1449_v45  ;;  %v2452_v48 = vpack.c.bf16 %v1503_v46, %v1503_v46 }
 0x179   : > { %v1091_v49 = vpop.f32.mrb[48].mxu0  ;;  %v1307_v50 = vpop.f32.mrb[48].mxu1 }
 0x17a   : > { %1990 = vst.msk [vmem:[%s2949_s16 + $0x5c] sm:$0xf] %vm1966_vm0, %v2398_v47  ;;  %2044 = vst.msk [vmem:[%s2949_s16 + $0x134] sm:$0xf] %vm1966_vm0, %v2452_v48  ;;  %v1092_v51 = vadd.f32 %v2939_v61, %v1091_v49  ;;  %v1308_v52 = vadd.f32 %v2939_v61, %v1307_v50  ;;  %v1093_v53 = vpop.f32.mrb[49].mxu0  ;;  %v1309_v54 = vpop.f32.mrb[49].mxu1 }
 0x17b   : > { %v1094_v55 = vpop.f32.mrb[50].mxu0  ;;  %v1310_v56 = vpop.f32.mrb[50].mxu1 }
 0x17c   : > { %v1450_v57 = vmax.f32 %v1092_v51, 0.0  ;;  %v1504_v58 = vmax.f32 %v1308_v52, 0.0  ;;  %v1095_v59 = vadd.f32 %v2939_v61, %v1094_v55  ;;  %v1311_v60 = vadd.f32 %v2939_v61, %v1310_v56  ;;  %v1096_v62 = vpop.f32.mrb[51].mxu0  ;;  %v1312_v63 = vpop.f32.mrb[51].mxu1 }
 0x17e   : > { %v2399_v0 = vpack.c.bf16 %v1450_v57, %v1450_v57  ;;  %v2453_v1 = vpack.c.bf16 %v1504_v58, %v1504_v58  ;;  %v1451_v2 = vmax.f32 %v1095_v59, 0.0  ;;  %v1505_v3 = vmax.f32 %v1311_v60, 0.0 }
 0x180   : > { %1991 = vst.msk [vmem:[%s2949_s16 + $0x60] sm:$0xf] %vm1966_vm0, %v2399_v0  ;;  %2045 = vst.msk [vmem:[%s2949_s16 + $0x138] sm:$0xf] %vm1966_vm0, %v2453_v1  ;;  %v2400_v4 = vpack.c.bf16 %v1451_v2, %v1451_v2  ;;  %v2454_v5 = vpack.c.bf16 %v1505_v3, %v1505_v3 }
 0x181   : > { %v1099_v6 = vpop.f32.mrb[52].mxu0  ;;  %v1315_v7 = vpop.f32.mrb[52].mxu1 }
 0x182   : > { %1992 = vst.msk [vmem:[%s2949_s16 + $0x64] sm:$0xf] %vm1966_vm0, %v2400_v4  ;;  %2046 = vst.msk [vmem:[%s2949_s16 + $0x13c] sm:$0xf] %vm1966_vm0, %v2454_v5  ;;  %v1100_v8 = vadd.f32 %v2939_v61, %v1099_v6  ;;  %v1316_v9 = vadd.f32 %v2939_v61, %v1315_v7  ;;  %v1101_v10 = vpop.f32.mrb[53].mxu0  ;;  %v1317_v11 = vpop.f32.mrb[53].mxu1 }
 0x183   : > { %v1102_v12 = vpop.f32.mrb[54].mxu0  ;;  %v1318_v13 = vpop.f32.mrb[54].mxu1 }
 0x184   : > { %v1452_v14 = vmax.f32 %v1100_v8, 0.0  ;;  %v1506_v15 = vmax.f32 %v1316_v9, 0.0  ;;  %v1103_v16 = vadd.f32 %v2939_v61, %v1102_v12  ;;  %v1319_v17 = vadd.f32 %v2939_v61, %v1318_v13  ;;  %v1104_v18 = vpop.f32.mrb[55].mxu0  ;;  %v1320_v19 = vpop.f32.mrb[55].mxu1 }
 0x186   : > { %v2401_v20 = vpack.c.bf16 %v1452_v14, %v1452_v14  ;;  %v2455_v21 = vpack.c.bf16 %v1506_v15, %v1506_v15  ;;  %v1453_v22 = vmax.f32 %v1103_v16, 0.0  ;;  %v1507_v23 = vmax.f32 %v1319_v17, 0.0 }
 0x188   : > { %1993 = vst.msk [vmem:[%s2949_s16 + $0x68] sm:$0xf] %vm1966_vm0, %v2401_v20  ;;  %2047 = vst.msk [vmem:[%s2949_s16 + $0x140] sm:$0xf] %vm1966_vm0, %v2455_v21  ;;  %v2402_v24 = vpack.c.bf16 %v1453_v22, %v1453_v22  ;;  %v2456_v25 = vpack.c.bf16 %v1507_v23, %v1507_v23 }
 0x189   : > { %v1107_v26 = vpop.f32.mrb[56].mxu0  ;;  %v1323_v27 = vpop.f32.mrb[56].mxu1 }
 0x18a   : > { %1994 = vst.msk [vmem:[%s2949_s16 + $0x6c] sm:$0xf] %vm1966_vm0, %v2402_v24  ;;  %2048 = vst.msk [vmem:[%s2949_s16 + $0x144] sm:$0xf] %vm1966_vm0, %v2456_v25  ;;  %v1108_v28 = vadd.f32 %v2939_v61, %v1107_v26  ;;  %v1324_v29 = vadd.f32 %v2939_v61, %v1323_v27  ;;  %v1109_v30 = vpop.f32.mrb[57].mxu0  ;;  %v1325_v31 = vpop.f32.mrb[57].mxu1 }
 0x18b   : > { %v1110_v32 = vpop.f32.mrb[58].mxu0  ;;  %v1326_v33 = vpop.f32.mrb[58].mxu1 }
 0x18c   : > { %v1454_v34 = vmax.f32 %v1108_v28, 0.0  ;;  %v1508_v35 = vmax.f32 %v1324_v29, 0.0  ;;  %v1111_v36 = vadd.f32 %v2939_v61, %v1110_v32  ;;  %v1327_v37 = vadd.f32 %v2939_v61, %v1326_v33  ;;  %v1112_v38 = vpop.f32.mrb[59].mxu0  ;;  %v1328_v39 = vpop.f32.mrb[59].mxu1 }
 0x18e   : > { %v2403_v40 = vpack.c.bf16 %v1454_v34, %v1454_v34  ;;  %v2457_v41 = vpack.c.bf16 %v1508_v35, %v1508_v35  ;;  %v1455_v42 = vmax.f32 %v1111_v36, 0.0  ;;  %v1509_v43 = vmax.f32 %v1327_v37, 0.0 }
 0x190   : > { %1995 = vst.msk [vmem:[%s2949_s16 + $0x70] sm:$0xf] %vm1966_vm0, %v2403_v40  ;;  %2049 = vst.msk [vmem:[%s2949_s16 + $0x148] sm:$0xf] %vm1966_vm0, %v2457_v41  ;;  %v2404_v44 = vpack.c.bf16 %v1455_v42, %v1455_v42  ;;  %v2458_v45 = vpack.c.bf16 %v1509_v43, %v1509_v43 }
 0x191   : > { %v1115_v46 = vpop.f32.mrb[60].mxu0  ;;  %v1331_v47 = vpop.f32.mrb[60].mxu1 }
 0x192   : > { %1996 = vst.msk [vmem:[%s2949_s16 + $0x74] sm:$0xf] %vm1966_vm0, %v2404_v44  ;;  %2050 = vst.msk [vmem:[%s2949_s16 + $0x14c] sm:$0xf] %vm1966_vm0, %v2458_v45  ;;  %v1116_v48 = vadd.f32 %v2939_v61, %v1115_v46  ;;  %v1332_v49 = vadd.f32 %v2939_v61, %v1331_v47  ;;  %v1117_v50 = vpop.f32.mrb[61].mxu0  ;;  %v1333_v51 = vpop.f32.mrb[61].mxu1 }
 0x193   : > { %v1118_v52 = vpop.f32.mrb[62].mxu0  ;;  %v1334_v53 = vpop.f32.mrb[62].mxu1 }
 0x194   : > { %v1456_v54 = vmax.f32 %v1116_v48, 0.0  ;;  %v1510_v55 = vmax.f32 %v1332_v49, 0.0  ;;  %v1119_v56 = vadd.f32 %v2939_v61, %v1118_v52  ;;  %v1335_v57 = vadd.f32 %v2939_v61, %v1334_v53  ;;  %v1120_v58 = vpop.f32.mrb[63].mxu0  ;;  %v1336_v59 = vpop.f32.mrb[63].mxu1 }
 0x196   : > { %v2405_v60 = vpack.c.bf16 %v1456_v54, %v1456_v54  ;;  %v2459_v62 = vpack.c.bf16 %v1510_v55, %v1510_v55  ;;  %v1457_v63 = vmax.f32 %v1119_v56, 0.0  ;;  %v1511_v0 = vmax.f32 %v1335_v57, 0.0 }
 0x198   : > { %1997 = vst.msk [vmem:[%s2949_s16 + $0x78] sm:$0xf] %vm1966_vm0, %v2405_v60  ;;  %2051 = vst.msk [vmem:[%s2949_s16 + $0x150] sm:$0xf] %vm1966_vm0, %v2459_v62  ;;  %v2406_v1 = vpack.c.bf16 %v1457_v63, %v1457_v63  ;;  %v2460_v2 = vpack.c.bf16 %v1511_v0, %v1511_v0 }
 0x199   : > { %v1123_v3 = vpop.f32.mrb[64].mxu0  ;;  %v1339_v4 = vpop.f32.mrb[64].mxu1 }
 0x19a   : > { %1998 = vst.msk [vmem:[%s2949_s16 + $0x7c] sm:$0xf] %vm1966_vm0, %v2406_v1  ;;  %2052 = vst.msk [vmem:[%s2949_s16 + $0x154] sm:$0xf] %vm1966_vm0, %v2460_v2  ;;  %v1124_v5 = vadd.f32 %v2939_v61, %v1123_v3  ;;  %v1340_v6 = vadd.f32 %v2939_v61, %v1339_v4  ;;  %v1125_v7 = vpop.f32.mrb[65].mxu0  ;;  %v1341_v8 = vpop.f32.mrb[65].mxu1 }
 0x19b   : > { %v1126_v9 = vpop.f32.mrb[66].mxu0  ;;  %v1342_v10 = vpop.f32.mrb[66].mxu1 }
 0x19c   : > { %v1458_v11 = vmax.f32 %v1124_v5, 0.0  ;;  %v1512_v12 = vmax.f32 %v1340_v6, 0.0  ;;  %v1127_v13 = vadd.f32 %v2939_v61, %v1126_v9  ;;  %v1343_v14 = vadd.f32 %v2939_v61, %v1342_v10  ;;  %v1128_v15 = vpop.f32.mrb[67].mxu0  ;;  %v1344_v16 = vpop.f32.mrb[67].mxu1 }
 0x19e   : > { %v2407_v17 = vpack.c.bf16 %v1458_v11, %v1458_v11  ;;  %v2461_v18 = vpack.c.bf16 %v1512_v12, %v1512_v12  ;;  %v1459_v19 = vmax.f32 %v1127_v13, 0.0  ;;  %v1513_v20 = vmax.f32 %v1343_v14, 0.0 }
 0x1a0   : > { %1999 = vst.msk [vmem:[%s2949_s16 + $0x80] sm:$0xf] %vm1966_vm0, %v2407_v17  ;;  %2053 = vst.msk [vmem:[%s2949_s16 + $0x158] sm:$0xf] %vm1966_vm0, %v2461_v18  ;;  %v2408_v21 = vpack.c.bf16 %v1459_v19, %v1459_v19  ;;  %v2462_v22 = vpack.c.bf16 %v1513_v20, %v1513_v20 }
 0x1a1   : > { %v1131_v23 = vpop.f32.mrb[68].mxu0  ;;  %v1347_v24 = vpop.f32.mrb[68].mxu1 }
 0x1a2   : > { %2000 = vst.msk [vmem:[%s2949_s16 + $0x84] sm:$0xf] %vm1966_vm0, %v2408_v21  ;;  %2054 = vst.msk [vmem:[%s2949_s16 + $0x15c] sm:$0xf] %vm1966_vm0, %v2462_v22  ;;  %v1132_v25 = vadd.f32 %v2939_v61, %v1131_v23  ;;  %v1348_v26 = vadd.f32 %v2939_v61, %v1347_v24  ;;  %v1133_v27 = vpop.f32.mrb[69].mxu0  ;;  %v1349_v28 = vpop.f32.mrb[69].mxu1 }
 0x1a3   : > { %v1134_v29 = vpop.f32.mrb[70].mxu0  ;;  %v1350_v30 = vpop.f32.mrb[70].mxu1 }
 0x1a4   : > { %v1460_v31 = vmax.f32 %v1132_v25, 0.0  ;;  %v1514_v32 = vmax.f32 %v1348_v26, 0.0  ;;  %v1135_v33 = vadd.f32 %v2939_v61, %v1134_v29  ;;  %v1351_v34 = vadd.f32 %v2939_v61, %v1350_v30  ;;  %v1136_v35 = vpop.f32.mrb[71].mxu0  ;;  %v1352_v36 = vpop.f32.mrb[71].mxu1 }
 0x1a6   : > { %v2409_v37 = vpack.c.bf16 %v1460_v31, %v1460_v31  ;;  %v2463_v38 = vpack.c.bf16 %v1514_v32, %v1514_v32  ;;  %v1461_v39 = vmax.f32 %v1135_v33, 0.0  ;;  %v1515_v40 = vmax.f32 %v1351_v34, 0.0 }
 0x1a8   : > { %2001 = vst.msk [vmem:[%s2949_s16 + $0x88] sm:$0xf] %vm1966_vm0, %v2409_v37  ;;  %2055 = vst.msk [vmem:[%s2949_s16 + $0x160] sm:$0xf] %vm1966_vm0, %v2463_v38  ;;  %v2410_v41 = vpack.c.bf16 %v1461_v39, %v1461_v39  ;;  %v2464_v42 = vpack.c.bf16 %v1515_v40, %v1515_v40 }
 0x1a9   : > { %v1139_v43 = vpop.f32.mrb[72].mxu0  ;;  %v1355_v44 = vpop.f32.mrb[72].mxu1 }
 0x1aa   : > { %2002 = vst.msk [vmem:[%s2949_s16 + $0x8c] sm:$0xf] %vm1966_vm0, %v2410_v41  ;;  %2056 = vst.msk [vmem:[%s2949_s16 + $0x164] sm:$0xf] %vm1966_vm0, %v2464_v42  ;;  %v1140_v45 = vadd.f32 %v2939_v61, %v1139_v43  ;;  %v1356_v46 = vadd.f32 %v2939_v61, %v1355_v44  ;;  %v1141_v47 = vpop.f32.mrb[73].mxu0  ;;  %v1357_v48 = vpop.f32.mrb[73].mxu1 }
 0x1ab   : > { %v1142_v49 = vpop.f32.mrb[74].mxu0  ;;  %v1358_v50 = vpop.f32.mrb[74].mxu1 }
 0x1ac   : > { %v1462_v51 = vmax.f32 %v1140_v45, 0.0  ;;  %v1516_v52 = vmax.f32 %v1356_v46, 0.0  ;;  %v1143_v53 = vadd.f32 %v2939_v61, %v1142_v49  ;;  %v1359_v54 = vadd.f32 %v2939_v61, %v1358_v50  ;;  %v1144_v55 = vpop.f32.mrb[75].mxu0  ;;  %v1360_v56 = vpop.f32.mrb[75].mxu1  ;;  %v3204_v50 = vld [vmem:[%s3281_s2] ss:$0 sm:$0xff] }
 0x1ae   : > { %v2411_v57 = vpack.c.bf16 %v1462_v51, %v1462_v51  ;;  %v2465_v58 = vpack.c.bf16 %v1516_v52, %v1516_v52  ;;  %v1463_v59 = vmax.f32 %v1143_v53, 0.0  ;;  %v1517_v60 = vmax.f32 %v1359_v54, 0.0 }
 0x1b0   : > { %2003 = vst.msk [vmem:[%s2949_s16 + $0x90] sm:$0xf] %vm1966_vm0, %v2411_v57  ;;  %2057 = vst.msk [vmem:[%s2949_s16 + $0x168] sm:$0xf] %vm1966_vm0, %v2465_v58  ;;  %v2412_v62 = vpack.c.bf16 %v1463_v59, %v1463_v59  ;;  %v2466_v63 = vpack.c.bf16 %v1517_v60, %v1517_v60 }
 0x1b1   : > { %v1147_v0 = vpop.f32.mrb[76].mxu0  ;;  %v1363_v1 = vpop.f32.mrb[76].mxu1 }
 0x1b2   : > { %2004 = vst.msk [vmem:[%s2949_s16 + $0x94] sm:$0xf] %vm1966_vm0, %v2412_v62  ;;  %2058 = vst.msk [vmem:[%s2949_s16 + $0x16c] sm:$0xf] %vm1966_vm0, %v2466_v63  ;;  %v1148_v2 = vadd.f32 %v2939_v61, %v1147_v0  ;;  %v1364_v3 = vadd.f32 %v2939_v61, %v1363_v1  ;;  %v1149_v4 = vpop.f32.mrb[77].mxu0  ;;  %v1365_v5 = vpop.f32.mrb[77].mxu1 }
 0x1b3   : > { %v1150_v6 = vpop.f32.mrb[78].mxu0  ;;  %v1366_v7 = vpop.f32.mrb[78].mxu1 }
 0x1b4   : > { %v1464_v8 = vmax.f32 %v1148_v2, 0.0  ;;  %v1518_v9 = vmax.f32 %v1364_v3, 0.0  ;;  %v1151_v10 = vadd.f32 %v2939_v61, %v1150_v6  ;;  %v1367_v11 = vadd.f32 %v2939_v61, %v1366_v7  ;;  %v1152_v12 = vpop.f32.mrb[79].mxu0  ;;  %v1368_v13 = vpop.f32.mrb[79].mxu1 }
 0x1b6   : > { %v2413_v14 = vpack.c.bf16 %v1464_v8, %v1464_v8  ;;  %v2467_v15 = vpack.c.bf16 %v1518_v9, %v1518_v9  ;;  %v1465_v16 = vmax.f32 %v1151_v10, 0.0  ;;  %v1519_v17 = vmax.f32 %v1367_v11, 0.0 }
 0x1b8   : > { %2005 = vst.msk [vmem:[%s2949_s16 + $0x98] sm:$0xf] %vm1966_vm0, %v2413_v14  ;;  %2059 = vst.msk [vmem:[%s2949_s16 + $0x170] sm:$0xf] %vm1966_vm0, %v2467_v15  ;;  %v2414_v18 = vpack.c.bf16 %v1465_v16, %v1465_v16  ;;  %v2468_v19 = vpack.c.bf16 %v1519_v17, %v1519_v17 }
 0x1b9   : > { %v1155_v20 = vpop.f32.mrb[80].mxu0  ;;  %v1371_v21 = vpop.f32.mrb[80].mxu1 }
 0x1ba   : > { %2006 = vst.msk [vmem:[%s2949_s16 + $0x9c] sm:$0xf] %vm1966_vm0, %v2414_v18  ;;  %2060 = vst.msk [vmem:[%s2949_s16 + $0x174] sm:$0xf] %vm1966_vm0, %v2468_v19  ;;  %v1156_v22 = vadd.f32 %v2939_v61, %v1155_v20  ;;  %v1372_v23 = vadd.f32 %v2939_v61, %v1371_v21  ;;  %v1157_v24 = vpop.f32.mrb[81].mxu0  ;;  %v1373_v25 = vpop.f32.mrb[81].mxu1 }
 0x1bb   : > { %v1158_v26 = vpop.f32.mrb[82].mxu0  ;;  %v1374_v27 = vpop.f32.mrb[82].mxu1 }
 0x1bc   : > { %v1466_v28 = vmax.f32 %v1156_v22, 0.0  ;;  %v1520_v29 = vmax.f32 %v1372_v23, 0.0  ;;  %v1159_v30 = vadd.f32 %v2939_v61, %v1158_v26  ;;  %v1375_v31 = vadd.f32 %v2939_v61, %v1374_v27  ;;  %v1160_v32 = vpop.f32.mrb[83].mxu0  ;;  %v1376_v33 = vpop.f32.mrb[83].mxu1 }
 0x1be   : > { %v2415_v34 = vpack.c.bf16 %v1466_v28, %v1466_v28  ;;  %v2469_v35 = vpack.c.bf16 %v1520_v29, %v1520_v29  ;;  %v1467_v36 = vmax.f32 %v1159_v30, 0.0  ;;  %v1521_v37 = vmax.f32 %v1375_v31, 0.0 }
 0x1c0   : > { %2007 = vst.msk [vmem:[%s2949_s16 + $0xa0] sm:$0xf] %vm1966_vm0, %v2415_v34  ;;  %2061 = vst.msk [vmem:[%s2949_s16 + $0x178] sm:$0xf] %vm1966_vm0, %v2469_v35  ;;  %v2416_v38 = vpack.c.bf16 %v1467_v36, %v1467_v36  ;;  %v2470_v39 = vpack.c.bf16 %v1521_v37, %v1521_v37 }
 0x1c1   : > { %v1163_v40 = vpop.f32.mrb[84].mxu0  ;;  %v1379_v41 = vpop.f32.mrb[84].mxu1 }
 0x1c2   : > { %2008 = vst.msk [vmem:[%s2949_s16 + $0xa4] sm:$0xf] %vm1966_vm0, %v2416_v38  ;;  %2062 = vst.msk [vmem:[%s2949_s16 + $0x17c] sm:$0xf] %vm1966_vm0, %v2470_v39  ;;  %v1164_v42 = vadd.f32 %v2939_v61, %v1163_v40  ;;  %v1380_v43 = vadd.f32 %v2939_v61, %v1379_v41  ;;  %v1165_v44 = vpop.f32.mrb[85].mxu0  ;;  %v1381_v45 = vpop.f32.mrb[85].mxu1 }
 0x1c3   : > { %v1166_v46 = vpop.f32.mrb[86].mxu0  ;;  %v1382_v47 = vpop.f32.mrb[86].mxu1 }
 0x1c4   : > { %v1468_v48 = vmax.f32 %v1164_v42, 0.0  ;;  %v1522_v49 = vmax.f32 %v1380_v43, 0.0  ;;  %v1167_v51 = vadd.f32 %v3204_v50, %v1166_v46  ;;  %v1383_v52 = vadd.f32 %v3204_v50, %v1382_v47  ;;  %v1168_v61 = vpop.f32.mrb[87].mxu0  ;;  %v1384_v53 = vpop.f32.mrb[87].mxu1 }
 0x1c6   : > { %v2417_v54 = vpack.c.bf16 %v1468_v48, %v1468_v48  ;;  %v2471_v55 = vpack.c.bf16 %v1522_v49, %v1522_v49  ;;  %v1469_v56 = vmax.f32 %v1167_v51, 0.0  ;;  %v1523_v57 = vmax.f32 %v1383_v52, 0.0 }
 0x1c8   : > { %2009 = vst.msk [vmem:[%s2949_s16 + $0xa8] sm:$0xf] %vm1966_vm0, %v2417_v54  ;;  %2063 = vst.msk [vmem:[%s2949_s16 + $0x180] sm:$0xf] %vm1966_vm0, %v2471_v55  ;;  %v2418_v58 = vpack.c.bf16 %v1469_v56, %v1469_v56  ;;  %v2472_v59 = vpack.c.bf16 %v1523_v57, %v1523_v57 }
 0x1c9   : > { %v1171_v60 = vpop.f32.mrb[88].mxu0  ;;  %v1387_v62 = vpop.f32.mrb[88].mxu1 }
 0x1ca   : > { %2010 = vst.msk [vmem:[%s2949_s16 + $0xac] sm:$0xf] %vm1966_vm0, %v2418_v58  ;;  %2064 = vst.msk [vmem:[%s2949_s16 + $0x184] sm:$0xf] %vm1966_vm0, %v2472_v59  ;;  %v1172_v63 = vadd.f32 %v3204_v50, %v1171_v60  ;;  %v1388_v0 = vadd.f32 %v3204_v50, %v1387_v62  ;;  %v1173_v1 = vpop.f32.mrb[89].mxu0  ;;  %v1389_v2 = vpop.f32.mrb[89].mxu1 }
 0x1cb   : > { %v1174_v3 = vpop.f32.mrb[90].mxu0  ;;  %v1390_v4 = vpop.f32.mrb[90].mxu1 }
 0x1cc   : > { %v1470_v5 = vmax.f32 %v1172_v63, 0.0  ;;  %v1524_v6 = vmax.f32 %v1388_v0, 0.0  ;;  %v1175_v7 = vadd.f32 %v3204_v50, %v1174_v3  ;;  %v1391_v8 = vadd.f32 %v3204_v50, %v1390_v4  ;;  %v1176_v9 = vpop.f32.mrb[91].mxu0  ;;  %v1392_v10 = vpop.f32.mrb[91].mxu1 }
 0x1ce   : > { %v2419_v11 = vpack.c.bf16 %v1470_v5, %v1470_v5  ;;  %v2473_v12 = vpack.c.bf16 %v1524_v6, %v1524_v6  ;;  %v1471_v13 = vmax.f32 %v1175_v7, 0.0  ;;  %v1525_v14 = vmax.f32 %v1391_v8, 0.0 }
 0x1d0   : > { %2011 = vst.msk [vmem:[%s2949_s16 + $0xb0] sm:$0xf] %vm1966_vm0, %v2419_v11  ;;  %2065 = vst.msk [vmem:[%s2949_s16 + $0x188] sm:$0xf] %vm1966_vm0, %v2473_v12  ;;  %v2420_v15 = vpack.c.bf16 %v1471_v13, %v1471_v13  ;;  %v2474_v16 = vpack.c.bf16 %v1525_v14, %v1525_v14 }
 0x1d1   : > { %v1179_v17 = vpop.f32.mrb[92].mxu0  ;;  %v1395_v18 = vpop.f32.mrb[92].mxu1 }
 0x1d2   : > { %2012 = vst.msk [vmem:[%s2949_s16 + $0xb4] sm:$0xf] %vm1966_vm0, %v2420_v15  ;;  %2066 = vst.msk [vmem:[%s2949_s16 + $0x18c] sm:$0xf] %vm1966_vm0, %v2474_v16  ;;  %v1180_v19 = vadd.f32 %v3204_v50, %v1179_v17  ;;  %v1396_v20 = vadd.f32 %v3204_v50, %v1395_v18  ;;  %v1181_v21 = vpop.f32.mrb[93].mxu0  ;;  %v1397_v22 = vpop.f32.mrb[93].mxu1 }
 0x1d3   : > { %v1182_v23 = vpop.f32.mrb[94].mxu0  ;;  %v1398_v24 = vpop.f32.mrb[94].mxu1 }
 0x1d4   : > { %v1472_v25 = vmax.f32 %v1180_v19, 0.0  ;;  %v1526_v26 = vmax.f32 %v1396_v20, 0.0  ;;  %v1183_v27 = vadd.f32 %v3204_v50, %v1182_v23  ;;  %v1399_v28 = vadd.f32 %v3204_v50, %v1398_v24  ;;  %v1184_v29 = vpop.f32.mrb[95].mxu0  ;;  %v1400_v30 = vpop.f32.mrb[95].mxu1 }
 0x1d6   : > { %v2421_v31 = vpack.c.bf16 %v1472_v25, %v1472_v25  ;;  %v2475_v32 = vpack.c.bf16 %v1526_v26, %v1526_v26  ;;  %v1473_v33 = vmax.f32 %v1183_v27, 0.0  ;;  %v1527_v34 = vmax.f32 %v1399_v28, 0.0 }
 0x1d8   : > { %2013 = vst.msk [vmem:[%s2949_s16 + $0xb8] sm:$0xf] %vm1966_vm0, %v2421_v31  ;;  %2067 = vst.msk [vmem:[%s2949_s16 + $0x190] sm:$0xf] %vm1966_vm0, %v2475_v32  ;;  %v2422_v35 = vpack.c.bf16 %v1473_v33, %v1473_v33  ;;  %v2476_v36 = vpack.c.bf16 %v1527_v34, %v1527_v34 }
 0x1d9   : > { %v1187_v37 = vpop.f32.mrb[96].mxu0  ;;  %v1403_v38 = vpop.f32.mrb[96].mxu1 }
 0x1da   : > { %2014 = vst.msk [vmem:[%s2949_s16 + $0xbc] sm:$0xf] %vm1966_vm0, %v2422_v35  ;;  %2068 = vst.msk [vmem:[%s2949_s16 + $0x194] sm:$0xf] %vm1966_vm0, %v2476_v36  ;;  %v1188_v39 = vadd.f32 %v3204_v50, %v1187_v37  ;;  %v1404_v40 = vadd.f32 %v3204_v50, %v1403_v38  ;;  %v1189_v41 = vpop.f32.mrb[97].mxu0  ;;  %v1405_v42 = vpop.f32.mrb[97].mxu1 }
 0x1db   : > { %v1190_v43 = vpop.f32.mrb[98].mxu0  ;;  %v1406_v44 = vpop.f32.mrb[98].mxu1 }
 0x1dc   : > { %v1474_v45 = vmax.f32 %v1188_v39, 0.0  ;;  %v1528_v46 = vmax.f32 %v1404_v40, 0.0  ;;  %v1191_v47 = vadd.f32 %v3204_v50, %v1190_v43  ;;  %v1407_v48 = vadd.f32 %v3204_v50, %v1406_v44  ;;  %v1192_v49 = vpop.f32.mrb[99].mxu0  ;;  %v1408_v51 = vpop.f32.mrb[99].mxu1 }
 0x1de   : > { %v2423_v52 = vpack.c.bf16 %v1474_v45, %v1474_v45  ;;  %v2477_v61 = vpack.c.bf16 %v1528_v46, %v1528_v46  ;;  %v1475_v53 = vmax.f32 %v1191_v47, 0.0  ;;  %v1529_v54 = vmax.f32 %v1407_v48, 0.0 }
 0x1e0   : > { %2015 = vst.msk [vmem:[%s2949_s16 + $0xc0] sm:$0xf] %vm1966_vm0, %v2423_v52  ;;  %2069 = vst.msk [vmem:[%s2949_s16 + $0x198] sm:$0xf] %vm1966_vm0, %v2477_v61  ;;  %v2424_v55 = vpack.c.bf16 %v1475_v53, %v1475_v53  ;;  %v2478_v56 = vpack.c.bf16 %v1529_v54, %v1529_v54 }
 0x1e1   : > { %v1195_v57 = vpop.f32.mrb[100].mxu0  ;;  %v1411_v58 = vpop.f32.mrb[100].mxu1 }
 0x1e2   : > { %2016 = vst.msk [vmem:[%s2949_s16 + $0xc4] sm:$0xf] %vm1966_vm0, %v2424_v55  ;;  %2070 = vst.msk [vmem:[%s2949_s16 + $0x19c] sm:$0xf] %vm1966_vm0, %v2478_v56  ;;  %v1196_v59 = vadd.f32 %v3204_v50, %v1195_v57  ;;  %v1412_v60 = vadd.f32 %v3204_v50, %v1411_v58  ;;  %v1197_v62 = vpop.f32.mrb[101].mxu0  ;;  %v1413_v63 = vpop.f32.mrb[101].mxu1 }
 0x1e3   : > { %v1198_v0 = vpop.f32.mrb[102].mxu0  ;;  %v1414_v1 = vpop.f32.mrb[102].mxu1 }
 0x1e4   : > { %v1476_v2 = vmax.f32 %v1196_v59, 0.0  ;;  %v1530_v3 = vmax.f32 %v1412_v60, 0.0  ;;  %v1199_v4 = vadd.f32 %v3204_v50, %v1198_v0  ;;  %v1415_v5 = vadd.f32 %v3204_v50, %v1414_v1  ;;  %v1200_v6 = vpop.f32.mrb[103].mxu0  ;;  %v1416_v7 = vpop.f32.mrb[103].mxu1 }
 0x1e6   : > { %v2425_v8 = vpack.c.bf16 %v1476_v2, %v1476_v2  ;;  %v2479_v9 = vpack.c.bf16 %v1530_v3, %v1530_v3  ;;  %v1477_v10 = vmax.f32 %v1199_v4, 0.0  ;;  %v1531_v11 = vmax.f32 %v1415_v5, 0.0 }
 0x1e8   : > { %2017 = vst.msk [vmem:[%s2949_s16 + $0xc8] sm:$0xf] %vm1966_vm0, %v2425_v8  ;;  %2071 = vst.msk [vmem:[%s2949_s16 + $0x1a0] sm:$0xf] %vm1966_vm0, %v2479_v9  ;;  %v2426_v12 = vpack.c.bf16 %v1477_v10, %v1477_v10  ;;  %v2480_v13 = vpack.c.bf16 %v1531_v11, %v1531_v11 }
 0x1e9   : > { %v1203_v14 = vpop.f32.mrb[104].mxu0  ;;  %v1419_v15 = vpop.f32.mrb[104].mxu1 }
 0x1ea   : > { %2018 = vst.msk [vmem:[%s2949_s16 + $0xcc] sm:$0xf] %vm1966_vm0, %v2426_v12  ;;  %2072 = vst.msk [vmem:[%s2949_s16 + $0x1a4] sm:$0xf] %vm1966_vm0, %v2480_v13  ;;  %v1204_v16 = vadd.f32 %v3204_v50, %v1203_v14  ;;  %v1420_v17 = vadd.f32 %v3204_v50, %v1419_v15  ;;  %v1205_v18 = vpop.f32.mrb[105].mxu0  ;;  %v1421_v19 = vpop.f32.mrb[105].mxu1 }
 0x1eb   : > { %v1206_v20 = vpop.f32.mrb[106].mxu0  ;;  %v1422_v21 = vpop.f32.mrb[106].mxu1 }
 0x1ec   : > { %v1478_v22 = vmax.f32 %v1204_v16, 0.0  ;;  %v1532_v23 = vmax.f32 %v1420_v17, 0.0  ;;  %v1207_v24 = vadd.f32 %v3204_v50, %v1206_v20  ;;  %v1423_v25 = vadd.f32 %v3204_v50, %v1422_v21  ;;  %v1208_v26 = vpop.f32.mrb[107].mxu0  ;;  %v1424_v27 = vpop.f32.mrb[107].mxu1 }
 0x1ee   : > { %v2427_v28 = vpack.c.bf16 %v1478_v22, %v1478_v22  ;;  %v2481_v29 = vpack.c.bf16 %v1532_v23, %v1532_v23  ;;  %v1479_v30 = vmax.f32 %v1207_v24, 0.0  ;;  %v1533_v31 = vmax.f32 %v1423_v25, 0.0 }
 0x1f0   : > { %2019 = vst.msk [vmem:[%s2949_s16 + $0xd0] sm:$0xf] %vm1966_vm0, %v2427_v28  ;;  %2073 = vst.msk [vmem:[%s2949_s16 + $0x1a8] sm:$0xf] %vm1966_vm0, %v2481_v29  ;;  %v2428_v32 = vpack.c.bf16 %v1479_v30, %v1479_v30  ;;  %v2482_v33 = vpack.c.bf16 %v1533_v31, %v1533_v31 }
 0x1f2   : > { %2020 = vst.msk [vmem:[%s2949_s16 + $0xd4] sm:$0xf] %vm1966_vm0, %v2428_v32  ;;  %2074 = vst.msk [vmem:[%s2949_s16 + $0x1ac] sm:$0xf] %vm1966_vm0, %v2482_v33 }
 0x1f3 PF: > { %s13_s12 = sadd.s32 1, %s2709_s12  }
 0x1f4   : > { %p10_p4 = scmp.ge.s32.totalorder %s13_s12, 5  }
 0x1f6   :  { %12 = sbr.rel (!%p10_p4) target bundleno = 1 (0x1), region = 62 }

// kernel: qnetwork_forward.4
= control target key start
LH: loop header
LB: loop body
LE: loop exit
PB: predicated region body
PF: predicated region fallthrough
CT: control target
= control target key end

     0   :  { %s2924_s12 = smov 0   ;;  %s3463_s0 = inlined_call_operand.vmem [shape: bf16[128,2048], index: 0, kind: input, shape index: {}]   ;;  %s3464_s1 = inlined_call_operand.vmem [shape: bf16[2048,32], index: 1, kind: input, shape index: {}]   ;;  %s3465_s2 = inlined_call_operand.vmem [shape: f32[1,32], index: 2, kind: input, shape index: {}]   ;;  %s3466_s3 = inlined_call_operand.vmem [shape: bf16[128,32], index: 3, kind: output, shape index: {}]  }
   0x1 LB: > { %s2218_s13 = sadd.s32 4294967295, %s2902_s12   ;;  %p2222_p0 = scmp.ge.s32.totalorder %s2902_s12, 1  ;;  %s2902_s12 = sphi %s2924_s12, %s13_s12  }
   0x2   : > { %p139_p1 = scmp.lt.s32.totalorder %s2902_s12, 3 }
   0x4   : > { %p140_p2 = pnand %p2222_p0, %p139_p1 }
   0x5   : > { %v2768_v0 = vld [vmem:[%s3464_s1 + $0x40] sm:$0xff] (!%p140_p2)   ;;  %v2772_v4 = vld [vmem:[%s3464_s1 + $0x48] sm:$0xff] (!%p140_p2)   ;;  %v2776_v8 = vld [vmem:[%s3464_s1 + $0x50] sm:$0xff] (!%p140_p2)   ;;  %s2223_s21 = sshll.u32 (!%p140_p2), %s2218_s13, 3  ;;  %vm2153_vm0 = vcmask (!%p140_p2), 257024  }
   0x6   : > { %143 = sbr.rel (%p140_p2) target bundleno = 385 (0x181), region = 32  ;;  %v2769_v1 = vld [vmem:[%s3464_s1 + $0xc0] sm:$0xff] (!%p140_p2)   ;;  %2440 = vmatprep.subr.bf16.mxu0 (!%p140_p2), %v2768_v0  ;;  %v2773_v5 = vld [vmem:[%s3464_s1 + $0xc8] sm:$0xff] (!%p140_p2)   ;;  %v2777_v9 = vld [vmem:[%s3464_s1 + $0xd0] sm:$0xff] (!%p140_p2)   ;;  %p165_p3 = scmp.lt.s32.totalorder (!%p140_p2), %s2223_s21, 15 }
   0x7   : > { %v2770_v2 = vld [vmem:[%s3464_s1] sm:$0xff] (!%p140_p2)   ;;  %2480 = vmatprep.subr.bf16.mxu1 (!%p140_p2), %v2769_v1  ;;  %v2774_v6 = vld [vmem:[%s3464_s1 + $0x8] sm:$0xff] (!%p140_p2)   ;;  %v2778_v10 = vld [vmem:[%s3464_s1 + $0x10] sm:$0xff] (!%p140_p2)  }
   0x8   : > { %v2771_v3 = vld [vmem:[%s3464_s1 + $0x80] sm:$0xff] (!%p140_p2)   ;;  %2441 = vmatpush3.bf16.msra.mxu0 (!%p140_p2), %v2770_v2  ;;  %v2775_v7 = vld [vmem:[%s3464_s1 + $0x88] sm:$0xff] (!%p140_p2)   ;;  %v2779_v11 = vld [vmem:[%s3464_s1 + $0x90] sm:$0xff] (!%p140_p2)  }
   0x9   : > { %2481 = vmatpush3.bf16.msra.mxu1 (!%p140_p2), %v2771_v3  ;;  %2442 = vmatprep.subr.bf16.mxu0 (!%p140_p2), %v2772_v4  ;;  %v2780_v12 = vld [vmem:[%s3464_s1 + $0x58] sm:$0xff] (!%p140_p2)   ;;  %v2784_v16 = vld [vmem:[%s3464_s1 + $0x60] sm:$0xff] (!%p140_p2)   ;;  %v2788_v20 = vld [vmem:[%s3464_s1 + $0x68] sm:$0xff] (!%p140_p2)  }
   0xa   : > { %2482 = vmatprep.subr.bf16.mxu1 (!%p140_p2), %v2773_v5  ;;  %v2781_v13 = vld [vmem:[%s3464_s1 + $0xd8] sm:$0xff] (!%p140_p2)   ;;  %v2785_v17 = vld [vmem:[%s3464_s1 + $0xe0] sm:$0xff] (!%p140_p2)   ;;  %v2789_v21 = vld [vmem:[%s3464_s1 + $0xe8] sm:$0xff] (!%p140_p2)  }
   0xb   : > { %v2782_v14 = vld [vmem:[%s3464_s1 + $0x18] sm:$0xff] (!%p140_p2)   ;;  %v2786_v18 = vld [vmem:[%s3464_s1 + $0x20] sm:$0xff] (!%p140_p2)   ;;  %v2790_v22 = vld [vmem:[%s3464_s1 + $0x28] sm:$0xff] (!%p140_p2)  }
   0xc   : > { %2443 = vmatpush3.bf16.msra.mxu0 (!%p140_p2), %v2774_v6  ;;  %v2783_v15 = vld [vmem:[%s3464_s1 + $0x98] sm:$0xff] (!%p140_p2)   ;;  %v2787_v19 = vld [vmem:[%s3464_s1 + $0xa0] sm:$0xff] (!%p140_p2)   ;;  %v2791_v23 = vld [vmem:[%s3464_s1 + $0xa8] sm:$0xff] (!%p140_p2)  }
   0xd   : > { %2483 = vmatpush3.bf16.msra.mxu1 %v2775_v7  ;;  %2444 = vmatprep.subr.bf16.mxu0 %v2776_v8  ;;  %s3468_s21 = smov (!%p165_p3, %s2223_s21), 15  ;;  %v2792_v24 = vld [vmem:[%s3464_s1 + $0x70] sm:$0xff]   ;;  %v2796_v28 = vld [vmem:[%s3464_s1 + $0x78] sm:$0xff]   ;;  %v2800_v40 = vld [vmem:[%s3464_s1 + $0x140] sm:$0xff]  }
   0xe   : > { %2484 = vmatprep.subr.bf16.mxu1 %v2777_v9  ;;  %v2793_v25 = vld [vmem:[%s3464_s1 + $0xf0] sm:$0xff]   ;;  %s2431_s18 = sshll.u32 %s3468_s21, 6  ;;  %v2797_v29 = vld [vmem:[%s3464_s1 + $0xf8] sm:$0xff]   ;;  %v2801_v41 = vld [vmem:[%s3464_s1 + $0x1c0] sm:$0xff]  }
   0xf   : > { %v2794_v26 = vld [vmem:[%s3464_s1 + $0x30] sm:$0xff]   ;;  %s3030_s28 = scalar_lea.vmem %s3463_s0, %s2431_s18  ;;  %v2798_v30 = vld [vmem:[%s3464_s1 + $0x38] sm:$0xff]   ;;  %v2802_v42 = vld [vmem:[%s3464_s1 + $0x100] sm:$0xff]  }
  0x10   : > { %2445 = vmatpush3.bf16.msra.mxu0 %v2778_v10  ;;  %v2795_v27 = vld [vmem:[%s3464_s1 + $0xb0] sm:$0xff]   ;;  %v2799_v31 = vld [vmem:[%s3464_s1 + $0xb8] sm:$0xff]   ;;  %v178_v32 = vld [vmem:[%s3030_s28] sm:$0xff] }
  0x11   : > { %2485 = vmatpush3.bf16.msra.mxu1 %v2779_v11  ;;  %2446 = vmatprep.subr.bf16.mxu0 %v2780_v12  ;;  %v186_v33 = vld [vmem:[%s3030_s28 + $0x40] sm:$0xff]  ;;  %v179_v34 = vld [vmem:[%s3030_s28 + $0x8] sm:$0xff]  ;;  %v2808_v56 = vld [vmem:[%s3464_s1 + $0x150] sm:$0xff]  }
  0x12   : > { %2486 = vmatprep.subr.bf16.mxu1 %v2781_v13  ;;  %v2229_v35 = vcombine.low %v178_v32, %v186_v33  ;;  %v2230_v36 = vcombine.high %v178_v32, %v186_v33  ;;  %v187_v37 = vld [vmem:[%s3030_s28 + $0x48] sm:$0xff]  ;;  %v2803_v43 = vld [vmem:[%s3464_s1 + $0x180] sm:$0xff]   ;;  %v2809_v57 = vld [vmem:[%s3464_s1 + $0x1d0] sm:$0xff]  }
  0x13   : > { %v2231_v38 = vcombine.low %v179_v34, %v187_v37  ;;  %v2232_v39 = vcombine.high %v179_v34, %v187_v37  ;;  %v2804_v44 = vld [vmem:[%s3464_s1 + $0x148] sm:$0xff]   ;;  %v194_v48 = vld [vmem:[%s3030_s28 + $0x80] sm:$0xff]  ;;  %v2810_v58 = vld [vmem:[%s3464_s1 + $0x110] sm:$0xff]  }
  0x14   : > { %2447 = vmatpush3.bf16.msra.mxu0 %v2782_v14  ;;  %1625 = vmatprep.mubr.bf16.mxu0 %v2230_v36  ;;  %v2805_v45 = vld [vmem:[%s3464_s1 + $0x1c8] sm:$0xff]   ;;  %v202_v49 = vld [vmem:[%s3030_s28 + $0xc0] sm:$0xff]  ;;  %v2811_v59 = vld [vmem:[%s3464_s1 + $0x190] sm:$0xff]  }
  0x15   : > { %2487 = vmatpush3.bf16.msra.mxu1 %v2783_v15  ;;  %2448 = vmatprep.subr.bf16.mxu0 %v2784_v16  ;;  %v2806_v46 = vld [vmem:[%s3464_s1 + $0x108] sm:$0xff]   ;;  %v2246_v50 = vcombine.high %v194_v48, %v202_v49  ;;  %v2245_v53 = vcombine.low %v194_v48, %v202_v49  ;;  %v2812_v60 = vld [vmem:[%s3464_s1 + $0x158] sm:$0xff]   ;;  %v210_v0 = vld [vmem:[%s3030_s28 + $0x100] sm:$0xff] }
  0x16   : > { %2488 = vmatprep.subr.bf16.mxu1 %v2785_v17  ;;  %1690 = vmatprep.mubr.bf16.mxu1 %v2232_v39  ;;  %v2807_v47 = vld [vmem:[%s3464_s1 + $0x188] sm:$0xff]   ;;  %v2813_v61 = vld [vmem:[%s3464_s1 + $0x1d8] sm:$0xff]   ;;  %v218_v1 = vld [vmem:[%s3030_s28 + $0x140] sm:$0xff] }
  0x17   : > { %v195_v51 = vld [vmem:[%s3030_s28 + $0x88] sm:$0xff]  ;;  %v2814_v62 = vld [vmem:[%s3464_s1 + $0x118] sm:$0xff]   ;;  %v2262_v4 = vcombine.high %v210_v0, %v218_v1  ;;  %v2261_v6 = vcombine.low %v210_v0, %v218_v1  ;;  %v2816_v8 = vld [vmem:[%s3464_s1 + $0x160] sm:$0xff]  }
  0x18   : > { %2449 = vmatpush3.bf16.msra.mxu0 %v2786_v18  ;;  %v203_v52 = vld [vmem:[%s3030_s28 + $0xc8] sm:$0xff]  ;;  %v2815_v63 = vld [vmem:[%s3464_s1 + $0x198] sm:$0xff]   ;;  %v2817_v9 = vld [vmem:[%s3464_s1 + $0x1e0] sm:$0xff]  }
  0x19   : > { %2489 = vmatpush3.bf16.msra.mxu1 %v2787_v19  ;;  %2450 = vmatprep.subr.bf16.mxu0 %v2788_v20  ;;  %v2248_v54 = vcombine.high %v195_v51, %v203_v52  ;;  %v2247_v55 = vcombine.low %v195_v51, %v203_v52  ;;  %v211_v2 = vld [vmem:[%s3030_s28 + $0x108] sm:$0xff]  ;;  %v2818_v10 = vld [vmem:[%s3464_s1 + $0x120] sm:$0xff]   ;;  %v180_v32 = vld [vmem:[%s3030_s28 + $0x10] sm:$0xff] }
  0x1a   : > { %2490 = vmatprep.subr.bf16.mxu1 %v2789_v21  ;;  %v219_v3 = vld [vmem:[%s3030_s28 + $0x148] sm:$0xff]  ;;  %v2819_v11 = vld [vmem:[%s3464_s1 + $0x1a0] sm:$0xff]   ;;  %v188_v33 = vld [vmem:[%s3030_s28 + $0x50] sm:$0xff] }
  0x1b   : > { %v2264_v5 = vcombine.high %v211_v2, %v219_v3  ;;  %v2263_v7 = vcombine.low %v211_v2, %v219_v3  ;;  %v2820_v12 = vld [vmem:[%s3464_s1 + $0x168] sm:$0xff]   ;;  %v226_v16 = vld [vmem:[%s3030_s28 + $0x180] sm:$0xff]  ;;  %v2233_v34 = vcombine.low %v180_v32, %v188_v33  ;;  %v181_v36 = vld [vmem:[%s3030_s28 + $0x18] sm:$0xff] }
  0x1c   : > { %2451 = vmatpush3.bf16.msra.mxu0 %v2790_v22  ;;  %v2821_v13 = vld [vmem:[%s3464_s1 + $0x1e8] sm:$0xff]   ;;  %v234_v17 = vld [vmem:[%s3030_s28 + $0x1c0] sm:$0xff]  ;;  %v189_v37 = vld [vmem:[%s3030_s28 + $0x58] sm:$0xff] }
  0x1d   : > { %2491 = vmatpush3.bf16.msra.mxu1 %v2791_v23  ;;  %2452 = vmatprep.subr.bf16.mxu0 %v2792_v24  ;;  %v2822_v14 = vld [vmem:[%s3464_s1 + $0x128] sm:$0xff]   ;;  %v2278_v19 = vcombine.high %v226_v16, %v234_v17  ;;  %v2277_v21 = vcombine.low %v226_v16, %v234_v17  ;;  %v2824_v24 = vld [vmem:[%s3464_s1 + $0x170] sm:$0xff]   ;;  %v2236_v39 = vcombine.high %v181_v36, %v189_v37  ;;  %v205_v51 = vld [vmem:[%s3030_s28 + $0xd8] sm:$0xff] }
  0x1e   : > { %2492 = vmatprep.subr.bf16.mxu1 %v2793_v25  ;;  %v2823_v15 = vld [vmem:[%s3464_s1 + $0x1a8] sm:$0xff]   ;;  %v2825_v25 = vld [vmem:[%s3464_s1 + $0x1f0] sm:$0xff]   ;;  %v213_v2 = vld [vmem:[%s3030_s28 + $0x118] sm:$0xff] }
  0x1f   : > { %v227_v18 = vld [vmem:[%s3030_s28 + $0x188] sm:$0xff]  ;;  %v196_v48 = vld [vmem:[%s3030_s28 + $0x90] sm:$0xff] }
  0x20   : > { %2453 = vmatpush3.bf16.msra.mxu0 %v2794_v26  ;;  %v235_v20 = vld [vmem:[%s3030_s28 + $0x1c8] sm:$0xff]  ;;  %v2826_v26 = vld [vmem:[%s3464_s1 + $0x130] sm:$0xff]  }
  0x21   : > { %2493 = vmatpush3.bf16.msra.mxu1 %v2795_v27  ;;  %2454 = vmatprep.subr.bf16.mxu0 %v2796_v28  ;;  %v2280_v22 = vcombine.high %v227_v18, %v235_v20  ;;  %v2279_v23 = vcombine.low %v227_v18, %v235_v20  ;;  %v2827_v27 = vld [vmem:[%s3464_s1 + $0x1b0] sm:$0xff]   ;;  %v2828_v28 = vld [vmem:[%s3464_s1 + $0x178] sm:$0xff]  }
  0x22   : > { %2494 = vmatprep.subr.bf16.mxu1 %v2797_v29  ;;  %v2829_v29 = vld [vmem:[%s3464_s1 + $0x1f8] sm:$0xff]   ;;  %v204_v49 = vld [vmem:[%s3030_s28 + $0xd0] sm:$0xff] }
  0x23   : > { %v2250_v52 = vcombine.high %v196_v48, %v204_v49  ;;  %v212_v0 = vld [vmem:[%s3030_s28 + $0x110] sm:$0xff]  ;;  %v237_v20 = vld [vmem:[%s3030_s28 + $0x1d8] sm:$0xff] }
  0x24   : > { %2455 = vmatpush3.bf16.msra.mxu0 %v2798_v30  ;;  %v2830_v30 = vld [vmem:[%s3464_s1 + $0x138] sm:$0xff]   ;;  %v220_v1 = vld [vmem:[%s3030_s28 + $0x150] sm:$0xff] }
  0x25   : > { %2495 = vmatpush3.bf16.msra.mxu1 %v2799_v31  ;;  %2520 = vmatprep.subr.bf16.mxu0 %v2800_v40  ;;  %v2831_v31 = vld [vmem:[%s3464_s1 + $0x1b8] sm:$0xff]   ;;  %v2832_v40 = vld [vmem:[%s3464_s1 + $0x240] sm:$0xff]   ;;  %v2266_v3 = vcombine.high %v212_v0, %v220_v1  ;;  %v228_v16 = vld [vmem:[%s3030_s28 + $0x190] sm:$0xff] }
  0x26   : > { %2560 = vmatprep.subr.bf16.mxu1 %v2801_v41  ;;  %v2833_v41 = vld [vmem:[%s3464_s1 + $0x2c0] sm:$0xff]   ;;  %v236_v17 = vld [vmem:[%s3030_s28 + $0x1d0] sm:$0xff] }
  0x27   : > { %1626 = vmatmul.mubr.bf16.vlgmr.msra.gmra.mrb[0].mxu0 %v2229_v35  ;;  %v2234_v35 = vcombine.high %v180_v32, %v188_v33  ;;  %v2282_v18 = vcombine.high %v228_v16, %v236_v17  ;;  %v182_v32 = vld [vmem:[%s3030_s28 + $0x20] sm:$0xff] }
  0x28   : > { %1691 = vmatmul.mubr.bf16.vlgmr.msra.gmra.mrb[0].mxu1 %v2231_v38  ;;  %2521 = vmatpush3.bf16.msra.mxu0 %v2802_v42  ;;  %v2235_v38 = vcombine.low %v181_v36, %v189_v37  ;;  %v2834_v42 = vld [vmem:[%s3464_s1 + $0x200] sm:$0xff]  }
  0x29   : > { %2561 = vmatpush3.bf16.msra.mxu1 %v2803_v43  ;;  %2522 = vmatprep.subr.bf16.mxu0 %v2804_v44  ;;  %v2835_v43 = vld [vmem:[%s3464_s1 + $0x280] sm:$0xff]   ;;  %v2836_v44 = vld [vmem:[%s3464_s1 + $0x248] sm:$0xff]  }
  0x2a   : > { %2562 = vmatprep.subr.bf16.mxu1 %v2805_v45  ;;  %1633 = vmatprep.mubr.bf16.mxu0 %v2246_v50  ;;  %v2837_v45 = vld [vmem:[%s3464_s1 + $0x2c8] sm:$0xff]   ;;  %v197_v50 = vld [vmem:[%s3030_s28 + $0x98] sm:$0xff]  ;;  %v190_v33 = vld [vmem:[%s3030_s28 + $0x60] sm:$0xff] }
  0x2b   : > { %1698 = vmatprep.mubr.bf16.mxu1 %v2248_v54  ;;  %v2249_v54 = vcombine.low %v196_v48, %v204_v49  ;;  %v2237_v36 = vcombine.low %v182_v32, %v190_v33  ;;  %v2238_v37 = vcombine.high %v182_v32, %v190_v33  ;;  %v198_v48 = vld [vmem:[%s3030_s28 + $0xa0] sm:$0xff]  ;;  %v184_v32 = vld [vmem:[%s3030_s28 + $0x30] sm:$0xff] }
  0x2c   : > { %2523 = vmatpush3.bf16.msra.mxu0 %v2806_v46  ;;  %v2838_v46 = vld [vmem:[%s3464_s1 + $0x208] sm:$0xff]   ;;  %v206_v49 = vld [vmem:[%s3030_s28 + $0xe0] sm:$0xff]  ;;  %v192_v33 = vld [vmem:[%s3030_s28 + $0x70] sm:$0xff] }
  0x2d   : > { %2563 = vmatpush3.bf16.msra.mxu1 %v2807_v47  ;;  %2524 = vmatprep.subr.bf16.mxu0 %v2808_v56  ;;  %v2839_v47 = vld [vmem:[%s3464_s1 + $0x288] sm:$0xff]   ;;  %v2840_v56 = vld [vmem:[%s3464_s1 + $0x250] sm:$0xff]  }
  0x2e   : > { %2564 = vmatprep.subr.bf16.mxu1 %v2809_v57  ;;  %v2841_v57 = vld [vmem:[%s3464_s1 + $0x2d0] sm:$0xff]  }
  0x2f   : > { %1634 = vmatmul.mubr.bf16.gmra.mrb[4].mxu0 %v2245_v53  ;;  %v2252_v53 = vcombine.high %v197_v50, %v205_v51 }
  0x30   : > { %1699 = vmatmul.mubr.bf16.gmra.mrb[4].mxu1 %v2247_v55  ;;  %2525 = vmatpush3.bf16.msra.mxu0 %v2810_v58  ;;  %v2251_v55 = vcombine.low %v197_v50, %v205_v51  ;;  %v2842_v58 = vld [vmem:[%s3464_s1 + $0x210] sm:$0xff]   ;;  %v199_v50 = vld [vmem:[%s3030_s28 + $0xa8] sm:$0xff]  ;;  %v2254_v51 = vcombine.high %v198_v48, %v206_v49 }
  0x31   : > { %2565 = vmatpush3.bf16.msra.mxu1 %v2811_v59  ;;  %2526 = vmatprep.subr.bf16.mxu0 %v2812_v60  ;;  %v2843_v59 = vld [vmem:[%s3464_s1 + $0x290] sm:$0xff]   ;;  %v2844_v60 = vld [vmem:[%s3464_s1 + $0x258] sm:$0xff]  }
  0x32   : > { %2566 = vmatprep.subr.bf16.mxu1 %v2813_v61  ;;  %1641 = vmatprep.mubr.bf16.mxu0 %v2262_v4  ;;  %v2845_v61 = vld [vmem:[%s3464_s1 + $0x2d8] sm:$0xff]  }
  0x33   : > { %1706 = vmatprep.mubr.bf16.mxu1 %v2264_v5  ;;  %v221_v4 = vld [vmem:[%s3030_s28 + $0x158] sm:$0xff]  ;;  %v2265_v5 = vcombine.low %v212_v0, %v220_v1  ;;  %v214_v0 = vld [vmem:[%s3030_s28 + $0x120] sm:$0xff] }
  0x34   : > { %2527 = vmatpush3.bf16.msra.mxu0 %v2814_v62  ;;  %v2846_v62 = vld [vmem:[%s3464_s1 + $0x218] sm:$0xff]   ;;  %v222_v1 = vld [vmem:[%s3030_s28 + $0x160] sm:$0xff] }
  0x35   : > { %2567 = vmatpush3.bf16.msra.mxu1 %v2815_v63  ;;  %2528 = vmatprep.subr.bf16.mxu0 %v2816_v8  ;;  %v2847_v63 = vld [vmem:[%s3464_s1 + $0x298] sm:$0xff]   ;;  %v2848_v8 = vld [vmem:[%s3464_s1 + $0x260] sm:$0xff]  }
  0x36   : > { %2568 = vmatprep.subr.bf16.mxu1 %v2817_v9  ;;  %v2849_v9 = vld [vmem:[%s3464_s1 + $0x2e0] sm:$0xff]  }
  0x37   : > { %1642 = vmatmul.mubr.bf16.gmra.mrb[8].mxu0 %v2261_v6  ;;  %v2268_v6 = vcombine.high %v213_v2, %v221_v4 }
  0x38   : > { %1707 = vmatmul.mubr.bf16.gmra.mrb[8].mxu1 %v2263_v7  ;;  %2529 = vmatpush3.bf16.msra.mxu0 %v2818_v10  ;;  %v2267_v7 = vcombine.low %v213_v2, %v221_v4  ;;  %v2850_v10 = vld [vmem:[%s3464_s1 + $0x220] sm:$0xff]   ;;  %v2270_v2 = vcombine.high %v214_v0, %v222_v1  ;;  %v223_v4 = vld [vmem:[%s3030_s28 + $0x168] sm:$0xff] }
  0x39   : > { %2569 = vmatpush3.bf16.msra.mxu1 %v2819_v11  ;;  %2530 = vmatprep.subr.bf16.mxu0 %v2820_v12  ;;  %v2851_v11 = vld [vmem:[%s3464_s1 + $0x2a0] sm:$0xff]   ;;  %v2852_v12 = vld [vmem:[%s3464_s1 + $0x268] sm:$0xff]  }
  0x3a   : > { %2570 = vmatprep.subr.bf16.mxu1 %v2821_v13  ;;  %1649 = vmatprep.mubr.bf16.mxu0 %v2278_v19  ;;  %v2853_v13 = vld [vmem:[%s3464_s1 + $0x2e8] sm:$0xff]   ;;  %v229_v19 = vld [vmem:[%s3030_s28 + $0x198] sm:$0xff] }
  0x3b   : > { %1714 = vmatprep.mubr.bf16.mxu1 %v2280_v22  ;;  %v2284_v22 = vcombine.high %v229_v19, %v237_v20 }
  0x3c   : > { %2531 = vmatpush3.bf16.msra.mxu0 %v2822_v14  ;;  %v2854_v14 = vld [vmem:[%s3464_s1 + $0x228] sm:$0xff]  }
  0x3d   : > { %2571 = vmatpush3.bf16.msra.mxu1 %v2823_v15  ;;  %2532 = vmatprep.subr.bf16.mxu0 %v2824_v24  ;;  %v2855_v15 = vld [vmem:[%s3464_s1 + $0x2a8] sm:$0xff]   ;;  %v2856_v24 = vld [vmem:[%s3464_s1 + $0x270] sm:$0xff]  }
  0x3e   : > { %2572 = vmatprep.subr.bf16.mxu1 %v2825_v25  ;;  %v2857_v25 = vld [vmem:[%s3464_s1 + $0x2f0] sm:$0xff]  }
  0x3f   : > { %1650 = vmatmul.mubr.bf16.gmra.mrb[12].mxu0 %v2277_v21  ;;  %v2281_v21 = vcombine.low %v228_v16, %v236_v17  ;;  %v230_v16 = vld [vmem:[%s3030_s28 + $0x1a0] sm:$0xff] }
  0x40   : > { %1715 = vmatmul.mubr.bf16.gmra.mrb[12].mxu1 %v2279_v23  ;;  %2533 = vmatpush3.bf16.msra.mxu0 %v2826_v26  ;;  %v2283_v23 = vcombine.low %v229_v19, %v237_v20  ;;  %v2858_v26 = vld [vmem:[%s3464_s1 + $0x230] sm:$0xff]   ;;  %v238_v17 = vld [vmem:[%s3030_s28 + $0x1e0] sm:$0xff]  ;;  %v239_v19 = vld [vmem:[%s3030_s28 + $0x1e8] sm:$0xff] }
  0x41   : > { %2573 = vmatpush3.bf16.msra.mxu1 %v2827_v27  ;;  %2534 = vmatprep.subr.bf16.mxu0 %v2828_v28  ;;  %v2859_v27 = vld [vmem:[%s3464_s1 + $0x2b0] sm:$0xff]   ;;  %v2860_v28 = vld [vmem:[%s3464_s1 + $0x278] sm:$0xff]   ;;  %v2286_v20 = vcombine.high %v230_v16, %v238_v17 }
  0x42   : > { %2574 = vmatprep.subr.bf16.mxu1 %v2829_v29  ;;  %1755 = vmatprep.mubr.bf16.mxu0 %v2234_v35  ;;  %v2861_v29 = vld [vmem:[%s3464_s1 + $0x2f8] sm:$0xff]   ;;  %v191_v35 = vld [vmem:[%s3030_s28 + $0x68] sm:$0xff] }
  0x43   : > { %1820 = vmatprep.mubr.bf16.mxu1 %v2236_v39 }
  0x44   : > { %2535 = vmatpush3.bf16.msra.mxu0 %v2830_v30  ;;  %v2862_v30 = vld [vmem:[%s3464_s1 + $0x238] sm:$0xff]  }
  0x45   : > { %2575 = vmatpush3.bf16.msra.mxu1 %v2831_v31  ;;  %2600 = vmatprep.subr.bf16.mxu0 %v2832_v40  ;;  %v2863_v31 = vld [vmem:[%s3464_s1 + $0x2b8] sm:$0xff]   ;;  %v2864_v40 = vld [vmem:[%s3464_s1 + $0x340] sm:$0xff]  }
  0x46   : > { %2640 = vmatprep.subr.bf16.mxu1 %v2833_v41  ;;  %v2865_v41 = vld [vmem:[%s3464_s1 + $0x3c0] sm:$0xff]  }
  0x47   : > { %1756 = vmatmul.mubr.bf16.vlgmr.msra.gmra.mrb[16].mxu0 %v2233_v34  ;;  %v183_v34 = vld [vmem:[%s3030_s28 + $0x28] sm:$0xff] }
  0x48   : > { %1821 = vmatmul.mubr.bf16.vlgmr.msra.gmra.mrb[16].mxu1 %v2235_v38  ;;  %2601 = vmatpush3.bf16.msra.mxu0 %v2834_v42  ;;  %v2239_v38 = vcombine.low %v183_v34, %v191_v35  ;;  %v2240_v39 = vcombine.high %v183_v34, %v191_v35  ;;  %v2866_v42 = vld [vmem:[%s3464_s1 + $0x300] sm:$0xff]   ;;  %v185_v34 = vld [vmem:[%s3030_s28 + $0x38] sm:$0xff]  ;;  %v2241_v35 = vcombine.low %v184_v32, %v192_v33 }
  0x49   : > { %2641 = vmatpush3.bf16.msra.mxu1 %v2835_v43  ;;  %2602 = vmatprep.subr.bf16.mxu0 %v2836_v44  ;;  %v2867_v43 = vld [vmem:[%s3464_s1 + $0x380] sm:$0xff]   ;;  %v2868_v44 = vld [vmem:[%s3464_s1 + $0x348] sm:$0xff]  }
  0x4a   : > { %2642 = vmatprep.subr.bf16.mxu1 %v2837_v45  ;;  %1763 = vmatprep.mubr.bf16.mxu0 %v2250_v52  ;;  %v2869_v45 = vld [vmem:[%s3464_s1 + $0x3c8] sm:$0xff]  }
  0x4b   : > { %1828 = vmatprep.mubr.bf16.mxu1 %v2252_v53  ;;  %v207_v52 = vld [vmem:[%s3030_s28 + $0xe8] sm:$0xff]  ;;  %v2253_v53 = vcombine.low %v198_v48, %v206_v49  ;;  %v217_v48 = vld [vmem:[%s3030_s28 + $0x138] sm:$0xff] }
  0x4c   : > { %2603 = vmatpush3.bf16.msra.mxu0 %v2838_v46  ;;  %v2870_v46 = vld [vmem:[%s3464_s1 + $0x308] sm:$0xff]   ;;  %v225_v49 = vld [vmem:[%s3030_s28 + $0x178] sm:$0xff] }
  0x4d   : > { %2643 = vmatpush3.bf16.msra.mxu1 %v2839_v47  ;;  %2604 = vmatprep.subr.bf16.mxu0 %v2840_v56  ;;  %v2871_v47 = vld [vmem:[%s3464_s1 + $0x388] sm:$0xff]   ;;  %v2872_v56 = vld [vmem:[%s3464_s1 + $0x350] sm:$0xff]  }
  0x4e   : > { %2644 = vmatprep.subr.bf16.mxu1 %v2841_v57  ;;  %v2873_v57 = vld [vmem:[%s3464_s1 + $0x3d0] sm:$0xff]  }
  0x4f   : > { %1764 = vmatmul.mubr.bf16.gmra.mrb[20].mxu0 %v2249_v54  ;;  %v2256_v54 = vcombine.high %v199_v50, %v207_v52 }
  0x50   : > { %1829 = vmatmul.mubr.bf16.gmra.mrb[20].mxu1 %v2251_v55  ;;  %2605 = vmatpush3.bf16.msra.mxu0 %v2842_v58  ;;  %v2255_v55 = vcombine.low %v199_v50, %v207_v52  ;;  %v2874_v58 = vld [vmem:[%s3464_s1 + $0x310] sm:$0xff]  }
  0x51   : > { %2645 = vmatpush3.bf16.msra.mxu1 %v2843_v59  ;;  %2606 = vmatprep.subr.bf16.mxu0 %v2844_v60  ;;  %v2875_v59 = vld [vmem:[%s3464_s1 + $0x390] sm:$0xff]   ;;  %v2876_v60 = vld [vmem:[%s3464_s1 + $0x358] sm:$0xff]  }
  0x52   : > { %2646 = vmatprep.subr.bf16.mxu1 %v2845_v61  ;;  %1771 = vmatprep.mubr.bf16.mxu0 %v2266_v3  ;;  %v2877_v61 = vld [vmem:[%s3464_s1 + $0x3d8] sm:$0xff]   ;;  %v215_v3 = vld [vmem:[%s3030_s28 + $0x128] sm:$0xff] }
  0x53   : > { %1836 = vmatprep.mubr.bf16.mxu1 %v2268_v6  ;;  %v2272_v6 = vcombine.high %v215_v3, %v223_v4 }
  0x54   : > { %2607 = vmatpush3.bf16.msra.mxu0 %v2846_v62  ;;  %v2878_v62 = vld [vmem:[%s3464_s1 + $0x318] sm:$0xff]  }
  0x55   : > { %2647 = vmatpush3.bf16.msra.mxu1 %v2847_v63  ;;  %2608 = vmatprep.subr.bf16.mxu0 %v2848_v8  ;;  %v2879_v63 = vld [vmem:[%s3464_s1 + $0x398] sm:$0xff]   ;;  %v2880_v8 = vld [vmem:[%s3464_s1 + $0x360] sm:$0xff]  }
  0x56   : > { %2648 = vmatprep.subr.bf16.mxu1 %v2849_v9  ;;  %v2881_v9 = vld [vmem:[%s3464_s1 + $0x3e0] sm:$0xff]  }
  0x57   : > { %1772 = vmatmul.mubr.bf16.gmra.mrb[24].mxu0 %v2265_v5  ;;  %v2269_v5 = vcombine.low %v214_v0, %v222_v1 }
  0x58   : > { %1837 = vmatmul.mubr.bf16.gmra.mrb[24].mxu1 %v2267_v7  ;;  %2609 = vmatpush3.bf16.msra.mxu0 %v2850_v10  ;;  %v2271_v7 = vcombine.low %v215_v3, %v223_v4  ;;  %v2882_v10 = vld [vmem:[%s3464_s1 + $0x320] sm:$0xff]  }
  0x59   : > { %2649 = vmatpush3.bf16.msra.mxu1 %v2851_v11  ;;  %2610 = vmatprep.subr.bf16.mxu0 %v2852_v12  ;;  %v2883_v11 = vld [vmem:[%s3464_s1 + $0x3a0] sm:$0xff]   ;;  %v2884_v12 = vld [vmem:[%s3464_s1 + $0x368] sm:$0xff]  }
  0x5a   : > { %2650 = vmatprep.subr.bf16.mxu1 %v2853_v13  ;;  %1779 = vmatprep.mubr.bf16.mxu0 %v2282_v18  ;;  %v2885_v13 = vld [vmem:[%s3464_s1 + $0x3e8] sm:$0xff]  }
  0x5b   : > { %1844 = vmatprep.mubr.bf16.mxu1 %v2284_v22  ;;  %v231_v18 = vld [vmem:[%s3030_s28 + $0x1a8] sm:$0xff]  ;;  %v2285_v22 = vcombine.low %v230_v16, %v238_v17 }
  0x5c   : > { %2611 = vmatpush3.bf16.msra.mxu0 %v2854_v14  ;;  %v2886_v14 = vld [vmem:[%s3464_s1 + $0x328] sm:$0xff]  }
  0x5d   : > { %2651 = vmatpush3.bf16.msra.mxu1 %v2855_v15  ;;  %2612 = vmatprep.subr.bf16.mxu0 %v2856_v24  ;;  %v2887_v15 = vld [vmem:[%s3464_s1 + $0x3a8] sm:$0xff]   ;;  %v2888_v24 = vld [vmem:[%s3464_s1 + $0x370] sm:$0xff]  }
  0x5e   : > { %2652 = vmatprep.subr.bf16.mxu1 %v2857_v25  ;;  %v2889_v25 = vld [vmem:[%s3464_s1 + $0x3f0] sm:$0xff]  }
  0x5f   : > { %1780 = vmatmul.mubr.bf16.gmra.mrb[28].mxu0 %v2281_v21  ;;  %v2288_v21 = vcombine.high %v231_v18, %v239_v19 }
  0x60   : > { %1845 = vmatmul.mubr.bf16.gmra.mrb[28].mxu1 %v2283_v23  ;;  %2613 = vmatpush3.bf16.msra.mxu0 %v2858_v26  ;;  %v2287_v23 = vcombine.low %v231_v18, %v239_v19  ;;  %v2890_v26 = vld [vmem:[%s3464_s1 + $0x330] sm:$0xff]  }
  0x61   : > { %2653 = vmatpush3.bf16.msra.mxu1 %v2859_v27  ;;  %2614 = vmatprep.subr.bf16.mxu0 %v2860_v28  ;;  %v2891_v27 = vld [vmem:[%s3464_s1 + $0x3b0] sm:$0xff]   ;;  %v2892_v28 = vld [vmem:[%s3464_s1 + $0x378] sm:$0xff]  }
  0x62   : > { %2654 = vmatprep.subr.bf16.mxu1 %v2861_v29  ;;  %1885 = vmatprep.mubr.bf16.mxu0 %v2238_v37  ;;  %v2893_v29 = vld [vmem:[%s3464_s1 + $0x3f8] sm:$0xff]  }
  0x63   : > { %1950 = vmatprep.mubr.bf16.mxu1 %v2240_v39  ;;  %v193_v37 = vld [vmem:[%s3030_s28 + $0x78] sm:$0xff]  ;;  %v208_v39 = vld [vmem:[%s3030_s28 + $0xf0] sm:$0xff] }
  0x64   : > { %2615 = vmatpush3.bf16.msra.mxu0 %v2862_v30  ;;  %v2894_v30 = vld [vmem:[%s3464_s1 + $0x338] sm:$0xff]  }
  0x65   : > { %2655 = vmatpush3.bf16.msra.mxu1 %v2863_v31  ;;  %2680 = vmatprep.subr.bf16.mxu0 %v2864_v40  ;;  %v2895_v31 = vld [vmem:[%s3464_s1 + $0x3b8] sm:$0xff]   ;;  %v2243_v40 = vcombine.low %v185_v34, %v193_v37 }
  0x66   : > { %2720 = vmatprep.subr.bf16.mxu1 %v2865_v41  ;;  %v2244_v41 = vcombine.high %v185_v34, %v193_v37 }
  0x67   : > { %1886 = vmatmul.mubr.bf16.vlgmr.msra.gmra.mrb[32].mxu0 %v2237_v36  ;;  %v2242_v36 = vcombine.high %v184_v32, %v192_v33 }
  0x68   : > { %1951 = vmatmul.mubr.bf16.vlgmr.msra.gmra.mrb[32].mxu1 %v2239_v38  ;;  %2681 = vmatpush3.bf16.msra.mxu0 %v2866_v42  ;;  %v200_v38 = vld [vmem:[%s3030_s28 + $0xb0] sm:$0xff] }
  0x69   : > { %2721 = vmatpush3.bf16.msra.mxu1 %v2867_v43  ;;  %2682 = vmatprep.subr.bf16.mxu0 %v2868_v44  ;;  %v2258_v42 = vcombine.high %v200_v38, %v208_v39  ;;  %v201_v43 = vld [vmem:[%s3030_s28 + $0xb8] sm:$0xff]  ;;  %v2257_v50 = vcombine.low %v200_v38, %v208_v39 }
  0x6a   : > { %2722 = vmatprep.subr.bf16.mxu1 %v2869_v45  ;;  %1893 = vmatprep.mubr.bf16.mxu0 %v2254_v51  ;;  %v209_v44 = vld [vmem:[%s3030_s28 + $0xf8] sm:$0xff] }
  0x6b   : > { %1958 = vmatprep.mubr.bf16.mxu1 %v2256_v54  ;;  %v2260_v45 = vcombine.high %v201_v43, %v209_v44  ;;  %v2259_v51 = vcombine.low %v201_v43, %v209_v44  ;;  %v232_v54 = vld [vmem:[%s3030_s28 + $0x1b0] sm:$0xff] }
  0x6c   : > { %2683 = vmatpush3.bf16.msra.mxu0 %v2870_v46  ;;  %v216_v46 = vld [vmem:[%s3030_s28 + $0x130] sm:$0xff] }
  0x6d   : > { %2723 = vmatpush3.bf16.msra.mxu1 %v2871_v47  ;;  %2684 = vmatprep.subr.bf16.mxu0 %v2872_v56  ;;  %v224_v47 = vld [vmem:[%s3030_s28 + $0x170] sm:$0xff]  ;;  %v233_v56 = vld [vmem:[%s3030_s28 + $0x1b8] sm:$0xff] }
  0x6e   : > { %2724 = vmatprep.subr.bf16.mxu1 %v2873_v57  ;;  %v2274_v52 = vcombine.high %v216_v46, %v224_v47  ;;  %v241_v57 = vld [vmem:[%s3030_s28 + $0x1f8] sm:$0xff] }
  0x6f   : > { %1894 = vmatmul.mubr.bf16.gmra.mrb[36].mxu0 %v2253_v53  ;;  %v2276_v53 = vcombine.high %v217_v48, %v225_v49 }
  0x70   : > { %1959 = vmatmul.mubr.bf16.gmra.mrb[36].mxu1 %v2255_v55  ;;  %2685 = vmatpush3.bf16.msra.mxu0 %v2874_v58  ;;  %v240_v55 = vld [vmem:[%s3030_s28 + $0x1f0] sm:$0xff]  ;;  %v2273_v58 = vcombine.low %v216_v46, %v224_v47  ;;  %s2227_s28 = sshll.u32 %s3468_s21, 2 }
  0x71   : > { %2725 = vmatpush3.bf16.msra.mxu1 %v2875_v59  ;;  %2686 = vmatprep.subr.bf16.mxu0 %v2876_v60  ;;  %v2275_v59 = vcombine.low %v217_v48, %v225_v49  ;;  %v2290_v60 = vcombine.high %v232_v54, %v240_v55  ;;  %s3436_s9 = scalar_lea.vmem %s3466_s3, %s2227_s28 }
  0x72   : > { %2726 = vmatprep.subr.bf16.mxu1 %v2877_v61  ;;  %1901 = vmatprep.mubr.bf16.mxu0 %v2270_v2  ;;  %v2292_v61 = vcombine.high %v233_v56, %v241_v57  ;;  %v2228_v2 = vld [vmem:[%s3465_s2] ss:$0 sm:$0xff] }
  0x73   : > { %1966 = vmatprep.mubr.bf16.mxu1 %v2272_v6 }
  0x74   : > { %2687 = vmatpush3.bf16.msra.mxu0 %v2878_v62  ;;  %v2289_v62 = vcombine.low %v232_v54, %v240_v55 }
  0x75   : > { %2727 = vmatpush3.bf16.msra.mxu1 %v2879_v63  ;;  %2688 = vmatprep.subr.bf16.mxu0 %v2880_v8  ;;  %v2291_v63 = vcombine.low %v233_v56, %v241_v57 }
  0x76   : > { %2728 = vmatprep.subr.bf16.mxu1 %v2881_v9 }
  0x77   : > { %1902 = vmatmul.mubr.bf16.gmra.mrb[40].mxu0 %v2269_v5 }
  0x78   : > { %1967 = vmatmul.mubr.bf16.gmra.mrb[40].mxu1 %v2271_v7  ;;  %2689 = vmatpush3.bf16.msra.mxu0 %v2882_v10 }
  0x79   : > { %2729 = vmatpush3.bf16.msra.mxu1 %v2883_v11  ;;  %2690 = vmatprep.subr.bf16.mxu0 %v2884_v12 }
  0x7a   : > { %2730 = vmatprep.subr.bf16.mxu1 %v2885_v13  ;;  %1909 = vmatprep.mubr.bf16.mxu0 %v2286_v20 }
  0x7b   : > { %1974 = vmatprep.mubr.bf16.mxu1 %v2288_v21 }
  0x7c   : > { %2691 = vmatpush3.bf16.msra.mxu0 %v2886_v14 }
  0x7d   : > { %2731 = vmatpush3.bf16.msra.mxu1 %v2887_v15  ;;  %2692 = vmatprep.subr.bf16.mxu0 %v2888_v24 }
  0x7e   : > { %2732 = vmatprep.subr.bf16.mxu1 %v2889_v25 }
  0x7f   : > { %1910 = vmatmul.mubr.bf16.gmra.mrb[44].mxu0 %v2285_v22 }
  0x80   : > { %1975 = vmatmul.mubr.bf16.gmra.mrb[44].mxu1 %v2287_v23  ;;  %2693 = vmatpush3.bf16.msra.mxu0 %v2890_v26 }
  0x81   : > { %2733 = vmatpush3.bf16.msra.mxu1 %v2891_v27  ;;  %2694 = vmatprep.subr.bf16.mxu0 %v2892_v28 }
  0x82   : > { %2734 = vmatprep.subr.bf16.mxu1 %v2893_v29  ;;  %2015 = vmatprep.mubr.bf16.mxu0 %v2242_v36 }
  0x83   : > { %2080 = vmatprep.mubr.bf16.mxu1 %v2244_v41 }
  0x84   : > { %2695 = vmatpush3.bf16.msra.mxu0 %v2894_v30 }
  0x85   : > { %2735 = vmatpush3.bf16.msra.mxu1 %v2895_v31 }
  0x87   : > { %2016 = vmatmul.mubr.bf16.vlgmr.msra.gmra.mrb[48].mxu0 %v2241_v35 }
  0x88   : > { %2081 = vmatmul.mubr.bf16.vlgmr.msra.gmra.mrb[48].mxu1 %v2243_v40  ;;  %2023 = vmatprep.mubr.bf16.mxu0 %v2258_v42 }
  0x89   : > { %2088 = vmatprep.mubr.bf16.mxu1 %v2260_v45 }
  0x8f   : > { %2024 = vmatmul.mubr.bf16.gmra.mrb[52].mxu0 %v2257_v50 }
  0x90   : > { %2089 = vmatmul.mubr.bf16.gmra.mrb[52].mxu1 %v2259_v51  ;;  %2031 = vmatprep.mubr.bf16.mxu0 %v2274_v52 }
  0x91   : > { %2096 = vmatprep.mubr.bf16.mxu1 %v2276_v53 }
  0x97   : > { %2032 = vmatmul.mubr.bf16.gmra.mrb[56].mxu0 %v2273_v58 }
  0x98   : > { %2097 = vmatmul.mubr.bf16.gmra.mrb[56].mxu1 %v2275_v59  ;;  %2039 = vmatprep.mubr.bf16.mxu0 %v2290_v60 }
  0x99   : > { %2104 = vmatprep.mubr.bf16.mxu1 %v2292_v61 }
  0x9f   : > { %2040 = vmatmul.mubr.bf16.gmra.mrb[60].mxu0 %v2289_v62 }
  0xa0   : > { %2105 = vmatmul.mubr.bf16.gmra.mrb[60].mxu1 %v2291_v63 }
  0xfa   : > { %v2456_v0 = vpop.f32.mrb[0].mxu0 }
  0xfb   : > { %v2496_v1 = vpop.f32.mrb[0].mxu1  ;;  %v2457_v3 = vpop.f32.mrb[1].mxu0 }
  0xfc   : > { %v2458_v4 = vadd.f32 %v2457_v3, %v2456_v0  ;;  %v2497_v5 = vpop.f32.mrb[1].mxu1  ;;  %v2459_v6 = vpop.f32.mrb[2].mxu0 }
  0xfd   : > { %v2498_v7 = vadd.f32 %v2497_v5, %v2496_v1  ;;  %v2499_v8 = vpop.f32.mrb[2].mxu1  ;;  %v2460_v9 = vpop.f32.mrb[3].mxu0 }
  0xfe   : > { %v1628_v10 = vadd.f32 %v2458_v4, %v2228_v2  ;;  %v2461_v11 = vadd.f32 %v2460_v9, %v2459_v6  ;;  %v2500_v12 = vpop.f32.mrb[3].mxu1 }
  0xff   : > { %v2501_v13 = vadd.f32 %v2500_v12, %v2499_v8 }
 0x100   : > { %v1693_v14 = vadd.f32 %v2498_v7, %v1628_v10  ;;  %v1631_v15 = vadd.f32 %v2461_v11, %v2228_v2 }
 0x102   : > { %v3393_v16 = vadd.f32 %v2501_v13, %v1631_v15  ;;  %v2462_v17 = vpop.f32.mrb[4].mxu0 }
 0x103   : > { %v2502_v18 = vpop.f32.mrb[4].mxu1  ;;  %v2463_v19 = vpop.f32.mrb[5].mxu0 }
 0x104   : > { %v2464_v20 = vadd.f32 %v2463_v19, %v2462_v17  ;;  %v2503_v21 = vpop.f32.mrb[5].mxu1  ;;  %v2465_v22 = vpop.f32.mrb[6].mxu0 }
 0x105   : > { %v2504_v23 = vadd.f32 %v2503_v21, %v2502_v18  ;;  %v2505_v24 = vpop.f32.mrb[6].mxu1  ;;  %v2466_v25 = vpop.f32.mrb[7].mxu0 }
 0x106   : > { %v1636_v26 = vadd.f32 %v2464_v20, %v2228_v2  ;;  %v2467_v27 = vadd.f32 %v2466_v25, %v2465_v22  ;;  %v2506_v28 = vpop.f32.mrb[7].mxu1 }
 0x107   : > { %v2507_v29 = vadd.f32 %v2506_v28, %v2505_v24 }
 0x108   : > { %v1701_v30 = vadd.f32 %v2504_v23, %v1636_v26  ;;  %v1639_v31 = vadd.f32 %v2467_v27, %v2228_v2 }
 0x10a   : > { %v3395_v32 = vadd.f32 %v2507_v29, %v1639_v31  ;;  %v2468_v33 = vpop.f32.mrb[8].mxu0 }
 0x10b   : > { %v2508_v34 = vpop.f32.mrb[8].mxu1  ;;  %v2469_v35 = vpop.f32.mrb[9].mxu0 }
 0x10c   : > { %v2509_v36 = vpop.f32.mrb[9].mxu1  ;;  %v2470_v37 = vadd.f32 %v2469_v35, %v2468_v33  ;;  %v2471_v39 = vpop.f32.mrb[10].mxu0 }
 0x10d   : > { %v2510_v38 = vadd.f32 %v2509_v36, %v2508_v34  ;;  %v2511_v40 = vpop.f32.mrb[10].mxu1  ;;  %v2472_v41 = vpop.f32.mrb[11].mxu0 }
 0x10e   : > { %v2512_v42 = vpop.f32.mrb[11].mxu1  ;;  %v1644_v43 = vadd.f32 %v2470_v37, %v2228_v2  ;;  %v2473_v44 = vadd.f32 %v2472_v41, %v2471_v39 }
 0x10f   : > { %v2513_v45 = vadd.f32 %v2512_v42, %v2511_v40 }
 0x110   : > { %v1709_v46 = vadd.f32 %v2510_v38, %v1644_v43  ;;  %v1647_v47 = vadd.f32 %v2473_v44, %v2228_v2 }
 0x112   : > { %v3397_v48 = vadd.f32 %v2513_v45, %v1647_v47  ;;  %v2474_v49 = vpop.f32.mrb[12].mxu0 }
 0x113   : > { %v2514_v50 = vpop.f32.mrb[12].mxu1  ;;  %v2475_v51 = vpop.f32.mrb[13].mxu0 }
 0x114   : > { %v2476_v52 = vadd.f32 %v2475_v51, %v2474_v49  ;;  %v2515_v53 = vpop.f32.mrb[13].mxu1  ;;  %v2477_v54 = vpop.f32.mrb[14].mxu0 }
 0x115   : > { %v2516_v55 = vadd.f32 %v2515_v53, %v2514_v50  ;;  %v2517_v56 = vpop.f32.mrb[14].mxu1  ;;  %v2478_v57 = vpop.f32.mrb[15].mxu0 }
 0x116   : > { %v1652_v58 = vadd.f32 %v2476_v52, %v2228_v2  ;;  %v2479_v59 = vadd.f32 %v2478_v57, %v2477_v54  ;;  %v2518_v60 = vpop.f32.mrb[15].mxu1 }
 0x117   : > { %v2519_v61 = vadd.f32 %v2518_v60, %v2517_v56 }
 0x118   : > { %v1717_v62 = vadd.f32 %v2516_v55, %v1652_v58  ;;  %v1655_v63 = vadd.f32 %v2479_v59, %v2228_v2 }
 0x11a   : > { %v3399_v0 = vadd.f32 %v2519_v61, %v1655_v63  ;;  %v2536_v1 = vpop.f32.mrb[16].mxu0 }
 0x11b   : > { %v2576_v3 = vpop.f32.mrb[16].mxu1  ;;  %v2537_v4 = vpop.f32.mrb[17].mxu0 }
 0x11c   : > { %v2538_v5 = vadd.f32 %v2537_v4, %v2536_v1  ;;  %v2577_v6 = vpop.f32.mrb[17].mxu1  ;;  %v2539_v7 = vpop.f32.mrb[18].mxu0 }
 0x11d   : > { %v2578_v8 = vadd.f32 %v2577_v6, %v2576_v3  ;;  %v2579_v9 = vpop.f32.mrb[18].mxu1  ;;  %v2540_v10 = vpop.f32.mrb[19].mxu0 }
 0x11e   : > { %v1758_v11 = vadd.f32 %v2538_v5, %v1693_v14  ;;  %v2541_v12 = vadd.f32 %v2540_v10, %v2539_v7  ;;  %v2580_v13 = vpop.f32.mrb[19].mxu1 }
 0x11f   : > { %v2581_v15 = vadd.f32 %v2580_v13, %v2579_v9 }
 0x120   : > { %v1823_v17 = vadd.f32 %v2578_v8, %v1758_v11  ;;  %v1761_v18 = vadd.f32 %v2541_v12, %v3393_v16 }
 0x122   : > { %v3402_v19 = vadd.f32 %v2581_v15, %v1761_v18  ;;  %v2542_v2 = vpop.f32.mrb[20].mxu0 }
 0x123   : > { %v2582_v20 = vpop.f32.mrb[20].mxu1  ;;  %v2543_v21 = vpop.f32.mrb[21].mxu0 }
 0x124   : > { %v2583_v22 = vpop.f32.mrb[21].mxu1  ;;  %v2544_v23 = vadd.f32 %v2543_v21, %v2542_v2  ;;  %v2545_v25 = vpop.f32.mrb[22].mxu0 }
 0x125   : > { %v2584_v24 = vadd.f32 %v2583_v22, %v2582_v20  ;;  %v2585_v26 = vpop.f32.mrb[22].mxu1  ;;  %v2546_v27 = vpop.f32.mrb[23].mxu0 }
 0x126   : > { %v2586_v28 = vpop.f32.mrb[23].mxu1  ;;  %v1766_v29 = vadd.f32 %v2544_v23, %v1701_v30  ;;  %v2547_v14 = vadd.f32 %v2546_v27, %v2545_v25 }
 0x127   : > { %v2587_v31 = vadd.f32 %v2586_v28, %v2585_v26 }
 0x128   : > { %v1831_v33 = vadd.f32 %v2584_v24, %v1766_v29  ;;  %v1769_v34 = vadd.f32 %v2547_v14, %v3395_v32 }
 0x12a   : > { %v3405_v35 = vadd.f32 %v2587_v31, %v1769_v34  ;;  %v2548_v16 = vpop.f32.mrb[24].mxu0 }
 0x12b   : > { %v2588_v36 = vpop.f32.mrb[24].mxu1  ;;  %v2549_v37 = vpop.f32.mrb[25].mxu0 }
 0x12c   : > { %v2550_v38 = vadd.f32 %v2549_v37, %v2548_v16  ;;  %v2589_v39 = vpop.f32.mrb[25].mxu1  ;;  %v2551_v40 = vpop.f32.mrb[26].mxu0 }
 0x12d   : > { %v2590_v41 = vadd.f32 %v2589_v39, %v2588_v36  ;;  %v2591_v42 = vpop.f32.mrb[26].mxu1  ;;  %v2552_v43 = vpop.f32.mrb[27].mxu0 }
 0x12e   : > { %v1774_v44 = vadd.f32 %v2550_v38, %v1709_v46  ;;  %v2553_v45 = vadd.f32 %v2552_v43, %v2551_v40  ;;  %v2592_v47 = vpop.f32.mrb[27].mxu1 }
 0x12f   : > { %v2593_v30 = vadd.f32 %v2592_v47, %v2591_v42 }
 0x130   : > { %v1839_v49 = vadd.f32 %v2590_v41, %v1774_v44  ;;  %v1777_v50 = vadd.f32 %v2553_v45, %v3397_v48 }
 0x132   : > { %v3408_v51 = vadd.f32 %v2593_v30, %v1777_v50  ;;  %v2554_v32 = vpop.f32.mrb[28].mxu0 }
 0x133   : > { %v2594_v52 = vpop.f32.mrb[28].mxu1  ;;  %v2555_v53 = vpop.f32.mrb[29].mxu0 }
 0x134   : > { %v2556_v54 = vadd.f32 %v2555_v53, %v2554_v32  ;;  %v2595_v55 = vpop.f32.mrb[29].mxu1  ;;  %v2557_v56 = vpop.f32.mrb[30].mxu0 }
 0x135   : > { %v2596_v57 = vadd.f32 %v2595_v55, %v2594_v52  ;;  %v2597_v58 = vpop.f32.mrb[30].mxu1  ;;  %v2558_v59 = vpop.f32.mrb[31].mxu0 }
 0x136   : > { %v1782_v60 = vadd.f32 %v2556_v54, %v1717_v62  ;;  %v2559_v61 = vadd.f32 %v2558_v59, %v2557_v56  ;;  %v2598_v46 = vpop.f32.mrb[31].mxu1 }
 0x137   : > { %v2599_v63 = vadd.f32 %v2598_v46, %v2597_v58 }
 0x138   : > { %v1847_v1 = vadd.f32 %v2596_v57, %v1782_v60  ;;  %v1785_v3 = vadd.f32 %v2559_v61, %v3399_v0 }
 0x13a   : > { %v3411_v4 = vadd.f32 %v2599_v63, %v1785_v3  ;;  %v2616_v48 = vpop.f32.mrb[32].mxu0 }
 0x13b   : > { %v2656_v5 = vpop.f32.mrb[32].mxu1  ;;  %v2617_v6 = vpop.f32.mrb[33].mxu0 }
 0x13c   : > { %v2657_v7 = vpop.f32.mrb[33].mxu1  ;;  %v2618_v8 = vadd.f32 %v2617_v6, %v2616_v48  ;;  %v2619_v10 = vpop.f32.mrb[34].mxu0 }
 0x13d   : > { %v2658_v9 = vadd.f32 %v2657_v7, %v2656_v5  ;;  %v2659_v11 = vpop.f32.mrb[34].mxu1  ;;  %v2620_v12 = vpop.f32.mrb[35].mxu0 }
 0x13e   : > { %v2660_v13 = vpop.f32.mrb[35].mxu1  ;;  %v1888_v15 = vadd.f32 %v2618_v8, %v1823_v17  ;;  %v2621_v62 = vadd.f32 %v2620_v12, %v2619_v10 }
 0x13f   : > { %v2661_v18 = vadd.f32 %v2660_v13, %v2659_v11 }
 0x140   : > { %v1953_v2 = vadd.f32 %v2658_v9, %v1888_v15  ;;  %v1891_v20 = vadd.f32 %v2621_v62, %v3402_v19 }
 0x142   : > { %v3414_v21 = vadd.f32 %v2661_v18, %v1891_v20  ;;  %v2622_v0 = vpop.f32.mrb[36].mxu0 }
 0x143   : > { %v2662_v22 = vpop.f32.mrb[36].mxu1  ;;  %v2623_v23 = vpop.f32.mrb[37].mxu0 }
 0x144   : > { %v2624_v24 = vadd.f32 %v2623_v23, %v2622_v0  ;;  %v2663_v25 = vpop.f32.mrb[37].mxu1  ;;  %v2625_v26 = vpop.f32.mrb[38].mxu0 }
 0x145   : > { %v2664_v27 = vadd.f32 %v2663_v25, %v2662_v22  ;;  %v2665_v28 = vpop.f32.mrb[38].mxu1  ;;  %v2626_v29 = vpop.f32.mrb[39].mxu0 }
 0x146   : > { %v1896_v14 = vadd.f32 %v2624_v24, %v1831_v33  ;;  %v2627_v31 = vadd.f32 %v2626_v29, %v2625_v26  ;;  %v2666_v34 = vpop.f32.mrb[39].mxu1 }
 0x147   : > { %v2667_v17 = vadd.f32 %v2666_v34, %v2665_v28 }
 0x148   : > { %v3416_v16 = vadd.f32 %v2664_v27, %v1896_v14  ;;  %v1899_v36 = vadd.f32 %v2627_v31, %v3405_v35 }
 0x14a   : > { %v3419_v19 = vadd.f32 %v2667_v17, %v1899_v36  ;;  %v2628_v37 = vpop.f32.mrb[40].mxu0 }
 0x14b   : > { %v2668_v38 = vpop.f32.mrb[40].mxu1  ;;  %v2629_v39 = vpop.f32.mrb[41].mxu0 }
 0x14c   : > { %v2630_v40 = vadd.f32 %v2629_v39, %v2628_v37  ;;  %v2669_v41 = vpop.f32.mrb[41].mxu1  ;;  %v2631_v42 = vpop.f32.mrb[42].mxu0 }
 0x14d   : > { %v2670_v43 = vadd.f32 %v2669_v41, %v2668_v38  ;;  %v2671_v44 = vpop.f32.mrb[42].mxu1  ;;  %v2632_v45 = vpop.f32.mrb[43].mxu0 }
 0x14e   : > { %v1904_v47 = vadd.f32 %v2630_v40, %v1839_v49  ;;  %v2633_v33 = vadd.f32 %v2632_v45, %v2631_v42  ;;  %v2672_v30 = vpop.f32.mrb[43].mxu1 }
 0x14f   : > { %v2673_v50 = vadd.f32 %v2672_v30, %v2671_v44 }
 0x150   : > { %v3421_v32 = vadd.f32 %v2670_v43, %v1904_v47  ;;  %v1907_v52 = vadd.f32 %v2633_v33, %v3408_v51 }
 0x152   : > { %v3424_v35 = vadd.f32 %v2673_v50, %v1907_v52  ;;  %v2634_v53 = vpop.f32.mrb[44].mxu0 }
 0x153   : > { %v2674_v54 = vpop.f32.mrb[44].mxu1  ;;  %v2635_v55 = vpop.f32.mrb[45].mxu0 }
 0x154   : > { %v2675_v56 = vpop.f32.mrb[45].mxu1  ;;  %v2636_v57 = vadd.f32 %v2635_v55, %v2634_v53  ;;  %v2637_v59 = vpop.f32.mrb[46].mxu0 }
 0x155   : > { %v2676_v58 = vadd.f32 %v2675_v56, %v2674_v54  ;;  %v2677_v60 = vpop.f32.mrb[46].mxu1  ;;  %v2638_v61 = vpop.f32.mrb[47].mxu0 }
 0x156   : > { %v2678_v46 = vpop.f32.mrb[47].mxu1  ;;  %v1912_v49 = vadd.f32 %v2636_v57, %v1847_v1  ;;  %v2639_v63 = vadd.f32 %v2638_v61, %v2637_v59 }
 0x157   : > { %v2679_v3 = vadd.f32 %v2678_v46, %v2677_v60 }
 0x158   : > { %v3426_v48 = vadd.f32 %v2676_v58, %v1912_v49  ;;  %v1915_v51 = vadd.f32 %v2639_v63, %v3411_v4 }
 0x15a   : > { %v3429_v5 = vadd.f32 %v2679_v3, %v1915_v51  ;;  %v2696_v6 = vpop.f32.mrb[48].mxu0 }
 0x15b   : > { %v2736_v7 = vpop.f32.mrb[48].mxu1  ;;  %v2697_v8 = vpop.f32.mrb[49].mxu0 }
 0x15c   : > { %v2698_v9 = vadd.f32 %v2697_v8, %v2696_v6  ;;  %v2737_v10 = vpop.f32.mrb[49].mxu1  ;;  %v2699_v11 = vpop.f32.mrb[50].mxu0 }
 0x15d   : > { %v2738_v12 = vadd.f32 %v2737_v10, %v2736_v7  ;;  %v2739_v13 = vpop.f32.mrb[50].mxu1  ;;  %v2700_v15 = vpop.f32.mrb[51].mxu0 }
 0x15e   : > { %v2018_v62 = vadd.f32 %v2698_v9, %v1953_v2  ;;  %v2701_v1 = vadd.f32 %v2700_v15, %v2699_v11  ;;  %v2740_v18 = vpop.f32.mrb[51].mxu1 }
 0x15f   : > { %v2741_v20 = vadd.f32 %v2740_v18, %v2739_v13 }
 0x160   : > { %v2083_v0 = vadd.f32 %v2738_v12, %v2018_v62  ;;  %v2021_v22 = vadd.f32 %v2701_v1, %v3414_v21 }
 0x162   : > { %v2113_v4 = vmax.f32 %v2083_v0, 0.0  ;;  %v2086_v23 = vadd.f32 %v2741_v20, %v2021_v22  ;;  %v2702_v24 = vpop.f32.mrb[52].mxu0 }
 0x163   : > { %v2742_v25 = vpop.f32.mrb[52].mxu1  ;;  %v2703_v2 = vpop.f32.mrb[53].mxu0 }
 0x164   : > { %v2432_v26 = vpack.c.bf16 %v2113_v4, %v2113_v4  ;;  %v2114_v27 = vmax.f32 %v2086_v23, 0.0  ;;  %v2704_v28 = vadd.f32 %v2703_v2, %v2702_v24  ;;  %v2743_v29 = vpop.f32.mrb[53].mxu1  ;;  %v2705_v14 = vpop.f32.mrb[54].mxu0 }
 0x165   : > { %v2744_v31 = vadd.f32 %v2743_v29, %v2742_v25  ;;  %v2745_v21 = vpop.f32.mrb[54].mxu1  ;;  %v2706_v34 = vpop.f32.mrb[55].mxu0 }
 0x166   : > { %2154 = vst.msk [vmem:[%s3436_s9] sm:$0xf] %vm2153_vm0, %v2432_v26  ;;  %v2433_v17 = vpack.c.bf16 %v2114_v27, %v2114_v27  ;;  %v2026_v36 = vadd.f32 %v2704_v28, %v3416_v16  ;;  %v2707_v37 = vadd.f32 %v2706_v34, %v2705_v14  ;;  %v2746_v38 = vpop.f32.mrb[55].mxu1 }
 0x167   : > { %v2747_v39 = vadd.f32 %v2746_v38, %v2745_v21 }
 0x168   : > { %2155 = vst.msk [vmem:[%s3436_s9 + $0x4] sm:$0xf] %vm2153_vm0, %v2433_v17  ;;  %v2091_v40 = vadd.f32 %v2744_v31, %v2026_v36  ;;  %v2029_v41 = vadd.f32 %v2707_v37, %v3419_v19 }
 0x16a   : > { %v2115_v42 = vmax.f32 %v2091_v40, 0.0  ;;  %v2094_v43 = vadd.f32 %v2747_v39, %v2029_v41  ;;  %v2708_v44 = vpop.f32.mrb[56].mxu0 }
 0x16b   : > { %v2748_v45 = vpop.f32.mrb[56].mxu1  ;;  %v2709_v47 = vpop.f32.mrb[57].mxu0 }
 0x16c   : > { %v2434_v33 = vpack.c.bf16 %v2115_v42, %v2115_v42  ;;  %v2116_v30 = vmax.f32 %v2094_v43, 0.0  ;;  %v2710_v50 = vadd.f32 %v2709_v47, %v2708_v44  ;;  %v2749_v52 = vpop.f32.mrb[57].mxu1  ;;  %v2711_v16 = vpop.f32.mrb[58].mxu0 }
 0x16d   : > { %v2750_v53 = vadd.f32 %v2749_v52, %v2748_v45  ;;  %v2751_v54 = vpop.f32.mrb[58].mxu1  ;;  %v2712_v55 = vpop.f32.mrb[59].mxu0 }
 0x16e   : > { %2156 = vst.msk [vmem:[%s3436_s9 + $0x8] sm:$0xf] %vm2153_vm0, %v2434_v33  ;;  %v2435_v56 = vpack.c.bf16 %v2116_v30, %v2116_v30  ;;  %v2034_v57 = vadd.f32 %v2710_v50, %v3421_v32  ;;  %v2713_v19 = vadd.f32 %v2712_v55, %v2711_v16  ;;  %v2752_v58 = vpop.f32.mrb[59].mxu1 }
 0x16f   : > { %v2753_v59 = vadd.f32 %v2752_v58, %v2751_v54 }
 0x170   : > { %2157 = vst.msk [vmem:[%s3436_s9 + $0xc] sm:$0xf] %vm2153_vm0, %v2435_v56  ;;  %v2099_v60 = vadd.f32 %v2750_v53, %v2034_v57  ;;  %v2037_v61 = vadd.f32 %v2713_v19, %v3424_v35 }
 0x172   : > { %v2117_v46 = vmax.f32 %v2099_v60, 0.0  ;;  %v2102_v49 = vadd.f32 %v2753_v59, %v2037_v61  ;;  %v2714_v63 = vpop.f32.mrb[60].mxu0 }
 0x173   : > { %v2754_v3 = vpop.f32.mrb[60].mxu1  ;;  %v2715_v51 = vpop.f32.mrb[61].mxu0 }
 0x174   : > { %v2436_v6 = vpack.c.bf16 %v2117_v46, %v2117_v46  ;;  %v2118_v7 = vmax.f32 %v2102_v49, 0.0  ;;  %v2716_v8 = vadd.f32 %v2715_v51, %v2714_v63  ;;  %v2755_v9 = vpop.f32.mrb[61].mxu1  ;;  %v2717_v32 = vpop.f32.mrb[62].mxu0 }
 0x175   : > { %v2756_v10 = vadd.f32 %v2755_v9, %v2754_v3  ;;  %v2757_v11 = vpop.f32.mrb[62].mxu1  ;;  %v2718_v12 = vpop.f32.mrb[63].mxu0 }
 0x176   : > { %2158 = vst.msk [vmem:[%s3436_s9 + $0x10] sm:$0xf] %vm2153_vm0, %v2436_v6  ;;  %v2437_v13 = vpack.c.bf16 %v2118_v7, %v2118_v7  ;;  %v2042_v35 = vadd.f32 %v2716_v8, %v3426_v48  ;;  %v2719_v15 = vadd.f32 %v2718_v12, %v2717_v32  ;;  %v2758_v62 = vpop.f32.mrb[63].mxu1 }
 0x177   : > { %v2759_v1 = vadd.f32 %v2758_v62, %v2757_v11 }
 0x178   : > { %2159 = vst.msk [vmem:[%s3436_s9 + $0x14] sm:$0xf] %vm2153_vm0, %v2437_v13  ;;  %v2107_v18 = vadd.f32 %v2756_v10, %v2042_v35  ;;  %v2045_v20 = vadd.f32 %v2719_v15, %v3429_v5 }
 0x17a   : > { %v2119_v0 = vmax.f32 %v2107_v18, 0.0  ;;  %v2110_v22 = vadd.f32 %v2759_v1, %v2045_v20 }
 0x17c   : > { %v2438_v4 = vpack.c.bf16 %v2119_v0, %v2119_v0  ;;  %v2120_v23 = vmax.f32 %v2110_v22, 0.0 }
 0x17e   : > { %2160 = vst.msk [vmem:[%s3436_s9 + $0x18] sm:$0xf] %vm2153_vm0, %v2438_v4  ;;  %v2439_v24 = vpack.c.bf16 %v2120_v23, %v2120_v23 }
 0x180   : > { %2161 = vst.msk [vmem:[%s3436_s9 + $0x1c] sm:$0xf] %vm2153_vm0, %v2439_v24 }
 0x181 PF: > { %s13_s12 = sadd.s32 1, %s2902_s12  }
 0x182   : > { %p10_p4 = scmp.ge.s32.totalorder %s13_s12, 4  }
 0x184   :  { %12 = sbr.rel (!%p10_p4) target bundleno = 1 (0x1), region = 62 }

// kernel: qnetwork_forward.5
= control target key start
LH: loop header
LB: loop body
LE: loop exit
PB: predicated region body
PF: predicated region fallthrough
CT: control target
= control target key end

     0   :  { %14 = vsyncpa [#allocation3], 0  ;;  %s3304_s0 = inlined_call_operand.vmem [shape: bf16[2,9,512], index: 0, kind: input, shape index: {}]   ;;  %s3305_s1 = inlined_call_operand.vmem [shape: bf16[512,64], index: 1, kind: input, shape index: {}]   ;;  %s3306_s2 = inlined_call_operand.vmem [shape: f32[1,64], index: 2, kind: input, shape index: {}]   ;;  %s3307_s3 = inlined_call_operand.vmem [shape: bf16[9,64,64], index: 3, kind: input, shape index: {}]   ;;  %s3308_s4 = inlined_call_operand.vmem [shape: f32[1,64], index: 4, kind: input, shape index: {}]   ;;  %s3309_s5 = inlined_call_operand.vmem [shape: bf16[64,512], index: 5, kind: input, shape index: {}]   ;;  %s3310_s6 = inlined_call_operand.vmem [shape: f32[1,512], index: 6, kind: input, shape index: {}]   ;;  %s3311_s7 = inlined_call_operand.vmem [shape: bf16[512,6], index: 7, kind: input, shape index: {}]   ;;  %s3312_s8 = inlined_call_operand.vmem [shape: f32[1,6], index: 8, kind: input, shape index: {}]   ;;  %s3313_s9 = inlined_call_operand.hbm [shape: f32[2,1,6], index: 9, kind: output, shape index: {}]  }
   0x1   :  { %16 = vsyncpa [#allocation3 + $0x1], 0  ;;  %s2763_s30 = smov 0   ;;  %s2765_s10 = smov 0  }
   0x2   :  { %s2767_s11 = smov 0   ;;  %s2769_s12 = smov 0  }
   0x3 LB: > { %s2784_s13 = sadd.s32 4294967295, %s2707_s12   ;;  %s2026_s14 = sadd.s32 4294967294, %s2707_s12   ;;  %s2707_s12 = sphi %s2769_s12, %s3319_s12   ;;  %s2703_s11 = sphi %s2767_s11, %s3318_s11   ;;  %s2699_s10 = sphi %s2765_s10, %s3317_s10   ;;  %s2695_s30 = sphi %s2763_s30, %s3316_s30  }
   0x4   : > { %s2788_s15 = sadd.s32 1, %s2707_s12   ;;  %s223_s16 = sadd.s32 1, %s2703_s11 }
   0x5   : > { %s220_s17 = ssub.s32 %s2707_s12, %s2788_s15  ;;  %p233_p0 = scmp.ne.s32.totalorder %s2703_s11, %s2699_s10 }
   0x6   : > { %p221_p1 = scmp.eq.s32.totalorder %s220_s17, 0  ;;  %p234_p2 = scmp.eq.s32.totalorder %s2784_s13, 1 }
   0x7   : > { %p239_p3 = scmp.ne.s32.totalorder %s2699_s10, %s2695_s30  ;;  %p240_p4 = scmp.eq.s32.totalorder %s2026_s14, 1 }
   0x8   : > { %s2799_s18 = scalar_select %p221_p1, %s2703_s11, %s223_s16  }
   0x9   : > { %p2801_p5 = por %p234_p2, %p233_p0  ;;  %p2805_p6 = por %p240_p4, %p239_p3 }
   0xa   : > { %p2029_p7 = scmp.ge.s32.totalorder %s2707_s12, 1  ;;  %p290_p8 = scmp.lt.s32.totalorder %s2707_s12, 3 }
   0xc   : > { %p291_p9 = pnand %p2029_p7, %p290_p8 }
   0xd   : > { %v2515_v0 = vld [vmem:[%s3305_s1 + $0x40] sm:$0xff] (!%p291_p9)   ;;  %v2519_v4 = vld [vmem:[%s3305_s1 + $0x48] sm:$0xff] (!%p291_p9)   ;;  %v2523_v8 = vld [vmem:[%s3305_s1 + $0x50] sm:$0xff] (!%p291_p9)   ;;  %p325_p10 = scmp.lt.s32.totalorder (!%p291_p9), %s2784_s13, 1  ;;  %v2709_v34 = vmov (!%p291_p9), 0.0   ;;  %vm2710_vm0 = vmmov (!%p291_p9), 0  }
   0xe   : > { %294 = sbr.rel (%p291_p9) target bundleno = 1009 (0x3f1), region = 56  ;;  %v2516_v1 = vld [vmem:[%s3305_s1 + $0xc0] sm:$0xff] (!%p291_p9)   ;;  %2232 = vmatprep.subr.bf16.mxu0 (!%p291_p9), %v2515_v0  ;;  %v2520_v5 = vld [vmem:[%s3305_s1 + $0xc8] sm:$0xff] (!%p291_p9)   ;;  %v2524_v9 = vld [vmem:[%s3305_s1 + $0xd0] sm:$0xff] (!%p291_p9)   ;;  %vm747_vm1 = vcmask (!%p291_p9), 523264   ;;  %s323_s25 = sand.u32 (!%p291_p9), 1, %s2699_s10  }
   0xf   : > { %v2517_v2 = vld [vmem:[%s3305_s1] sm:$0xff] (!%p291_p9)   ;;  %2254 = vmatprep.subr.bf16.mxu1 (!%p291_p9), %v2516_v1  ;;  %v2521_v6 = vld [vmem:[%s3305_s1 + $0x8] sm:$0xff] (!%p291_p9)   ;;  %v2525_v10 = vld [vmem:[%s3305_s1 + $0x10] sm:$0xff] (!%p291_p9)   ;;  %s2228_s27 = sshll.u32 (!%p291_p9), %s2784_s13, 4  ;;  %s324_s29 = scalar_lea.vmem (!%p291_p9), [#allocation2], %s323_s25  ;;  %vm1956_vm2 = vcmask (!%p291_p9), 40960  }
  0x10   : > { %v2518_v3 = vld [vmem:[%s3305_s1 + $0x80] sm:$0xff] (!%p291_p9)   ;;  %2233 = vmatpush3.bf16.msra.mxu0 (!%p291_p9), %v2517_v2  ;;  %v2522_v7 = vld [vmem:[%s3305_s1 + $0x88] sm:$0xff] (!%p291_p9)   ;;  %v2526_v11 = vld [vmem:[%s3305_s1 + $0x90] sm:$0xff] (!%p291_p9)   ;;  %s1971_s14 = sshll.u32 (!%p291_p9), %s324_s29, 4  ;;  %s3262_s21 = scalar_lea.hbm (!%p291_p9), %s3313_s9, %s2228_s27  ;;  %s3264_s14 = int_to_ptr.vmem [resolvable:$true] %s1971_s14 }
  0x11   : > { %2255 = vmatpush3.bf16.msra.mxu1 (!%p291_p9), %v2518_v3  ;;  %2234 = vmatprep.subr.bf16.mxu0 (!%p291_p9), %v2519_v4  ;;  %v2527_v12 = vld [vmem:[%s3305_s1 + $0x58] sm:$0xff] (!%p291_p9)   ;;  %v2531_v16 = vld [vmem:[%s3305_s1 + $0x60] sm:$0xff] (!%p291_p9)   ;;  %v2535_v20 = vld [vmem:[%s3305_s1 + $0x68] sm:$0xff] (!%p291_p9)   ;;  %s1959_s22 = scalar_lea.sflag (!%p291_p9), [#allocation3], %s323_s25  ;;  %s2645_s23 = scalar_lea.vmem (!%p291_p9), %s3264_s14, 16 }
  0x12   : > { %2256 = vmatprep.subr.bf16.mxu1 (!%p291_p9), %v2520_v5  ;;  %v2528_v13 = vld [vmem:[%s3305_s1 + $0xd8] sm:$0xff] (!%p291_p9)   ;;  %v2532_v17 = vld [vmem:[%s3305_s1 + $0xe0] sm:$0xff] (!%p291_p9)   ;;  %v2536_v21 = vld [vmem:[%s3305_s1 + $0xe8] sm:$0xff] (!%p291_p9)   ;;  %p2646_p11 = scmp.ne.s32.totalorder (!%p291_p9), %s3264_s14, %s2645_s23 }
  0x13   : > { %v2529_v14 = vld [vmem:[%s3305_s1 + $0x18] sm:$0xff] (!%p291_p9)   ;;  %v2533_v18 = vld [vmem:[%s3305_s1 + $0x20] sm:$0xff] (!%p291_p9)   ;;  %v2537_v22 = vld [vmem:[%s3305_s1 + $0x28] sm:$0xff] (!%p291_p9)  }
  0x14   : > { %2235 = vmatpush3.bf16.msra.mxu0 (!%p291_p9), %v2521_v6  ;;  %v2530_v15 = vld [vmem:[%s3305_s1 + $0x98] sm:$0xff] (!%p291_p9)   ;;  %v2534_v19 = vld [vmem:[%s3305_s1 + $0xa0] sm:$0xff] (!%p291_p9)   ;;  %v2538_v23 = vld [vmem:[%s3305_s1 + $0xa8] sm:$0xff] (!%p291_p9)   ;;  %p2647_p12 = pnand (!%p291_p9), %p2646_p11, %p2801_p5 }
  0x15   : > { %2257 = vmatpush3.bf16.msra.mxu1 %v2522_v7  ;;  %2236 = vmatprep.subr.bf16.mxu0 %v2523_v8  ;;  %s326_s16 = scalar_select %p325_p10, %s2784_s13, 1  ;;  %v2539_v24 = vld [vmem:[%s3305_s1 + $0x70] sm:$0xff]   ;;  %v2543_v28 = vld [vmem:[%s3305_s1 + $0x78] sm:$0xff]   ;;  %v2553_v37 = vld [vmem:[%s3307_s3] sm:$0xff]  }
  0x16   : > { %2258 = vmatprep.subr.bf16.mxu1 %v2524_v9  ;;  %v2540_v25 = vld [vmem:[%s3305_s1 + $0xf0] sm:$0xff]   ;;  %v2544_v29 = vld [vmem:[%s3305_s1 + $0xf8] sm:$0xff]   ;;  %v2554_v38 = vld [vmem:[%s3307_s3 + $0x20] sm:$0xff]   ;;  %p2648_p13 = pneg %p2647_p12  ;;  %s2712_s13 = smov [#allocation2]  }
  0x17   : > { %v2541_v26 = vld [vmem:[%s3305_s1 + $0x30] sm:$0xff]   ;;  %s2231_s28 = sshll.u32 %s326_s16, 5  ;;  %v2545_v30 = vld [vmem:[%s3305_s1 + $0x38] sm:$0xff]   ;;  %v2555_v39 = vld [vmem:[%s3307_s3 + $0x8] sm:$0xff]   ;;  %s2649_s24 = sshll.u32 %s2712_s13, 4  ;;  %s2650_s24 = int_to_ptr.vmem [resolvable:$false] %s2649_s24 }
  0x18   : > { %2237 = vmatpush3.bf16.msra.mxu0 %v2525_v10  ;;  %v2542_v27 = vld [vmem:[%s3305_s1 + $0xb0] sm:$0xff]   ;;  %s329_s26 = scalar_lea.vmem %s3304_s0, %s2231_s28  ;;  %v2546_v31 = vld [vmem:[%s3305_s1 + $0xb8] sm:$0xff]   ;;  %v2556_v40 = vld [vmem:[%s3307_s3 + $0x28] sm:$0xff]   ;;  %p2652_p0 = scmp.lt.s32.totalorder %s3264_s14, %s2650_s24 }
  0x19   : > { %2259 = vmatpush3.bf16.msra.mxu1 %v2526_v11  ;;  %2238 = vmatprep.subr.bf16.mxu0 %v2527_v12  ;;  %v2547_v32 = vld [vmem:[%s329_s26] ss:$16 sps:$4 sm:$0x1f]   ;;  %v2549_v33 = vld [vmem:[%s329_s26 + $0x4] ss:$16 sps:$4 sm:$0x1f]  }
  0x1a   : > { %2260 = vmatprep.subr.bf16.mxu1 %v2528_v13  ;;  %v2550_v35 = vld [vmem:[%s329_s26 + $0x8] ss:$16 sps:$4 sm:$0x1f]   ;;  %v2552_v36 = vld [vmem:[%s329_s26 + $0xc] ss:$16 sps:$4 sm:$0x1f]   ;;  %650 = vmatprep.mubr.bf16.mxu0 %v2549_v33 }
  0x1b   : > { %691 = vmatprep.mubr.bf16.mxu1 %v2552_v36  ;;  %v2557_v41 = vld [vmem:[%s3307_s3 + $0x10] sm:$0xff]   ;;  %v2559_v43 = vld [vmem:[%s3307_s3 + $0x18] sm:$0xff]   ;;  %v2032_v47 = vld [vmem:[%s3306_s2] ss:$0 sm:$0xff]  ;;  %s2651_s26 = scalar_lea.vmem %s2650_s24, 32 }
  0x1c   : > { %2239 = vmatpush3.bf16.msra.mxu0 %v2529_v14  ;;  %v2558_v42 = vld [vmem:[%s3307_s3 + $0x30] sm:$0xff]   ;;  %v2560_v44 = vld [vmem:[%s3307_s3 + $0x38] sm:$0xff]   ;;  %v2561_v63 = vld [vmem:[%s3307_s3 + $0x60] sm:$0xff]   ;;  %p2653_p1 = scmp.lt.s32.totalorder %s2651_s26, %s2645_s23 }
  0x1d   : > { %2261 = vmatpush3.bf16.msra.mxu1 %v2530_v15  ;;  %2240 = vmatprep.subr.bf16.mxu0 %v2531_v16  ;;  %v2562_v1 = vld [vmem:[%s3307_s3 + $0x40] sm:$0xff]   ;;  %v2563_v3 = vld [vmem:[%s3307_s3 + $0x68] sm:$0xff]   ;;  %v2565_v5 = vld [vmem:[%s3307_s3 + $0x70] sm:$0xff]  }
  0x1e   : > { %2262 = vmatprep.subr.bf16.mxu1 %v2532_v17  ;;  %v2564_v4 = vld [vmem:[%s3307_s3 + $0x48] sm:$0xff]   ;;  %v2566_v6 = vld [vmem:[%s3307_s3 + $0x50] sm:$0xff]   ;;  %v2567_v7 = vld [vmem:[%s3307_s3 + $0x78] sm:$0xff]   ;;  %p2654_p2 = por %p2653_p1, %p2652_p0 }
  0x1f   : > { %v2568_v8 = vld [vmem:[%s3307_s3 + $0x58] sm:$0xff]   ;;  %v2569_v9 = vld [vmem:[%s3307_s3 + $0xa0] sm:$0xff]   ;;  %v2571_v13 = vld [vmem:[%s3307_s3 + $0xa8] sm:$0xff]  }
  0x20   : > { %2241 = vmatpush3.bf16.msra.mxu0 %v2533_v18  ;;  %v2570_v11 = vld [vmem:[%s3307_s3 + $0x80] sm:$0xff]   ;;  %v2572_v14 = vld [vmem:[%s3307_s3 + $0x88] sm:$0xff]   ;;  %v2573_v15 = vld [vmem:[%s3307_s3 + $0xb0] sm:$0xff]   ;;  %p2655_p3 = pnand %p2654_p2, %p2648_p13 }
  0x21   : > { %2263 = vmatpush3.bf16.msra.mxu1 %v2534_v19  ;;  %2242 = vmatprep.subr.bf16.mxu0 %v2535_v20  ;;  %v2574_v16 = vld [vmem:[%s3307_s3 + $0x90] sm:$0xff]   ;;  %v2575_v17 = vld [vmem:[%s3307_s3 + $0xb8] sm:$0xff]   ;;  %v2577_v19 = vld [vmem:[%s3307_s3 + $0xe0] sm:$0xff]  }
  0x22   : > { %2264 = vmatprep.subr.bf16.mxu1 %v2536_v21  ;;  %v2576_v18 = vld [vmem:[%s3307_s3 + $0x98] sm:$0xff]   ;;  %v2578_v21 = vld [vmem:[%s3307_s3 + $0xc0] sm:$0xff]   ;;  %v2587_v33 = vld [vmem:[%s3307_s3 + $0x110] sm:$0xff]  }
  0x24   : > { %2243 = vmatpush3.bf16.msra.mxu0 %v2537_v22 }
  0x25   : > { %2265 = vmatpush3.bf16.msra.mxu1 %v2538_v23  ;;  %2244 = vmatprep.subr.bf16.mxu0 %v2539_v24  ;;  %v2579_v23 = vld [vmem:[%s3307_s3 + $0xe8] sm:$0xff]  }
  0x26   : > { %2266 = vmatprep.subr.bf16.mxu1 %v2540_v25  ;;  %v2580_v24 = vld [vmem:[%s3307_s3 + $0xc8] sm:$0xff]   ;;  %v2581_v25 = vld [vmem:[%s3307_s3 + $0xf0] sm:$0xff]  }
  0x28   : > { %2245 = vmatpush3.bf16.msra.mxu0 %v2541_v26  ;;  %v2582_v26 = vld [vmem:[%s3307_s3 + $0xd0] sm:$0xff]  }
  0x29   : > { %2267 = vmatpush3.bf16.msra.mxu1 %v2542_v27  ;;  %2246 = vmatprep.subr.bf16.mxu0 %v2543_v28  ;;  %v2583_v27 = vld [vmem:[%s3307_s3 + $0xf8] sm:$0xff]  }
  0x2a   : > { %2268 = vmatprep.subr.bf16.mxu1 %v2544_v29  ;;  %v2584_v28 = vld [vmem:[%s3307_s3 + $0xd8] sm:$0xff]  }
  0x2c   : > { %2247 = vmatpush3.bf16.msra.mxu0 %v2545_v30  ;;  %v2585_v30 = vld [vmem:[%s3307_s3 + $0x100] sm:$0xff]  }
  0x2d   : > { %2269 = vmatpush3.bf16.msra.mxu1 %v2546_v31  ;;  %2365 = vmatprep.subr.bf16.mxu0 %v2709_v34 }
  0x2e   : > { %2377 = vmatprep.subr.bf16.mxu1 %v2709_v34 }
  0x2f   : > { %651 = vmatmul.mubr.bf16.vlgmr.msra.gmra.mrb[0].mxu0 %v2547_v32  ;;  %v2586_v32 = vld [vmem:[%s3307_s3 + $0x108] sm:$0xff]  }
  0x30   : > { %692 = vmatmul.mubr.bf16.vlgmr.msra.gmra.mrb[0].mxu1 %v2550_v35  ;;  %2366 = vmatpush3.bf16.msra.mxu0 %v2554_v38  ;;  %v2588_v35 = vld [vmem:[%s3307_s3 + $0x118] sm:$0xff]   ;;  %v2589_v38 = vld [vmem:[%s3309_s5] ss:$16 sps:$4 sm:$0xff]  }
  0x31   : > { %2378 = vmatpush3.bf16.msra.mxu1 %v2553_v37  ;;  %2367 = vmatprep.subr.bf16.mxu0 %v2709_v34 }
  0x32   : > { %2379 = vmatprep.subr.bf16.mxu1 %v2709_v34  ;;  %2385 = vmatprep.mubr.msk.bf16.mxu1 %vm2710_vm0, %v2709_v34 }
  0x33   : > { %2373 = vmatprep.mubr.msk.bf16.mxu0 %vm2710_vm0, %v2709_v34 }
  0x34   : > { %2368 = vmatpush3.bf16.msra.mxu0 %v2556_v40  ;;  %v2592_v40 = vld [vmem:[%s3309_s5 + $0x8] ss:$16 sps:$4 sm:$0xff]  }
  0x35   : > { %2380 = vmatpush3.bf16.msra.mxu1 %v2555_v39  ;;  %2369 = vmatprep.subr.bf16.mxu0 %v2709_v34  ;;  %v2591_v39 = vld [vmem:[%s3309_s5 + $0x4] ss:$16 sps:$4 sm:$0xff]  }
  0x36   : > { %2381 = vmatprep.subr.bf16.mxu1 %v2709_v34 }
  0x38   : > { %2370 = vmatpush3.bf16.msra.mxu0 %v2558_v42  ;;  %v2600_v42 = vld [vmem:[%s3309_s5 + $0x2c] ss:$16 sps:$4 sm:$0xff]  }
  0x39   : > { %2382 = vmatpush3.bf16.msra.mxu1 %v2557_v41  ;;  %2371 = vmatprep.subr.bf16.mxu0 %v2709_v34  ;;  %v2597_v41 = vld [vmem:[%s3309_s5 + $0x24] ss:$16 sps:$4 sm:$0xff]  }
  0x3a   : > { %2383 = vmatprep.subr.bf16.mxu1 %v2709_v34 }
  0x3c   : > { %2372 = vmatpush3.bf16.msra.mxu0 %v2560_v44  ;;  %v2598_v44 = vld [vmem:[%s3309_s5 + $0x28] ss:$16 sps:$4 sm:$0xff]  }
  0x3d   : > { %2384 = vmatpush3.bf16.msra.mxu1 %v2559_v43  ;;  %2389 = vmatprep.subr.bf16.mxu0 %v2709_v34  ;;  %v2595_v43 = vld [vmem:[%s3309_s5 + $0x20] ss:$16 sps:$4 sm:$0xff]  }
  0x3e   : > { %2401 = vmatprep.subr.bf16.mxu1 %v2709_v34 }
 0x102   : > { %v2248_v45 = vpop.f32.mrb[0].mxu0 }
 0x103   : > { %v2270_v46 = vpop.f32.mrb[0].mxu1  ;;  %v2249_v48 = vpop.f32.mrb[1].mxu0 }
 0x104   : > { %v2250_v49 = vadd.f32 %v2249_v48, %v2248_v45  ;;  %v2271_v50 = vpop.f32.mrb[1].mxu1  ;;  %v2251_v51 = vpop.f32.mrb[2].mxu0  ;;  %v2603_v45 = vld [vmem:[%s3309_s5 + $0x44] ss:$16 sps:$4 sm:$0xff]   ;;  %v2604_v48 = vld [vmem:[%s3309_s5 + $0x48] ss:$16 sps:$4 sm:$0xff]  }
 0x105   : > { %v2272_v52 = vadd.f32 %v2271_v50, %v2270_v46  ;;  %v2273_v53 = vpop.f32.mrb[2].mxu1  ;;  %v2252_v54 = vpop.f32.mrb[3].mxu0  ;;  %v2606_v46 = vld [vmem:[%s3309_s5 + $0x4c] ss:$16 sps:$4 sm:$0xff]  }
 0x106   : > { %v653_v55 = vadd.f32 %v2250_v49, %v2032_v47  ;;  %v2253_v56 = vadd.f32 %v2252_v54, %v2251_v51  ;;  %v2274_v57 = vpop.f32.mrb[3].mxu1  ;;  %v2609_v49 = vld [vmem:[%s3309_s5 + $0x64] ss:$16 sps:$4 sm:$0xff]   ;;  %v2612_v50 = vld [vmem:[%s3309_s5 + $0x6c] ss:$16 sps:$4 sm:$0xff]  }
 0x107   : > { %v2275_v58 = vadd.f32 %v2274_v57, %v2273_v53  ;;  %v2607_v51 = vld [vmem:[%s3309_s5 + $0x60] ss:$16 sps:$4 sm:$0xff]   ;;  %v2711_v53 = vmov 0  }
 0x108   : > { %v694_v59 = vadd.f32 %v2272_v52, %v653_v55  ;;  %v656_v60 = vadd.f32 %v2253_v56, %v2032_v47  ;;  %v2601_v47 = vld [vmem:[%s3309_s5 + $0x40] ss:$16 sps:$4 sm:$0xff]   ;;  %v2610_v52 = vld [vmem:[%s3309_s5 + $0x68] ss:$16 sps:$4 sm:$0xff]  }
 0x109   : > { %v2613_v54 = vld [vmem:[%s3311_s7 + $0x40] sm:$0xff]  }
 0x10a   : > { %v700_v61 = vmax.f32 %v694_v59, 0.0  ;;  %v2953_v62 = vadd.f32 %v2275_v58, %v656_v60  ;;  %v2614_v55 = vld [vmem:[%s3311_s7 + $0xc0] sm:$0xff]  }
 0x10c   : > { %v2958_v0 = vpack.c.bf16 %v700_v61, %v700_v61  ;;  %v701_v36 = vmax.f32 %v2953_v62, 0.0 }
 0x10e   : > { %2386 = vmatmul.mubr.msk.bf16.vlgmr.msra.gmra.mrb[4].mxu1 %vm747_vm1, %v2958_v0  ;;  %v2966_v2 = vshrl.u32 %v2958_v0, 16  ;;  %v867_v12 = vrot.slane %v2958_v0, 1  ;;  %v1023_v22 = vrot.slane %v2958_v0, 2  ;;  %v1179_v31 = vrot.slane %v2958_v0, 3 }
 0x10f   : > { %2402 = vmatpush3.bf16.msra.mxu1 %v2561_v63  ;;  %2409 = vmatprep.mubr.msk.bf16.mxu1 %vm2710_vm0, %v2709_v34  ;;  %v1326_v37 = vpack.c.bf16 %v701_v36, %v701_v36 }
 0x110   : > { %2374 = vmatmul.mubr.msk.bf16.vlgmr.msra.gmra.mrb[4].mxu0 %vm747_vm1, %v2966_v2  ;;  %2403 = vmatprep.subr.bf16.mxu1 %v2709_v34  ;;  %v945_v10 = vrot.slane %v2966_v2, 1  ;;  %v1101_v20 = vrot.slane %v2966_v2, 2  ;;  %v1257_v29 = vrot.slane %v2966_v2, 3 }
 0x111   : > { %2390 = vmatpush3.bf16.msra.mxu0 %v2562_v1  ;;  %2397 = vmatprep.mubr.msk.bf16.mxu0 %vm2710_vm0, %v2709_v34 }
 0x112   : > { %2391 = vmatprep.subr.bf16.mxu0 %v2709_v34 }
 0x113   : > { %2404 = vmatpush3.bf16.msra.mxu1 %v2563_v3 }
 0x114   : > { %2405 = vmatprep.subr.bf16.mxu1 %v2709_v34 }
 0x115   : > { %2392 = vmatpush3.bf16.msra.mxu0 %v2564_v4 }
 0x116   : > { %2393 = vmatprep.subr.bf16.mxu0 %v2709_v34 }
 0x117   : > { %2406 = vmatpush3.bf16.msra.mxu1 %v2565_v5 }
 0x118   : > { %2407 = vmatprep.subr.bf16.mxu1 %v2709_v34 }
 0x119   : > { %2394 = vmatpush3.bf16.msra.mxu0 %v2566_v6 }
 0x11a   : > { %2395 = vmatprep.subr.bf16.mxu0 %v2709_v34 }
 0x11b   : > { %2408 = vmatpush3.bf16.msra.mxu1 %v2567_v7 }
 0x11c   : > { %2425 = vmatprep.subr.bf16.mxu1 %v2709_v34 }
 0x11d   : > { %2396 = vmatpush3.bf16.msra.mxu0 %v2568_v8 }
 0x11e   : > { %2410 = vmatmul.mubr.msk.bf16.vlgmr.msra.gmra.mrb[8].mxu1 %vm747_vm1, %v945_v10  ;;  %2413 = vmatprep.subr.bf16.mxu0 %v2709_v34 }
 0x11f   : > { %2426 = vmatpush3.bf16.msra.mxu1 %v2569_v9  ;;  %2433 = vmatprep.mubr.msk.bf16.mxu1 %vm2710_vm0, %v2709_v34 }
 0x120   : > { %2398 = vmatmul.mubr.msk.bf16.vlgmr.msra.gmra.mrb[8].mxu0 %vm747_vm1, %v867_v12  ;;  %2427 = vmatprep.subr.bf16.mxu1 %v2709_v34 }
 0x121   : > { %2414 = vmatpush3.bf16.msra.mxu0 %v2570_v11  ;;  %2421 = vmatprep.mubr.msk.bf16.mxu0 %vm2710_vm0, %v2709_v34 }
 0x122   : > { %2415 = vmatprep.subr.bf16.mxu0 %v2709_v34 }
 0x123   : > { %2428 = vmatpush3.bf16.msra.mxu1 %v2571_v13 }
 0x124   : > { %2429 = vmatprep.subr.bf16.mxu1 %v2709_v34 }
 0x125   : > { %2416 = vmatpush3.bf16.msra.mxu0 %v2572_v14 }
 0x126   : > { %2417 = vmatprep.subr.bf16.mxu0 %v2709_v34 }
 0x127   : > { %2430 = vmatpush3.bf16.msra.mxu1 %v2573_v15 }
 0x128   : > { %2431 = vmatprep.subr.bf16.mxu1 %v2709_v34 }
 0x129   : > { %2418 = vmatpush3.bf16.msra.mxu0 %v2574_v16 }
 0x12a   : > { %2419 = vmatprep.subr.bf16.mxu0 %v2709_v34 }
 0x12b   : > { %2432 = vmatpush3.bf16.msra.mxu1 %v2575_v17 }
 0x12c   : > { %2449 = vmatprep.subr.bf16.mxu1 %v2709_v34 }
 0x12d   : > { %2420 = vmatpush3.bf16.msra.mxu0 %v2576_v18 }
 0x12e   : > { %2434 = vmatmul.mubr.msk.bf16.vlgmr.msra.gmra.mrb[12].mxu1 %vm747_vm1, %v1101_v20  ;;  %2437 = vmatprep.subr.bf16.mxu0 %v2709_v34 }
 0x12f   : > { %2450 = vmatpush3.bf16.msra.mxu1 %v2577_v19  ;;  %2457 = vmatprep.mubr.msk.bf16.mxu1 %vm2710_vm0, %v2709_v34 }
 0x130   : > { %2422 = vmatmul.mubr.msk.bf16.vlgmr.msra.gmra.mrb[12].mxu0 %vm747_vm1, %v1023_v22  ;;  %2451 = vmatprep.subr.bf16.mxu1 %v2709_v34 }
 0x131   : > { %2438 = vmatpush3.bf16.msra.mxu0 %v2578_v21  ;;  %2445 = vmatprep.mubr.msk.bf16.mxu0 %vm2710_vm0, %v2709_v34 }
 0x132   : > { %2439 = vmatprep.subr.bf16.mxu0 %v2709_v34 }
 0x133   : > { %2452 = vmatpush3.bf16.msra.mxu1 %v2579_v23 }
 0x134   : > { %2453 = vmatprep.subr.bf16.mxu1 %v2709_v34 }
 0x135   : > { %2440 = vmatpush3.bf16.msra.mxu0 %v2580_v24 }
 0x136   : > { %2441 = vmatprep.subr.bf16.mxu0 %v2709_v34 }
 0x137   : > { %2454 = vmatpush3.bf16.msra.mxu1 %v2581_v25 }
 0x138   : > { %2455 = vmatprep.subr.bf16.mxu1 %v2709_v34 }
 0x139   : > { %2442 = vmatpush3.bf16.msra.mxu0 %v2582_v26 }
 0x13a   : > { %2443 = vmatprep.subr.bf16.mxu0 %v2709_v34 }
 0x13b   : > { %2456 = vmatpush3.bf16.msra.mxu1 %v2583_v27 }
 0x13c   : > { %1529 = vmatprep.subr.bf16.mxu1 %v2591_v39 }
 0x13d   : > { %2444 = vmatpush3.bf16.msra.mxu0 %v2584_v28 }
 0x13e   : > { %2458 = vmatmul.mubr.msk.bf16.vlgmr.msra.gmra.mrb[16].mxu1 %vm747_vm1, %v1257_v29  ;;  %2461 = vmatprep.subr.bf16.mxu0 %v2709_v34 }
 0x13f   : > { %1530 = vmatpush1.bf16.msra.mxu1 %v2589_v38  ;;  %1561 = vmatprep.mubr.bf16.mxu1 %v2711_v53 }
 0x140   : > { %2446 = vmatmul.mubr.msk.bf16.vlgmr.msra.gmra.mrb[16].mxu0 %vm747_vm1, %v1179_v31  ;;  %1531 = vmatprep.subr.bf16.mxu1 %v2597_v41 }
 0x141   : > { %2462 = vmatpush3.bf16.msra.mxu0 %v2585_v30  ;;  %2469 = vmatprep.mubr.msk.bf16.mxu0 %vm2710_vm0, %v2709_v34 }
 0x142   : > { %2463 = vmatprep.subr.bf16.mxu0 %v2709_v34 }
 0x143   : > { %1532 = vmatpush1.bf16.msra.mxu1 %v2595_v43  ;;  %v2618_v43 = vld [vmem:[%s3311_s7 + $0xc8] sm:$0xff]  }
 0x144   : > { %1533 = vmatprep.subr.bf16.mxu1 %v2603_v45  ;;  %v2620_v45 = vld [vmem:[%s3311_s7 + $0x88] sm:$0xff]  }
 0x145   : > { %2464 = vmatpush3.bf16.msra.mxu0 %v2586_v32  ;;  %v1404_v32 = vld [vmem:[%s3308_s4] sm:$0x1] }
 0x146   : > { %2465 = vmatprep.subr.bf16.mxu0 %v2709_v34 }
 0x147   : > { %1534 = vmatpush1.bf16.msra.mxu1 %v2601_v47  ;;  %v2622_v47 = vld [vmem:[%s3311_s7 + $0xd0] sm:$0xff]  }
 0x148   : > { %1535 = vmatprep.subr.bf16.mxu1 %v2609_v49  ;;  %v2624_v49 = vld [vmem:[%s3311_s7 + $0x90] sm:$0xff]  }
 0x149   : > { %2466 = vmatpush3.bf16.msra.mxu0 %v2587_v33 }
 0x14a   : > { %2467 = vmatprep.subr.bf16.mxu0 %v2709_v34  ;;  %v2594_v34 = vld [vmem:[%s3309_s5 + $0xc] ss:$16 sps:$4 sm:$0xff]  }
 0x14b   : > { %1536 = vmatpush1.bf16.msra.mxu1 %v2607_v51  ;;  %v2626_v51 = vld [vmem:[%s3311_s7 + $0xd8] sm:$0xff]  }
 0x14c   : > { %2321 = vmatprep.subr.bf16.mxu1 %v2613_v54  ;;  %v2629_v54 = vld [vmem:[%s3311_s7 + $0x60] sm:$0xff]  }
 0x14d   : > { %2468 = vmatpush3.bf16.msra.mxu0 %v2588_v35 }
 0x14e   : > { %1570 = vmatprep.subr.bf16.mxu0 %v2594_v34  ;;  %v2616_v34 = vld [vmem:[%s3311_s7 + $0x80] sm:$0xff]  }
 0x150   : > { %2470 = vmatmul.mubr.msk.bf16.vlgmr.msra.gmra.mrb[20].mxu0 %vm747_vm1, %v1326_v37 }
 0x151   : > { %1571 = vmatpush1.bf16.msra.mxu0 %v2592_v40  ;;  %1602 = vmatprep.mubr.bf16.mxu0 %v2711_v53  ;;  %v2615_v40 = vld [vmem:[%s3311_s7] sm:$0xff]   ;;  %v2628_v53 = vld [vmem:[%s3311_s7 + $0x98] sm:$0xff]  }
 0x152   : > { %1572 = vmatprep.subr.bf16.mxu0 %v2600_v42  ;;  %v2617_v42 = vld [vmem:[%s3311_s7 + $0x48] sm:$0xff]  }
 0x155   : > { %1573 = vmatpush1.bf16.msra.mxu0 %v2598_v44  ;;  %v2619_v44 = vld [vmem:[%s3311_s7 + $0x8] sm:$0xff]  }
 0x156   : > { %1574 = vmatprep.subr.bf16.mxu0 %v2606_v46  ;;  %v2621_v46 = vld [vmem:[%s3311_s7 + $0x50] sm:$0xff]  }
 0x159   : > { %1575 = vmatpush1.bf16.msra.mxu0 %v2604_v48  ;;  %v2623_v48 = vld [vmem:[%s3311_s7 + $0x10] sm:$0xff]  }
 0x15a   : > { %1576 = vmatprep.subr.bf16.mxu0 %v2612_v50  ;;  %v2625_v50 = vld [vmem:[%s3311_s7 + $0x58] sm:$0xff]  }
 0x15d   : > { %1577 = vmatpush1.bf16.msra.mxu0 %v2610_v52  ;;  %v2627_v52 = vld [vmem:[%s3311_s7 + $0x18] sm:$0xff]  }
 0x15e   : > { %2343 = vmatprep.subr.bf16.mxu0 %v2614_v55  ;;  %v2630_v55 = vld [vmem:[%s3311_s7 + $0xe0] sm:$0xff]  }
 0x1e1   : > { %v851_v56 = vpop.f32.mrb[4].mxu1 }
 0x1e2   : > { %v2387_v57 = vpop.f32.mrb[5].mxu1 }
 0x1e3   : > { %v785_v58 = vpop.f32.mrb[4].mxu0  ;;  %v854_v59 = vpop.f32.mrb[6].mxu1  ;;  %v2632_v57 = vld [vmem:[%s3311_s7 + $0xa0] sm:$0xff]  }
 0x1e4   : > { %v852_v60 = vadd.f32 %v851_v56, %v785_v58  ;;  %v2375_v61 = vpop.f32.mrb[5].mxu0  ;;  %v2388_v62 = vpop.f32.mrb[7].mxu1  ;;  %v2631_v56 = vld [vmem:[%s3311_s7 + $0x20] sm:$0xff]   ;;  %v2633_v58 = vld [vmem:[%s3311_s7 + $0x68] sm:$0xff]  }
 0x1e5   : > { %v788_v63 = vpop.f32.mrb[6].mxu0  ;;  %v2634_v59 = vld [vmem:[%s3311_s7 + $0xe8] sm:$0xff]   ;;  %v2637_v62 = vld [vmem:[%s3311_s7 + $0x70] sm:$0xff]  }
 0x1e6   : > { %v2376_v0 = vpop.f32.mrb[7].mxu0  ;;  %v2636_v61 = vld [vmem:[%s3311_s7 + $0xa8] sm:$0xff]   ;;  %v2638_v63 = vld [vmem:[%s3311_s7 + $0xf0] sm:$0xff]  }
 0x1e7   : > { %v2639_v0 = vld [vmem:[%s3311_s7 + $0x30] sm:$0xff]  }
 0x1f1   : > { %v1007_v1 = vpop.f32.mrb[8].mxu1 }
 0x1f2   : > { %v2411_v2 = vpop.f32.mrb[9].mxu1 }
 0x1f3   : > { %v929_v3 = vpop.f32.mrb[8].mxu0  ;;  %v1010_v4 = vpop.f32.mrb[10].mxu1  ;;  %v2641_v2 = vld [vmem:[%s3311_s7 + $0x78] sm:$0xff]  }
 0x1f4   : > { %v935_v5 = vadd.f32 %v929_v3, %v852_v60  ;;  %v2399_v6 = vpop.f32.mrb[9].mxu0  ;;  %v2412_v7 = vpop.f32.mrb[11].mxu1  ;;  %v2635_v60 = vld [vmem:[%s3311_s7 + $0x28] sm:$0xff]   ;;  %v2642_v3 = vld [vmem:[%s3311_s7 + $0xf8] sm:$0xff]  }
 0x1f5   : > { %v932_v8 = vpop.f32.mrb[10].mxu0  ;;  %v2643_v4 = vld [vmem:[%s3311_s7 + $0x38] sm:$0xff]   ;;  %v1506_v6 = vlaneseq }
 0x1f6   : > { %v2400_v9 = vpop.f32.mrb[11].mxu0  ;;  %v1013_v10 = vadd.f32 %v1007_v1, %v935_v5  ;;  %v2640_v1 = vld [vmem:[%s3311_s7 + $0xb0] sm:$0xff]   ;;  %v2644_v5 = vld [vmem:[%s3311_s7 + $0xb8] sm:$0xff]  }
 0x1f7   : > { %v1507_v7 = vshrl.u32 %v1506_v6, 7 }
 0x1f9   : > { %v1508_v8 = vsub.s32 0, %v1507_v7  ;;  %v1516_v9 = vsub.s32 2, %v1507_v7 }
 0x201   : > { %v1163_v11 = vpop.f32.mrb[12].mxu1 }
 0x202   : > { %v2435_v12 = vpop.f32.mrb[13].mxu1 }
 0x203   : > { %v1085_v13 = vpop.f32.mrb[12].mxu0  ;;  %v1166_v14 = vpop.f32.mrb[14].mxu1  ;;  %v1520_v12 = vsub.s32 3, %v1507_v7 }
 0x204   : > { %v1091_v15 = vadd.f32 %v1085_v13, %v1013_v10  ;;  %v2423_v16 = vpop.f32.mrb[13].mxu0  ;;  %v2436_v17 = vpop.f32.mrb[15].mxu1  ;;  %v1424_v10 = vld [vmem:[%s3310_s6] sm:$0xf] }
 0x205   : > { %v1088_v18 = vpop.f32.mrb[14].mxu0  ;;  %v1509_v13 = vrot.slane %v1424_v10, %v1508_v8  ;;  %v1517_v14 = vrot.slane %v1424_v10, %v1516_v9  ;;  %v1521_v16 = vrot.slane %v1424_v10, %v1520_v12 }
 0x206   : > { %v2424_v19 = vpop.f32.mrb[15].mxu0  ;;  %v1169_v20 = vadd.f32 %v1163_v11, %v1091_v15  ;;  %v1512_v11 = vsub.s32 1, %v1507_v7 }
 0x208   : > { %v1513_v15 = vrot.slane %v1424_v10, %v1512_v11 }
 0x211   : > { %v1319_v21 = vpop.f32.mrb[16].mxu1 }
 0x212   : > { %v2459_v22 = vpop.f32.mrb[17].mxu1 }
 0x213   : > { %v1241_v23 = vpop.f32.mrb[16].mxu0  ;;  %v1322_v24 = vpop.f32.mrb[18].mxu1 }
 0x214   : > { %v1247_v25 = vadd.f32 %v1241_v23, %v1169_v20  ;;  %v2447_v26 = vpop.f32.mrb[17].mxu0  ;;  %v2460_v27 = vpop.f32.mrb[19].mxu1 }
 0x215   : > { %v1244_v28 = vpop.f32.mrb[18].mxu0 }
 0x216   : > { %v2448_v29 = vpop.f32.mrb[19].mxu0  ;;  %v1325_v30 = vadd.f32 %v1319_v21, %v1247_v25 }
 0x223   : > { %v1397_v31 = vpop.f32.mrb[20].mxu0 }
 0x224   : > { %v1403_v33 = vadd.f32 %v1397_v31, %v1325_v30  ;;  %v2471_v35 = vpop.f32.mrb[21].mxu0 }
 0x225   : > { %v1400_v36 = vpop.f32.mrb[22].mxu0 }
 0x226   : > { %v1405_v37 = vadd.f32 %v1404_v32, %v1403_v33  ;;  %v2472_v38 = vpop.f32.mrb[23].mxu0 }
 0x228   : > { %v1406_v39 = vmax.f32 %v1405_v37, 0.0 }
 0x22a   : > { %v1407_v41 = vpack.c.bf16 %v1406_v39, %v1406_v39 }
 0x22c   : > { %2194 = vmatmul.mubr.msk.bf16.vlgmr.msra.gmra.mrb[20].mxu1 %vm747_vm1, %v1407_v41  ;;  %2195 = vmatmul.mubr.msk.bf16.vlgmr.msra.gmra.mrb[24].mxu0 %vm747_vm1, %v1407_v41 }
 0x22d   : > { %2322 = vmatpush3.bf16.msra.mxu1 %v2615_v40  ;;  %2344 = vmatpush3.bf16.msra.mxu0 %v2616_v34  ;;  %v1683_v40 = vld [vmem:[%s3312_s8] sm:$0x1] }
 0x22e   : > { %2323 = vmatprep.subr.bf16.mxu1 %v2617_v42  ;;  %2345 = vmatprep.subr.bf16.mxu0 %v2618_v43 }
 0x231   : > { %2324 = vmatpush3.bf16.msra.mxu1 %v2619_v44  ;;  %2346 = vmatpush3.bf16.msra.mxu0 %v2620_v45 }
 0x232   : > { %2325 = vmatprep.subr.bf16.mxu1 %v2621_v46  ;;  %2347 = vmatprep.subr.bf16.mxu0 %v2622_v47 }
 0x235   : > { %2326 = vmatpush3.bf16.msra.mxu1 %v2623_v48  ;;  %2348 = vmatpush3.bf16.msra.mxu0 %v2624_v49 }
 0x236   : > { %2327 = vmatprep.subr.bf16.mxu1 %v2625_v50  ;;  %2349 = vmatprep.subr.bf16.mxu0 %v2626_v51 }
 0x239   : > { %2328 = vmatpush3.bf16.msra.mxu1 %v2627_v52  ;;  %2350 = vmatpush3.bf16.msra.mxu0 %v2628_v53 }
 0x23a   : > { %2329 = vmatprep.subr.bf16.mxu1 %v2629_v54  ;;  %2351 = vmatprep.subr.bf16.mxu0 %v2630_v55 }
 0x23d   : > { %2330 = vmatpush3.bf16.msra.mxu1 %v2631_v56  ;;  %2352 = vmatpush3.bf16.msra.mxu0 %v2632_v57 }
 0x23e   : > { %2331 = vmatprep.subr.bf16.mxu1 %v2633_v58  ;;  %2353 = vmatprep.subr.bf16.mxu0 %v2634_v59 }
 0x241   : > { %2332 = vmatpush3.bf16.msra.mxu1 %v2635_v60  ;;  %2354 = vmatpush3.bf16.msra.mxu0 %v2636_v61 }
 0x242   : > { %2333 = vmatprep.subr.bf16.mxu1 %v2637_v62  ;;  %2355 = vmatprep.subr.bf16.mxu0 %v2638_v63 }
 0x245   : > { %2334 = vmatpush3.bf16.msra.mxu1 %v2639_v0  ;;  %2356 = vmatpush3.bf16.msra.mxu0 %v2640_v1 }
 0x246   : > { %2335 = vmatprep.subr.bf16.mxu1 %v2641_v2  ;;  %2357 = vmatprep.subr.bf16.mxu0 %v2642_v3 }
 0x249   : > { %2336 = vmatpush3.bf16.msra.mxu1 %v2643_v4  ;;  %2358 = vmatpush3.bf16.msra.mxu0 %v2644_v5 }
 0x2ff   : > { %v1563_v17 = vpop.f32.mrb[20].mxu1  ;;  %v1604_v18 = vpop.f32.mrb[24].mxu0 }
 0x300   : > { %v1564_v19 = vadd.f32 %v1563_v17, %v1509_v13  ;;  %v1605_v20 = vadd.f32 %v1604_v18, %v1517_v14  ;;  %v1565_v21 = vpop.f32.mrb[21].mxu1  ;;  %v1606_v22 = vpop.f32.mrb[25].mxu0 }
 0x301   : > { %v1566_v23 = vadd.f32 %v1565_v21, %v1513_v15  ;;  %v1607_v24 = vadd.f32 %v1606_v22, %v1521_v16  ;;  %v1567_v25 = vpop.f32.mrb[22].mxu1  ;;  %v1608_v26 = vpop.f32.mrb[26].mxu0 }
 0x302   : > { %v1611_v27 = vmax.f32 %v1564_v19, 0.0  ;;  %v1613_v28 = vmax.f32 %v1605_v20, 0.0  ;;  %v1568_v29 = vpop.f32.mrb[23].mxu1  ;;  %v1609_v30 = vpop.f32.mrb[27].mxu0 }
 0x303   : > { %v1612_v31 = vmax.f32 %v1566_v23, 0.0  ;;  %v1614_v32 = vmax.f32 %v1607_v24, 0.0 }
 0x304   : > { %v1615_v36 = vpack.c.bf16 %v1611_v27, %v1611_v27  ;;  %v1617_v37 = vpack.c.bf16 %v1613_v28, %v1613_v28 }
 0x305   : > { %v1616_v33 = vpack.c.bf16 %v1612_v31, %v1612_v31  ;;  %v1618_v35 = vpack.c.bf16 %v1614_v32, %v1614_v32 }
 0x307   : > { %1908 = vmatprep.mubr.bf16.mxu1 %v1616_v33  ;;  %1948 = vmatprep.mubr.bf16.mxu0 %v1618_v35 }
 0x308   : > { %1909 = vmatmul.mubr.bf16.vlgmr.msra.gmra.mrb[24].mxu1 %v1615_v36  ;;  %1949 = vmatmul.mubr.bf16.vlgmr.msra.gmra.mrb[28].mxu0 %v1617_v37 }
 0x3db   : > { %v2337_v38 = vpop.f32.mrb[24].mxu1  ;;  %v2359_v39 = vpop.f32.mrb[28].mxu0 }
 0x3dc   : > { %v2338_v34 = vpop.f32.mrb[25].mxu1  ;;  %v2360_v41 = vpop.f32.mrb[29].mxu0 }
 0x3dd   : > { %v2339_v42 = vadd.f32 %v2338_v34, %v2337_v38  ;;  %v2361_v43 = vadd.f32 %v2360_v41, %v2359_v39  ;;  %v2340_v44 = vpop.f32.mrb[26].mxu1  ;;  %v2362_v45 = vpop.f32.mrb[30].mxu0 }
 0x3de   : > { %v2341_v46 = vpop.f32.mrb[27].mxu1  ;;  %v2363_v47 = vpop.f32.mrb[31].mxu0 }
 0x3df   : > { %v1911_v48 = vadd.f32 %v2339_v42, %v1683_v40 }
 0x3e1   : > { %v1951_v49 = vadd.f32 %v2361_v43, %v1911_v48 }
 0x3e3   : > { %1957 = vst.msk [vmem:[%s324_s29] sm:$0x1] %vm1956_vm2, %v1951_v49 }
 0x3e4   : > { %2658 = shalt.err (!%p2655_p3)
}
 0x3e5   : > { %s2659_s25 = scalar_lea.hbm %s3262_s21, 16  ;;  %s2663_s29 = scalar_lea.hbm %s3313_s9, 32 }
 0x3e6   : > { %p2660_p4 = scmp.ne.s32.totalorder %s3262_s21, %s2659_s25  ;;  %p2664_p9 = scmp.lt.u32.totalorder %s3262_s21, %s3313_s9 }
 0x3e7   : > { %p2665_p10 = scmp.lt.u32.totalorder %s2663_s29, %s2659_s25  ;;  %p2667_p12 = scmp.lt.u32.totalorder %s2659_s25, %s3262_s21 }
 0x3e8   : > { %p2661_p7 = pnand %p2660_p4, %p2801_p5 }
 0x3e9   : > { %p2666_p11 = por %p2665_p10, %p2664_p9 }
 0x3ea   : > { %p2662_p8 = pneg %p2661_p7 }
 0x3eb   : > { %p2668_p13 = por %p2667_p12, %p2666_p11 }
 0x3ed   : > { %p2669_p0 = pnand %p2668_p13, %p2662_p8 }
 0x3ef   : > { %2672 = shalt.err (!%p2669_p0)
}
 0x3f0   : > { %2473 = dma.vmem_to_hbm [thread:$0]  (%p2801_p5), %s3264_s14, 16, %s3262_s21, %s1959_s22  }
 0x3f1 PF: > { %p2479_p1 = scmp.ge.s32.totalorder %s2707_s12, 2  ;;  %s1983_s23 = sand.u32 1, %s2695_s30  }
 0x3f2   : > { %s1984_s13 = scalar_lea.sflag [#allocation3], %s1983_s23 }
 0x3f3   : > { %p2476_p2 = pnand %p2479_p1, %p2805_p6 }
 0x3f5   : > { %2690 = dma.done.wait (!%p2476_p2), %s1984_s13, 16  }
 0x3f6   : > { %2692 = vsyncadd (!%p2476_p2), %s1984_s13, 4294967280  ;;  %p19_p3 = scmp.ge.s32.totalorder %s2788_s15, 4   ;;  %s3316_s30 = smov %s2699_s10 }
 0x3f7   : > { %s3317_s10 = smov %s2703_s11  ;;  %s3318_s11 = smov %s2799_s18 }
 0x3f8   : > { %s3319_s12 = smov %s2788_s15  ;;  %21 = sbr.rel (!%p19_p3) target bundleno = 3 (0x3), region = 99 }
 0x3ff   :  { %1988 = vsyncpa [#allocation3], 1 }
 0x400   :  { %1990 = vsyncpa [#allocation3 + $0x1], 1 }

</bundles_post_ra>
